<compile_context>
chip_gen: v5e
topology: v5e:2x2
jax: 0.10.0
libtpu: 0.0.40
codegen_flags: <defaults>
</compile_context>

<pallas_src>
import functools

import jax
import jax.numpy as jnp
import numpy as np
from jax import lax
from jax.experimental import pallas as pl
from jax.experimental.pallas import tpu as pltpu


# ----------------------------------------------------------------------------
# Boundary masks: for tap (dy, dx) zero the output positions whose shifted read
# falls outside the image (exact zero "same" padding). When several images are
# stacked along the lane axis, these same masks also kill cross-image /
# circular-wrap reads from pltpu.roll.
# ----------------------------------------------------------------------------
def make_tap_masks(H, W):
    h = np.repeat(np.arange(H), W)          # flat row index of each spatial pos
    w = np.tile(np.arange(W), H)            # flat col index of each spatial pos
    masks = np.ones((9, 1, H * W), np.float32)
    for t in range(9):
        dy, dx = divmod(t, 3)
        valid = np.ones(H * W, bool)
        if dy == 0:
            valid &= h > 0
        elif dy == 2:
            valid &= h < H - 1
        if dx == 0:
            valid &= w > 0
        elif dx == 2:
            valid &= w < W - 1
        masks[t, 0] = valid
    return masks


# ----------------------------------------------------------------------------
# Fused single-level head kernel: both branches, both layers, one invocation.
# ----------------------------------------------------------------------------
def _fused_level_kernel(x_ref, masks_ref, w1_ref, b1_ref, w2_ref, b2_ref,
                        cls_ref, reg_ref, col_ref, *, img_w, n_cls):
    # x_ref    : (Cin, N)  f32   -- N = bs*H*W, bs images stacked along lanes
    # masks_ref: (9, 1, N) bf16  -- per-tap validity masks (padding / wrap kill)
    # w1_ref   : (C1, 9*Cin) bf16 -- [Wc1; Wr1] stacked rows, BN scale folded in
    # b1_ref   : (C1, 1)   f32   -- folded BN biases (cls then reg)
    # w2_ref   : (C1, 9*C1) bf16 -- block-diag [Wc2 (+) Wr2], BN scale folded in
    # b2_ref   : (C1, 1)   f32
    # cls_ref  : (Ccls, N) f32 ; reg_ref : (Creg, N) f32
    # col_ref  : (9*max_c, N) bf16 scratch -- im2col buffer reused by both layers
    N = x_ref.shape[-1]

    def im2col(a):
        # a: (C, N) f32 activation. Builds tap-major / channel-minor bf16 im2col.
        c = a.shape[0]
        for t in range(9):
            dy, dx = divmod(t, 3)
            off = (dy - 1) * img_w + (dx - 1)      # flat-spatial offset of this tap
            if off == 0:
                p = a.astype(jnp.bfloat16)         # center tap: no shift, no mask
            else:
                # result[p] = a[p + off] (circular, XLU); padded / cross-image /
                # wrapped reads are zeroed by the bf16 mask (packed-bf16 VPU on
                # v6e/v7x; exact since masks are 0/1).
                p = pltpu.roll(a, shift=(-off) % N, axis=1).astype(jnp.bfloat16)
                p = p * masks_ref[t]
            col_ref[t * c:(t + 1) * c, :] = p
        return col_ref[0:9 * c, :]

    def bias_silu(acc, b_ref):
        z = acc + b_ref[...]                       # folded-BN bias (f32, VPU)
        return z * jax.nn.sigmoid(z)               # SiLU (f32, EUP)

    # --- layer 1: ONE shared im2col of x, ONE stacked matmul for cls+reg ------
    col1 = im2col(x_ref[...])
    y1 = bias_silu(jnp.dot(w1_ref[...], col1, preferred_element_type=jnp.float32),
                   b1_ref)                         # (C1, N); rows [0:Ccls)=cls

    # --- layer 2: ONE im2col of the stacked activation, block-diagonal matmul -
    col2 = im2col(y1)
    y2 = bias_silu(jnp.dot(w2_ref[...], col2, preferred_element_type=jnp.float32),
                   b2_ref)

    cls_ref[...] = y2[0:n_cls, :].astype(cls_ref.dtype)
    reg_ref[...] = y2[n_cls:, :].astype(reg_ref.dtype)


def single_level_head_forward(x_nchw, packed):
    """x_nchw: (B, Cin, H, W) f32. Returns (cls (B,Ccls,H,W), reg (B,Creg,H,W))."""
    B, Cin, H, W = x_nchw.shape
    HW = H * W
    assert HW % 128 == 0, "flattened spatial axis must be a multiple of 128 (lane-dense)"
    assert Cin == packed["Cin"]

    Ccls, Creg = packed["Ccls"], packed["Creg"]
    C1 = Ccls + Creg
    max_c = max(Cin, C1)

    # 2-way "parallel" grid over batch halves when possible (both v7x TensorCores);
    # remaining batch is folded onto the lane axis -> one fat (C, bs*H*W) matmul
    # per step (amortizes per-step overhead / widens MXU N on 1-TC v5e/v6e).
    n_steps = 2 if (B >= 2 and B % 2 == 0) else 1
    bs = B // n_steps
    N = bs * HW

    # batch folded onto lanes: (B, Cin, HW) -> (Cin, B*HW), image-major columns.
    x_cl = jnp.transpose(x_nchw.reshape(B, Cin, HW), (1, 0, 2)).reshape(Cin, B * HW)
    masks = jnp.asarray(np.tile(make_tap_masks(H, W), (1, 1, bs)), dtype=jnp.bfloat16)

    # VMEM budget (v7x: 64 MiB physical, ~32 MiB default scoped limit).
    # TODO(synk): for production feature-map sizes add an H*W-tile grid axis with a
    #             +/-W-lane halo for the rolls instead of one full-(bs*H*W) block.
    vmem_est = (2 * Cin * N * 4                    # x block, double-buffered
                + 2 * (Ccls + Creg) * N * 4        # outputs, double-buffered
                + 9 * max_c * N * 2                # im2col scratch
                + 2 * (masks.size * 2 + packed["w1"].size * 2 + packed["w2"].size * 2
                       + packed["b1"].size * 4 + packed["b2"].size * 4))
    assert vmem_est < 28 * 1024 * 1024, f"VMEM estimate {vmem_est}B too large; tile H*W"

    def bcast_spec(a):
        nd = a.ndim
        return pl.BlockSpec(a.shape, lambda g, nd=nd: (0,) * nd)

    cls_cl, reg_cl = pl.pallas_call(
        functools.partial(_fused_level_kernel, img_w=W, n_cls=Ccls),
        out_shape=(jax.ShapeDtypeStruct((Ccls, B * HW), x_nchw.dtype),
                   jax.ShapeDtypeStruct((Creg, B * HW), x_nchw.dtype)),
        grid=(n_steps,),
        in_specs=[pl.BlockSpec((Cin, N), lambda g: (0, g)),
                  bcast_spec(masks),
                  bcast_spec(packed["w1"]), bcast_spec(packed["b1"]),
                  bcast_spec(packed["w2"]), bcast_spec(packed["b2"])],
        out_specs=(pl.BlockSpec((Ccls, N), lambda g: (0, g)),
                   pl.BlockSpec((Creg, N), lambda g: (0, g))),
        scratch_shapes=[pltpu.VMEM((9 * max_c, N), jnp.bfloat16)],
        compiler_params=pltpu.CompilerParams(dimension_semantics=("parallel",)),
    )(x_cl, masks, packed["w1"], packed["b1"], packed["w2"], packed["b2"])

    cls_out = cls_cl.reshape(Ccls, B, H, W).transpose(1, 0, 2, 3)
    reg_out = reg_cl.reshape(Creg, B, H, W).transpose(1, 0, 2, 3)
    return cls_out, reg_out


# ----------------------------------------------------------------------------
# Deterministic parameter construction (shapes match the PyTorch __init__)
# ----------------------------------------------------------------------------
def make_basic_conv_params(key, cin, cout, groups=1, eps=1e-5):
    """BasicConv = Conv2d(3x3, s1, p1, bias=False, groups) -> BN(eval) -> SiLU."""
    k_w, k_g, k_b, k_m, k_v = jax.random.split(key, 5)
    cin_g, cout_g = cin // groups, cout // groups

    # PyTorch Conv2d weight layout: (cout, cin/groups, 3, 3)
    w_torch = 0.05 * jax.random.normal(k_w, (cout, cin_g, 3, 3), dtype=jnp.float32)

    # -> dense HWIO (3, 3, cin, cout); grouped conv as exact block-diagonal weight.
    w_hwio = jnp.zeros((3, 3, cin, cout), dtype=jnp.float32)
    for g in range(groups):
        wg = jnp.transpose(w_torch[g * cout_g:(g + 1) * cout_g], (2, 3, 1, 0))
        w_hwio = w_hwio.at[:, :, g * cin_g:(g + 1) * cin_g,
                           g * cout_g:(g + 1) * cout_g].set(wg)

    # BatchNorm2d (eval mode) folded to per-channel scale/bias, deterministic.
    gamma = 1.0 + 0.1 * jax.random.normal(k_g, (cout,), dtype=jnp.float32)
    beta = 0.1 * jax.random.normal(k_b, (cout,), dtype=jnp.float32)
    r_mean = 0.05 * jax.random.normal(k_m, (cout,), dtype=jnp.float32)
    r_var = jnp.abs(1.0 + 0.1 * jax.random.normal(k_v, (cout,), dtype=jnp.float32))
    scale = gamma / jnp.sqrt(r_var + eps)
    bias = beta - r_mean * scale
    return {"w_hwio": w_hwio, "scale": scale, "bias": bias}


def _folded_hwio_bf16(p):
    # BN scale folded into the conv weight, then cast to the bf16 MXU operand dtype.
    return (p["w_hwio"] * p["scale"].reshape(1, 1, 1, -1)).astype(jnp.bfloat16)


def _mxu_weight(p):
    # (cout, 9*cin) bf16, tap-major / channel-minor columns, BN scale folded in.
    w = _folded_hwio_bf16(p)
    cin, cout = w.shape[2], w.shape[3]
    return w.reshape(9 * cin, cout).T


def pack_level_params(level):
    """Stack the two first-layer convs row-wise and the two second-layer convs
    block-diagonally so each layer is a single MXU matmul in the kernel."""
    pc1, pc2 = level["cls"]
    pr1, pr2 = level["reg"]
    Cin = pc1["w_hwio"].shape[2]
    Ccls = pc1["w_hwio"].shape[3]
    Creg = pr1["w_hwio"].shape[3]
    C1 = Ccls + Creg

    w1 = jnp.concatenate([_mxu_weight(pc1), _mxu_weight(pr1)], axis=0)  # (C1, 9*Cin)
    b1 = jnp.concatenate([pc1["bias"], pr1["bias"]]).reshape(C1, 1)

    wc2, wr2 = _mxu_weight(pc2), _mxu_weight(pr2)   # (Ccls,9*Ccls), (Creg,9*Creg)
    w2 = jnp.zeros((C1, 9 * C1), dtype=jnp.bfloat16)
    for t in range(9):
        w2 = w2.at[0:Ccls, t * C1:t * C1 + Ccls].set(wc2[:, t * Ccls:(t + 1) * Ccls])
        w2 = w2.at[Ccls:, t * C1 + Ccls:(t + 1) * C1].set(wr2[:, t * Creg:(t + 1) * Creg])
    b2 = jnp.concatenate([pc2["bias"], pr2["bias"]]).reshape(C1, 1)

    return {"w1": w1, "b1": b1, "w2": w2, "b2": b2,
            "Cin": Cin, "Ccls": Ccls, "Creg": Creg}


class Cfg:
    num_classes = 8
    reg_max = 4
    num_cls_head = 2
    num_reg_head = 2
    head_act = "silu"
    head_norm = "BN"
    head_depthwise = False
    num_levels = 2


def build_gelan_det_head_params(cfg, in_dims, key):
    cls_head_dim = max(in_dims[0], min(cfg.num_classes * 2, 128))
    reg_head_dim = max(in_dims[0] // 4, 16, 4 * cfg.reg_max)
    levels = []
    for level in range(cfg.num_levels):
        in_dim = in_dims[level]
        cls_convs, reg_convs = [], []
        for i in range(cfg.num_cls_head):
            key, sub = jax.random.split(key)
            cin = in_dim if i == 0 else cls_head_dim
            cls_convs.append(make_basic_conv_params(sub, cin, cls_head_dim, groups=1))
        for i in range(cfg.num_reg_head):
            key, sub = jax.random.split(key)
            cin = in_dim if i == 0 else reg_head_dim
            groups = 1 if i == 0 else 4
            reg_convs.append(make_basic_conv_params(sub, cin, reg_head_dim, groups=groups))
        lvl = {"cls": cls_convs, "reg": reg_convs}
        lvl["packed"] = pack_level_params(lvl)
        levels.append(lvl)
    return levels, cls_head_dim, reg_head_dim


# ----------------------------------------------------------------------------
# Forward pass (Pallas) and pure-JAX reference
# ----------------------------------------------------------------------------
def gelan_det_head_forward(feats_nchw, level_params):
    """feats_nchw: list of (B, C, H, W). Returns (cls_feats, reg_feats), NCHW."""
    cls_outs, reg_outs = [], []
    for x, params in zip(feats_nchw, level_params):
        c, r = single_level_head_forward(x, params["packed"])
        cls_outs.append(c)
        reg_outs.append(r)
    return cls_outs, reg_outs


def _conv_bn_silu_ref(x, p):
    # Same numerics as the kernel: BN scale folded into bf16 MXU weights, f32
    # accumulation, then folded-BN bias add + SiLU in f32.
    y = lax.conv_general_dilated(
        x.astype(jnp.bfloat16), _folded_hwio_bf16(p),
        window_strides=(1, 1), padding="SAME",
        dimension_numbers=("NCHW", "HWIO", "NCHW"),
        preferred_element_type=jnp.float32)
    z = y + p["bias"].reshape(1, -1, 1, 1)
    return z * jax.nn.sigmoid(z)


def gelan_det_head_ref(feats_nchw, level_params):
    cls_outs, reg_outs = [], []
    for x, params in zip(feats_nchw, level_params):
        c = x
        for p in params["cls"]:
            c = _conv_bn_silu_ref(c, p)
        r = x
        for p in params["reg"]:
            r = _conv_bn_silu_ref(r, p)
        cls_outs.append(c)
        reg_outs.append(r)
    return cls_outs, reg_outs


if __name__ == "__main__":
    cfg = Cfg()
    in_dims = [16, 32]                           # per-level input channel dims
    B = 4                                        # even: exercises batch-on-lanes AND
                                                 # the 2-way parallel grid (bs=2/step)
    spatial = [(16, 16), (8, 16)]                # H*W = 256, 128 (multiples of 128)

    key = jax.random.PRNGKey(0)
    key, kp = jax.random.split(key)
    level_params, cls_dim, reg_dim = build_gelan_det_head_params(cfg, in_dims, kp)

    feats = []
    for lvl in range(cfg.num_levels):
        key, kx = jax.random.split(key)
        H, W = spatial[lvl]
        feats.append(jax.random.normal(kx, (B, in_dims[lvl], H, W), dtype=jnp.float32))

    cls_feats, reg_feats = gelan_det_head_forward(feats, level_params)
    jax.block_until_ready(cls_feats)
    jax.block_until_ready(reg_feats)

    # correctness check vs pure-JAX reference (same bf16-operand / f32-accum numerics,
    # also validates the stacked batch-on-lanes layout for B > 1)
    cls_ref, reg_ref = gelan_det_head_ref(feats, level_params)
    for a, b in zip(cls_feats + reg_feats, cls_ref + reg_ref):
        np.testing.assert_allclose(np.asarray(a), np.asarray(b), rtol=1e-3, atol=1e-3)

    # shape sanity: cls -> (B, cls_head_dim, H, W), reg -> (B, reg_head_dim, H, W)
    assert cls_feats[0].shape == (B, cls_dim) + spatial[0]
    assert reg_feats[1].shape == (B, reg_dim) + spatial[1]

    print("KERNEL_OK")
</pallas_src>

<mosaic_0001>
module attributes {stable_mosaic.version = 11 : i64} {
  func.func @_fused_level_kernel(%arg0: i32, %arg1: memref<16x512xf32, #tpu.memory_space<vmem>>, %arg2: memref<9x1x512xbf16, #tpu.memory_space<vmem>>, %arg3: memref<32x144xbf16, #tpu.memory_space<vmem>>, %arg4: memref<32x1xf32, #tpu.memory_space<vmem>>, %arg5: memref<32x288xbf16, #tpu.memory_space<vmem>>, %arg6: memref<32x1xf32, #tpu.memory_space<vmem>>, %arg7: memref<16x512xf32, #tpu.memory_space<vmem>>, %arg8: memref<16x512xf32, #tpu.memory_space<vmem>>, %arg9: memref<288x512xbf16, #tpu.memory_space<vmem>>) attributes {dimension_semantics = [#tpu.dimension_semantics<parallel>], iteration_bounds = array<i64: 2>, scalar_prefetch = 0 : i64, scratch_operands = 1 : i64, tpu.core_type = #tpu.core_type<tc>, window_params = [{transform_indices = @transform_0, window_bounds = array<i64: 16, 512>}, {pipeline_mode = #tpu.pipeline_mode<synchronous>, transform_indices = @transform_1, window_bounds = array<i64: 9, 1, 512>}, {pipeline_mode = #tpu.pipeline_mode<synchronous>, transform_indices = @transform_2, window_bounds = array<i64: 32, 144>}, {pipeline_mode = #tpu.pipeline_mode<synchronous>, transform_indices = @transform_3, window_bounds = array<i64: 32, 1>}, {pipeline_mode = #tpu.pipeline_mode<synchronous>, transform_indices = @transform_4, window_bounds = array<i64: 32, 288>}, {pipeline_mode = #tpu.pipeline_mode<synchronous>, transform_indices = @transform_5, window_bounds = array<i64: 32, 1>}, {transform_indices = @transform_6, window_bounds = array<i64: 16, 512>}, {transform_indices = @transform_7, window_bounds = array<i64: 16, 512>}]} {
    %c0 = arith.constant 0 : index
    %c0_0 = arith.constant 0 : index
    %0 = vector.load %arg1[%c0, %c0_0] : memref<16x512xf32, #tpu.memory_space<vmem>>, vector<16x512xf32>
    %c17_i32 = arith.constant 17 : i32
    %1 = tpu.dynamic_rotate %0 by %c17_i32 dim 1 : vector<16x512xf32>, i32 -> vector<16x512xf32>
    %2 = arith.truncf %1 : vector<16x512xf32> to vector<16x512xbf16>
    %c0_1 = arith.constant 0 : index
    %c0_2 = arith.constant 0 : index
    %c0_3 = arith.constant 0 : index
    %3 = vector.load %arg2[%c0_1, %c0_2, %c0_3] : memref<9x1x512xbf16, #tpu.memory_space<vmem>>, vector<1x1x512xbf16>
    %4 = vector.shape_cast %3 : vector<1x1x512xbf16> to vector<1x512xbf16>
    %5 = vector.broadcast %4 : vector<1x512xbf16> to vector<16x512xbf16>
    %6 = arith.mulf %2, %5 : vector<16x512xbf16>
    %c0_4 = arith.constant 0 : index
    %c0_5 = arith.constant 0 : index
    %7 = vector.load %arg9[%c0_4, %c0_5] : memref<288x512xbf16, #tpu.memory_space<vmem>>, vector<16x512xbf16>
    tpu.vector_store %arg9[%c0_4, %c0_5], %6 {strides = array<i32>} : memref<288x512xbf16, #tpu.memory_space<vmem>>, vector<16x512xbf16>,
    %c16_i32 = arith.constant 16 : i32
    %8 = tpu.dynamic_rotate %0 by %c16_i32 dim 1 : vector<16x512xf32>, i32 -> vector<16x512xf32>
    %9 = arith.truncf %8 : vector<16x512xf32> to vector<16x512xbf16>
    %c1 = arith.constant 1 : index
    %c0_6 = arith.constant 0 : index
    %c0_7 = arith.constant 0 : index
    %10 = vector.load %arg2[%c1, %c0_6, %c0_7] : memref<9x1x512xbf16, #tpu.memory_space<vmem>>, vector<1x1x512xbf16>
    %11 = vector.shape_cast %10 : vector<1x1x512xbf16> to vector<1x512xbf16>
    %12 = vector.broadcast %11 : vector<1x512xbf16> to vector<16x512xbf16>
    %13 = arith.mulf %9, %12 : vector<16x512xbf16>
    %c16 = arith.constant 16 : index
    %c0_8 = arith.constant 0 : index
    %14 = vector.load %arg9[%c16, %c0_8] : memref<288x512xbf16, #tpu.memory_space<vmem>>, vector<16x512xbf16>
    tpu.vector_store %arg9[%c16, %c0_8], %13 {strides = array<i32>} : memref<288x512xbf16, #tpu.memory_space<vmem>>, vector<16x512xbf16>,
    %c15_i32 = arith.constant 15 : i32
    %15 = tpu.dynamic_rotate %0 by %c15_i32 dim 1 : vector<16x512xf32>, i32 -> vector<16x512xf32>
    %16 = arith.truncf %15 : vector<16x512xf32> to vector<16x512xbf16>
    %c2 = arith.constant 2 : index
    %c0_9 = arith.constant 0 : index
    %c0_10 = arith.constant 0 : index
    %17 = vector.load %arg2[%c2, %c0_9, %c0_10] : memref<9x1x512xbf16, #tpu.memory_space<vmem>>, vector<1x1x512xbf16>
    %18 = vector.shape_cast %17 : vector<1x1x512xbf16> to vector<1x512xbf16>
    %19 = vector.broadcast %18 : vector<1x512xbf16> to vector<16x512xbf16>
    %20 = arith.mulf %16, %19 : vector<16x512xbf16>
    %c32 = arith.constant 32 : index
    %c0_11 = arith.constant 0 : index
    %21 = vector.load %arg9[%c32, %c0_11] : memref<288x512xbf16, #tpu.memory_space<vmem>>, vector<16x512xbf16>
    tpu.vector_store %arg9[%c32, %c0_11], %20 {strides = array<i32>} : memref<288x512xbf16, #tpu.memory_space<vmem>>, vector<16x512xbf16>,
    %c1_i32 = arith.constant 1 : i32
    %22 = tpu.dynamic_rotate %0 by %c1_i32 dim 1 : vector<16x512xf32>, i32 -> vector<16x512xf32>
    %23 = arith.truncf %22 : vector<16x512xf32> to vector<16x512xbf16>
    %c3 = arith.constant 3 : index
    %c0_12 = arith.constant 0 : index
    %c0_13 = arith.constant 0 : index
    %24 = vector.load %arg2[%c3, %c0_12, %c0_13] : memref<9x1x512xbf16, #tpu.memory_space<vmem>>, vector<1x1x512xbf16>
    %25 = vector.shape_cast %24 : vector<1x1x512xbf16> to vector<1x512xbf16>
    %26 = vector.broadcast %25 : vector<1x512xbf16> to vector<16x512xbf16>
    %27 = arith.mulf %23, %26 : vector<16x512xbf16>
    %c48 = arith.constant 48 : index
    %c0_14 = arith.constant 0 : index
    %28 = vector.load %arg9[%c48, %c0_14] : memref<288x512xbf16, #tpu.memory_space<vmem>>, vector<16x512xbf16>
    tpu.vector_store %arg9[%c48, %c0_14], %27 {strides = array<i32>} : memref<288x512xbf16, #tpu.memory_space<vmem>>, vector<16x512xbf16>,
    %29 = arith.truncf %0 : vector<16x512xf32> to vector<16x512xbf16>
    %c64 = arith.constant 64 : index
    %c0_15 = arith.constant 0 : index
    %30 = vector.load %arg9[%c64, %c0_15] : memref<288x512xbf16, #tpu.memory_space<vmem>>, vector<16x512xbf16>
    tpu.vector_store %arg9[%c64, %c0_15], %29 {strides = array<i32>} : memref<288x512xbf16, #tpu.memory_space<vmem>>, vector<16x512xbf16>,
    %c511_i32 = arith.constant 511 : i32
    %31 = tpu.dynamic_rotate %0 by %c511_i32 dim 1 : vector<16x512xf32>, i32 -> vector<16x512xf32>
    %32 = arith.truncf %31 : vector<16x512xf32> to vector<16x512xbf16>
    %c5 = arith.constant 5 : index
    %c0_16 = arith.constant 0 : index
    %c0_17 = arith.constant 0 : index
    %33 = vector.load %arg2[%c5, %c0_16, %c0_17] : memref<9x1x512xbf16, #tpu.memory_space<vmem>>, vector<1x1x512xbf16>
    %34 = vector.shape_cast %33 : vector<1x1x512xbf16> to vector<1x512xbf16>
    %35 = vector.broadcast %34 : vector<1x512xbf16> to vector<16x512xbf16>
    %36 = arith.mulf %32, %35 : vector<16x512xbf16>
    %c80 = arith.constant 80 : index
    %c0_18 = arith.constant 0 : index
    %37 = vector.load %arg9[%c80, %c0_18] : memref<288x512xbf16, #tpu.memory_space<vmem>>, vector<16x512xbf16>
    tpu.vector_store %arg9[%c80, %c0_18], %36 {strides = array<i32>} : memref<288x512xbf16, #tpu.memory_space<vmem>>, vector<16x512xbf16>,
    %c497_i32 = arith.constant 497 : i32
    %38 = tpu.dynamic_rotate %0 by %c497_i32 dim 1 : vector<16x512xf32>, i32 -> vector<16x512xf32>
    %39 = arith.truncf %38 : vector<16x512xf32> to vector<16x512xbf16>
    %c6 = arith.constant 6 : index
    %c0_19 = arith.constant 0 : index
    %c0_20 = arith.constant 0 : index
    %40 = vector.load %arg2[%c6, %c0_19, %c0_20] : memref<9x1x512xbf16, #tpu.memory_space<vmem>>, vector<1x1x512xbf16>
    %41 = vector.shape_cast %40 : vector<1x1x512xbf16> to vector<1x512xbf16>
    %42 = vector.broadcast %41 : vector<1x512xbf16> to vector<16x512xbf16>
    %43 = arith.mulf %39, %42 : vector<16x512xbf16>
    %c96 = arith.constant 96 : index
    %c0_21 = arith.constant 0 : index
    %44 = vector.load %arg9[%c96, %c0_21] : memref<288x512xbf16, #tpu.memory_space<vmem>>, vector<16x512xbf16>
    tpu.vector_store %arg9[%c96, %c0_21], %43 {strides = array<i32>} : memref<288x512xbf16, #tpu.memory_space<vmem>>, vector<16x512xbf16>,
    %c496_i32 = arith.constant 496 : i32
    %45 = tpu.dynamic_rotate %0 by %c496_i32 dim 1 : vector<16x512xf32>, i32 -> vector<16x512xf32>
    %46 = arith.truncf %45 : vector<16x512xf32> to vector<16x512xbf16>
    %c7 = arith.constant 7 : index
    %c0_22 = arith.constant 0 : index
    %c0_23 = arith.constant 0 : index
    %47 = vector.load %arg2[%c7, %c0_22, %c0_23] : memref<9x1x512xbf16, #tpu.memory_space<vmem>>, vector<1x1x512xbf16>
    %48 = vector.shape_cast %47 : vector<1x1x512xbf16> to vector<1x512xbf16>
    %49 = vector.broadcast %48 : vector<1x512xbf16> to vector<16x512xbf16>
    %50 = arith.mulf %46, %49 : vector<16x512xbf16>
    %c112 = arith.constant 112 : index
    %c0_24 = arith.constant 0 : index
    %51 = vector.load %arg9[%c112, %c0_24] : memref<288x512xbf16, #tpu.memory_space<vmem>>, vector<16x512xbf16>
    tpu.vector_store %arg9[%c112, %c0_24], %50 {strides = array<i32>} : memref<288x512xbf16, #tpu.memory_space<vmem>>, vector<16x512xbf16>,
    %c495_i32 = arith.constant 495 : i32
    %52 = tpu.dynamic_rotate %0 by %c495_i32 dim 1 : vector<16x512xf32>, i32 -> vector<16x512xf32>
    %53 = arith.truncf %52 : vector<16x512xf32> to vector<16x512xbf16>
    %c8 = arith.constant 8 : index
    %c0_25 = arith.constant 0 : index
    %c0_26 = arith.constant 0 : index
    %54 = vector.load %arg2[%c8, %c0_25, %c0_26] : memref<9x1x512xbf16, #tpu.memory_space<vmem>>, vector<1x1x512xbf16>
    %55 = vector.shape_cast %54 : vector<1x1x512xbf16> to vector<1x512xbf16>
    %56 = vector.broadcast %55 : vector<1x512xbf16> to vector<16x512xbf16>
    %57 = arith.mulf %53, %56 : vector<16x512xbf16>
    %c128 = arith.constant 128 : index
    %c0_27 = arith.constant 0 : index
    %58 = vector.load %arg9[%c128, %c0_27] : memref<288x512xbf16, #tpu.memory_space<vmem>>, vector<16x512xbf16>
    tpu.vector_store %arg9[%c128, %c0_27], %57 {strides = array<i32>} : memref<288x512xbf16, #tpu.memory_space<vmem>>, vector<16x512xbf16>,
    %c0_28 = arith.constant 0 : index
    %c0_29 = arith.constant 0 : index
    %59 = vector.load %arg9[%c0_28, %c0_29] : memref<288x512xbf16, #tpu.memory_space<vmem>>, vector<144x512xbf16>
    %c0_30 = arith.constant 0 : index
    %c0_31 = arith.constant 0 : index
    %60 = vector.load %arg3[%c0_30, %c0_31] : memref<32x144xbf16, #tpu.memory_space<vmem>>, vector<32x144xbf16>
    %cst = arith.constant dense<0.000000e+00> : vector<32x512xf32>
    %61 = tpu.matmul %60, %59, %cst {dimension_numbers = #tpu.dot_dimension_numbers<[1], [0], [0], [1], [0, 0, 1, 1], [], []>} : vector<32x144xbf16>, vector<144x512xbf16>, vector<32x512xf32> -> vector<32x512xf32>
    %c0_32 = arith.constant 0 : index
    %c0_33 = arith.constant 0 : index
    %62 = vector.load %arg4[%c0_32, %c0_33] : memref<32x1xf32, #tpu.memory_space<vmem>>, vector<32x1xf32>
    %63 = vector.broadcast %62 : vector<32x1xf32> to vector<32x512xf32>
    %64 = arith.addf %61, %63 : vector<32x512xf32>
    %65 = arith.negf %64 : vector<32x512xf32>
    %66 = math.exp %65 : vector<32x512xf32>
    %cst_34 = arith.constant 1.000000e+00 : f32
    %67 = vector.broadcast %cst_34 : f32 to vector<32x512xf32>
    %68 = arith.addf %67, %66 : vector<32x512xf32>
    %69 = arith.divf %67, %68 : vector<32x512xf32>
    %70 = arith.mulf %64, %69 : vector<32x512xf32>
    %c17_i32_35 = arith.constant 17 : i32
    %71 = tpu.dynamic_rotate %70 by %c17_i32_35 dim 1 : vector<32x512xf32>, i32 -> vector<32x512xf32>
    %72 = arith.truncf %71 : vector<32x512xf32> to vector<32x512xbf16>
    %c0_36 = arith.constant 0 : index
    %c0_37 = arith.constant 0 : index
    %c0_38 = arith.constant 0 : index
    %73 = vector.load %arg2[%c0_36, %c0_37, %c0_38] : memref<9x1x512xbf16, #tpu.memory_space<vmem>>, vector<1x1x512xbf16>
    %74 = vector.shape_cast %73 : vector<1x1x512xbf16> to vector<1x512xbf16>
    %75 = vector.broadcast %74 : vector<1x512xbf16> to vector<32x512xbf16>
    %76 = arith.mulf %72, %75 : vector<32x512xbf16>
    %c0_39 = arith.constant 0 : index
    %c0_40 = arith.constant 0 : index
    %77 = vector.load %arg9[%c0_39, %c0_40] : memref<288x512xbf16, #tpu.memory_space<vmem>>, vector<32x512xbf16>
    tpu.vector_store %arg9[%c0_39, %c0_40], %76 {strides = array<i32>} : memref<288x512xbf16, #tpu.memory_space<vmem>>, vector<32x512xbf16>,
    %c16_i32_41 = arith.constant 16 : i32
    %78 = tpu.dynamic_rotate %70 by %c16_i32_41 dim 1 : vector<32x512xf32>, i32 -> vector<32x512xf32>
    %79 = arith.truncf %78 : vector<32x512xf32> to vector<32x512xbf16>
    %c1_42 = arith.constant 1 : index
    %c0_43 = arith.constant 0 : index
    %c0_44 = arith.constant 0 : index
    %80 = vector.load %arg2[%c1_42, %c0_43, %c0_44] : memref<9x1x512xbf16, #tpu.memory_space<vmem>>, vector<1x1x512xbf16>
    %81 = vector.shape_cast %80 : vector<1x1x512xbf16> to vector<1x512xbf16>
    %82 = vector.broadcast %81 : vector<1x512xbf16> to vector<32x512xbf16>
    %83 = arith.mulf %79, %82 : vector<32x512xbf16>
    %c32_45 = arith.constant 32 : index
    %c0_46 = arith.constant 0 : index
    %84 = vector.load %arg9[%c32_45, %c0_46] : memref<288x512xbf16, #tpu.memory_space<vmem>>, vector<32x512xbf16>
    tpu.vector_store %arg9[%c32_45, %c0_46], %83 {strides = array<i32>} : memref<288x512xbf16, #tpu.memory_space<vmem>>, vector<32x512xbf16>,
    %c15_i32_47 = arith.constant 15 : i32
    %85 = tpu.dynamic_rotate %70 by %c15_i32_47 dim 1 : vector<32x512xf32>, i32 -> vector<32x512xf32>
    %86 = arith.truncf %85 : vector<32x512xf32> to vector<32x512xbf16>
    %c2_48 = arith.constant 2 : index
    %c0_49 = arith.constant 0 : index
    %c0_50 = arith.constant 0 : index
    %87 = vector.load %arg2[%c2_48, %c0_49, %c0_50] : memref<9x1x512xbf16, #tpu.memory_space<vmem>>, vector<1x1x512xbf16>
    %88 = vector.shape_cast %87 : vector<1x1x512xbf16> to vector<1x512xbf16>
    %89 = vector.broadcast %88 : vector<1x512xbf16> to vector<32x512xbf16>
    %90 = arith.mulf %86, %89 : vector<32x512xbf16>
    %c64_51 = arith.constant 64 : index
    %c0_52 = arith.constant 0 : index
    %91 = vector.load %arg9[%c64_51, %c0_52] : memref<288x512xbf16, #tpu.memory_space<vmem>>, vector<32x512xbf16>
    tpu.vector_store %arg9[%c64_51, %c0_52], %90 {strides = array<i32>} : memref<288x512xbf16, #tpu.memory_space<vmem>>, vector<32x512xbf16>,
    %c1_i32_53 = arith.constant 1 : i32
    %92 = tpu.dynamic_rotate %70 by %c1_i32_53 dim 1 : vector<32x512xf32>, i32 -> vector<32x512xf32>
    %93 = arith.truncf %92 : vector<32x512xf32> to vector<32x512xbf16>
    %c3_54 = arith.constant 3 : index
    %c0_55 = arith.constant 0 : index
    %c0_56 = arith.constant 0 : index
    %94 = vector.load %arg2[%c3_54, %c0_55, %c0_56] : memref<9x1x512xbf16, #tpu.memory_space<vmem>>, vector<1x1x512xbf16>
    %95 = vector.shape_cast %94 : vector<1x1x512xbf16> to vector<1x512xbf16>
    %96 = vector.broadcast %95 : vector<1x512xbf16> to vector<32x512xbf16>
    %97 = arith.mulf %93, %96 : vector<32x512xbf16>
    %c96_57 = arith.constant 96 : index
    %c0_58 = arith.constant 0 : index
    %98 = vector.load %arg9[%c96_57, %c0_58] : memref<288x512xbf16, #tpu.memory_space<vmem>>, vector<32x512xbf16>
    tpu.vector_store %arg9[%c96_57, %c0_58], %97 {strides = array<i32>} : memref<288x512xbf16, #tpu.memory_space<vmem>>, vector<32x512xbf16>,
    %99 = arith.truncf %70 : vector<32x512xf32> to vector<32x512xbf16>
    %c128_59 = arith.constant 128 : index
    %c0_60 = arith.constant 0 : index
    %100 = vector.load %arg9[%c128_59, %c0_60] : memref<288x512xbf16, #tpu.memory_space<vmem>>, vector<32x512xbf16>
    tpu.vector_store %arg9[%c128_59, %c0_60], %99 {strides = array<i32>} : memref<288x512xbf16, #tpu.memory_space<vmem>>, vector<32x512xbf16>,
    %c511_i32_61 = arith.constant 511 : i32
    %101 = tpu.dynamic_rotate %70 by %c511_i32_61 dim 1 : vector<32x512xf32>, i32 -> vector<32x512xf32>
    %102 = arith.truncf %101 : vector<32x512xf32> to vector<32x512xbf16>
    %c5_62 = arith.constant 5 : index
    %c0_63 = arith.constant 0 : index
    %c0_64 = arith.constant 0 : index
    %103 = vector.load %arg2[%c5_62, %c0_63, %c0_64] : memref<9x1x512xbf16, #tpu.memory_space<vmem>>, vector<1x1x512xbf16>
    %104 = vector.shape_cast %103 : vector<1x1x512xbf16> to vector<1x512xbf16>
    %105 = vector.broadcast %104 : vector<1x512xbf16> to vector<32x512xbf16>
    %106 = arith.mulf %102, %105 : vector<32x512xbf16>
    %c160 = arith.constant 160 : index
    %c0_65 = arith.constant 0 : index
    %107 = vector.load %arg9[%c160, %c0_65] : memref<288x512xbf16, #tpu.memory_space<vmem>>, vector<32x512xbf16>
    tpu.vector_store %arg9[%c160, %c0_65], %106 {strides = array<i32>} : memref<288x512xbf16, #tpu.memory_space<vmem>>, vector<32x512xbf16>,
    %c497_i32_66 = arith.constant 497 : i32
    %108 = tpu.dynamic_rotate %70 by %c497_i32_66 dim 1 : vector<32x512xf32>, i32 -> vector<32x512xf32>
    %109 = arith.truncf %108 : vector<32x512xf32> to vector<32x512xbf16>
    %c6_67 = arith.constant 6 : index
    %c0_68 = arith.constant 0 : index
    %c0_69 = arith.constant 0 : index
    %110 = vector.load %arg2[%c6_67, %c0_68, %c0_69] : memref<9x1x512xbf16, #tpu.memory_space<vmem>>, vector<1x1x512xbf16>
    %111 = vector.shape_cast %110 : vector<1x1x512xbf16> to vector<1x512xbf16>
    %112 = vector.broadcast %111 : vector<1x512xbf16> to vector<32x512xbf16>
    %113 = arith.mulf %109, %112 : vector<32x512xbf16>
    %c192 = arith.constant 192 : index
    %c0_70 = arith.constant 0 : index
    %114 = vector.load %arg9[%c192, %c0_70] : memref<288x512xbf16, #tpu.memory_space<vmem>>, vector<32x512xbf16>
    tpu.vector_store %arg9[%c192, %c0_70], %113 {strides = array<i32>} : memref<288x512xbf16, #tpu.memory_space<vmem>>, vector<32x512xbf16>,
    %c496_i32_71 = arith.constant 496 : i32
    %115 = tpu.dynamic_rotate %70 by %c496_i32_71 dim 1 : vector<32x512xf32>, i32 -> vector<32x512xf32>
    %116 = arith.truncf %115 : vector<32x512xf32> to vector<32x512xbf16>
    %c7_72 = arith.constant 7 : index
    %c0_73 = arith.constant 0 : index
    %c0_74 = arith.constant 0 : index
    %117 = vector.load %arg2[%c7_72, %c0_73, %c0_74] : memref<9x1x512xbf16, #tpu.memory_space<vmem>>, vector<1x1x512xbf16>
    %118 = vector.shape_cast %117 : vector<1x1x512xbf16> to vector<1x512xbf16>
    %119 = vector.broadcast %118 : vector<1x512xbf16> to vector<32x512xbf16>
    %120 = arith.mulf %116, %119 : vector<32x512xbf16>
    %c224 = arith.constant 224 : index
    %c0_75 = arith.constant 0 : index
    %121 = vector.load %arg9[%c224, %c0_75] : memref<288x512xbf16, #tpu.memory_space<vmem>>, vector<32x512xbf16>
    tpu.vector_store %arg9[%c224, %c0_75], %120 {strides = array<i32>} : memref<288x512xbf16, #tpu.memory_space<vmem>>, vector<32x512xbf16>,
    %c495_i32_76 = arith.constant 495 : i32
    %122 = tpu.dynamic_rotate %70 by %c495_i32_76 dim 1 : vector<32x512xf32>, i32 -> vector<32x512xf32>
    %123 = arith.truncf %122 : vector<32x512xf32> to vector<32x512xbf16>
    %c8_77 = arith.constant 8 : index
    %c0_78 = arith.constant 0 : index
    %c0_79 = arith.constant 0 : index
    %124 = vector.load %arg2[%c8_77, %c0_78, %c0_79] : memref<9x1x512xbf16, #tpu.memory_space<vmem>>, vector<1x1x512xbf16>
    %125 = vector.shape_cast %124 : vector<1x1x512xbf16> to vector<1x512xbf16>
    %126 = vector.broadcast %125 : vector<1x512xbf16> to vector<32x512xbf16>
    %127 = arith.mulf %123, %126 : vector<32x512xbf16>
    %c256 = arith.constant 256 : index
    %c0_80 = arith.constant 0 : index
    %128 = vector.load %arg9[%c256, %c0_80] : memref<288x512xbf16, #tpu.memory_space<vmem>>, vector<32x512xbf16>
    tpu.vector_store %arg9[%c256, %c0_80], %127 {strides = array<i32>} : memref<288x512xbf16, #tpu.memory_space<vmem>>, vector<32x512xbf16>,
    %c0_81 = arith.constant 0 : index
    %c0_82 = arith.constant 0 : index
    %129 = vector.load %arg9[%c0_81, %c0_82] : memref<288x512xbf16, #tpu.memory_space<vmem>>, vector<288x512xbf16>
    %c0_83 = arith.constant 0 : index
    %c0_84 = arith.constant 0 : index
    %130 = vector.load %arg5[%c0_83, %c0_84] : memref<32x288xbf16, #tpu.memory_space<vmem>>, vector<32x288xbf16>
    %cst_85 = arith.constant dense<0.000000e+00> : vector<32x512xf32>
    %131 = tpu.matmul %130, %129, %cst_85 {dimension_numbers = #tpu.dot_dimension_numbers<[1], [0], [0], [1], [0, 0, 1, 1], [], []>} : vector<32x288xbf16>, vector<288x512xbf16>, vector<32x512xf32> -> vector<32x512xf32>
    %c0_86 = arith.constant 0 : index
    %c0_87 = arith.constant 0 : index
    %132 = vector.load %arg6[%c0_86, %c0_87] : memref<32x1xf32, #tpu.memory_space<vmem>>, vector<32x1xf32>
    %133 = vector.broadcast %132 : vector<32x1xf32> to vector<32x512xf32>
    %134 = arith.addf %131, %133 : vector<32x512xf32>
    %135 = arith.negf %134 : vector<32x512xf32>
    %136 = math.exp %135 : vector<32x512xf32>
    %cst_88 = arith.constant 1.000000e+00 : f32
    %137 = vector.broadcast %cst_88 : f32 to vector<32x512xf32>
    %138 = arith.addf %137, %136 : vector<32x512xf32>
    %139 = arith.divf %137, %138 : vector<32x512xf32>
    %140 = arith.mulf %134, %139 : vector<32x512xf32>
    %141 = vector.extract_strided_slice %140 {offsets = [0, 0], sizes = [16, 512], strides = [1, 1]} : vector<32x512xf32> to vector<16x512xf32>
    %c0_89 = arith.constant 0 : index
    %c0_90 = arith.constant 0 : index
    %142 = vector.load %arg7[%c0_89, %c0_90] : memref<16x512xf32, #tpu.memory_space<vmem>>, vector<16x512xf32>
    tpu.vector_store %arg7[%c0_89, %c0_90], %141 {strides = array<i32>} : memref<16x512xf32, #tpu.memory_space<vmem>>, vector<16x512xf32>,
    %143 = vector.extract_strided_slice %140 {offsets = [16, 0], sizes = [16, 512], strides = [1, 1]} : vector<32x512xf32> to vector<16x512xf32>
    %c0_91 = arith.constant 0 : index
    %c0_92 = arith.constant 0 : index
    %144 = vector.load %arg8[%c0_91, %c0_92] : memref<16x512xf32, #tpu.memory_space<vmem>>, vector<16x512xf32>
    tpu.vector_store %arg8[%c0_91, %c0_92], %143 {strides = array<i32>} : memref<16x512xf32, #tpu.memory_space<vmem>>, vector<16x512xf32>,
    return
  }
  func.func @transform_0(%arg0: i32) -> (i32, i32) {
    %c0_i32 = arith.constant 0 : i32
    %c0_i32_0 = arith.constant 0 : i32
    return %c0_i32, %arg0 : i32, i32
  }
  func.func @transform_1(%arg0: i32) -> (i32, i32, i32) {
    %c0_i32 = arith.constant 0 : i32
    %c0_i32_0 = arith.constant 0 : i32
    %c0_i32_1 = arith.constant 0 : i32
    %c0_i32_2 = arith.constant 0 : i32
    return %c0_i32, %c0_i32_0, %c0_i32_1 : i32, i32, i32
  }
  func.func @transform_2(%arg0: i32) -> (i32, i32) {
    %c0_i32 = arith.constant 0 : i32
    %c0_i32_0 = arith.constant 0 : i32
    %c0_i32_1 = arith.constant 0 : i32
    return %c0_i32, %c0_i32_0 : i32, i32
  }
  func.func @transform_3(%arg0: i32) -> (i32, i32) {
    %c0_i32 = arith.constant 0 : i32
    %c0_i32_0 = arith.constant 0 : i32
    %c0_i32_1 = arith.constant 0 : i32
    return %c0_i32, %c0_i32_0 : i32, i32
  }
  func.func @transform_4(%arg0: i32) -> (i32, i32) {
    %c0_i32 = arith.constant 0 : i32
    %c0_i32_0 = arith.constant 0 : i32
    %c0_i32_1 = arith.constant 0 : i32
    return %c0_i32, %c0_i32_0 : i32, i32
  }
  func.func @transform_5(%arg0: i32) -> (i32, i32) {
    %c0_i32 = arith.constant 0 : i32
    %c0_i32_0 = arith.constant 0 : i32
    %c0_i32_1 = arith.constant 0 : i32
    return %c0_i32, %c0_i32_0 : i32, i32
  }
  func.func @transform_6(%arg0: i32) -> (i32, i32) {
    %c0_i32 = arith.constant 0 : i32
    %c0_i32_0 = arith.constant 0 : i32
    return %c0_i32, %arg0 : i32, i32
  }
  func.func @transform_7(%arg0: i32) -> (i32, i32) {
    %c0_i32 = arith.constant 0 : i32
    %c0_i32_0 = arith.constant 0 : i32
    return %c0_i32, %arg0 : i32, i32
  }
}

</mosaic_0001>

<bundles_post_ra>
// kernel: tpu_custom_call.1
= control target key start
LH: loop header
LB: loop body
LE: loop exit
PB: predicated region body
PF: predicated region fallthrough
CT: control target
= control target key end

     0   :  { %13 = vsyncpa [#allocation4], 0  ;;  %s8376_s0 = inlined_call_operand.hbm [shape: f32[16,1024], index: 0, kind: input, shape index: {}]   ;;  %s8377_s1 = inlined_call_operand.vmem [shape: bf16[9,1,512], index: 1, kind: input, shape index: {}]   ;;  %s8378_s2 = inlined_call_operand.vmem [shape: bf16[32,144], index: 2, kind: input, shape index: {}]   ;;  %s8379_s3 = inlined_call_operand.vmem [shape: f32[32,1], index: 3, kind: input, shape index: {}]   ;;  %s8380_s4 = inlined_call_operand.vmem [shape: bf16[32,288], index: 4, kind: input, shape index: {}]   ;;  %s8381_s5 = inlined_call_operand.vmem [shape: f32[32,1], index: 5, kind: input, shape index: {}]   ;;  %s8382_s6 = inlined_call_operand.hbm [shape: f32[16,1024], index: 6, kind: output, shape index: {0}]   ;;  %s8383_s7 = inlined_call_operand.hbm [shape: f32[16,1024], index: 7, kind: output, shape index: {1}]  }
   0x1   :  { %15 = vsyncpa [#allocation4 + $0x1], 0 }
   0x2   :  { %16 = vsyncpa [#allocation5], 0 }
   0x3   :  { %18 = vsyncpa [#allocation5 + $0x1], 0 }
   0x4   :  { %19 = vsyncpa [#allocation8], 0 }
   0x5   :  { %21 = vsyncpa [#allocation8 + $0x1], 0  ;;  %s5478_s24 = smov 0   ;;  %s5480_s25 = smov 0  }
   0x6   :  { %s5482_s26 = smov 0   ;;  %s5484_s27 = smov 0  }
   0x7 LB: > { %s5499_s28 = sadd.s32 4294967295, %s5421_s27   ;;  %s3929_s29 = sadd.s32 4294967294, %s5421_s27   ;;  %s5421_s27 = sphi %s5484_s27, %s8785_s27   ;;  %s5417_s26 = sphi %s5482_s26, %s8784_s26   ;;  %s5413_s25 = sphi %s5480_s25, %s8783_s25   ;;  %s5409_s24 = sphi %s5478_s24, %s8782_s24  }
   0x8   : > { %s5503_s30 = sadd.s32 1, %s5421_s27   ;;  %s34_s8 = sadd.s32 1, %s5417_s26 }
   0x9   : > { %s31_s9 = ssub.s32 %s5421_s27, %s5503_s30  ;;  %p41_p0 = scmp.ne.s32.totalorder %s5417_s26, %s5413_s25 }
   0xa   : > { %p32_p1 = scmp.eq.s32.totalorder %s31_s9, 0  ;;  %p42_p2 = scmp.eq.s32.totalorder %s5421_s27, 0 }
   0xb   : > { %p47_p3 = scmp.ne.s32.totalorder %s5413_s25, %s5409_s24  ;;  %p48_p4 = scmp.eq.s32.totalorder %s5499_s28, 0 }
   0xc   : > { %s5515_s10 = scalar_select %p32_p1, %s5417_s26, %s34_s8  }
   0xd   : > { %p5517_p5 = por %p42_p2, %p41_p0  ;;  %p5521_p6 = por %p48_p4, %p47_p3 }
   0xe   : > { %8500 = sst [smem:[#allocation12_spill]] %s5515_s10  ;;  %p176_p7 = scmp.eq.s32.totalorder %s5499_s28, 1 }
   0xf   : > { %p182_p8 = scmp.eq.s32.totalorder %s3929_s29, 1  ;;  %p3931_p9 = scmp.ge.s32.totalorder %s5421_s27, 2 }
  0x10   : > { %p4629_p10 = scmp.lt.s32.totalorder %s5421_s27, 2  ;;  %p5528_p11 = por %p176_p7, %p41_p0 }
  0x11   : > { %p5532_p12 = por %p182_p8, %p47_p3  ;;  %s243_s15 = sand.u32 1, %s5417_s26  }
  0x12   : > { %s4481_s16 = sshll.u32 %s5421_s27, 5  ;;  %s3932_s17 = sshll.u32 %s243_s15, 6 }
  0x13   : > { %s252_s20 = scalar_lea.hbm %s8376_s0, %s4481_s16  ;;  %s247_s22 = scalar_lea.vmem [#allocation3], %s3932_s17 }
  0x14   : > { %s253_s21 = sshll.u32 %s252_s20, 4  ;;  %s255_s23 = sshll.u32 %s247_s22, 4  ;;  %s254_s21 = int_to_ptr.hbm [resolvable:$true] %s253_s21  ;;  %s256_s23 = int_to_ptr.vmem [resolvable:$true] %s255_s23 }
  0x15   : > { %p5543_p13 = pnand %p4629_p10, %p5517_p5  ;;  %p3935_p0 = scmp.ge.s32.totalorder %s5421_s27, 1 }
  0x16   : > { %s244_s8 = scalar_lea.sflag [#allocation4], %s243_s15  ;;  %s5293_s9 = sshra.s32 %s254_s21, 4  ;;  %s5294_s9 = int_to_ptr.hbm [resolvable:$true] %s5293_s9 }
  0x17   : > { %s5295_s10 = scalar_lea.hbm %s5294_s9, 64  ;;  %p5297_p2 = pneg %p5543_p13 }
  0x18   : > { %p5296_p1 = scmp.ne.s32.totalorder %s5294_s9, %s5295_s10  ;;  %s5300_s18 = scalar_lea.hbm %s8376_s0, 128 }
  0x19   : > { %p5301_p5 = scmp.lt.s32.totalorder %s5294_s9, %s8376_s0  ;;  %p5302_p7 = scmp.lt.s32.totalorder %s5300_s18, %s5295_s10 }
  0x1a   : > { %p5298_p3 = pnand %p5297_p2, %p5296_p1 }
  0x1b   : > { %p5303_p8 = por %p5302_p7, %p5301_p5 }
  0x1c   : > { %p5299_p4 = pneg %p5298_p3 }
  0x1e   : > { %p5304_p10 = pnand %p5303_p8, %p5299_p4 }
  0x20   : > { %5307 = shalt.err (!%p5304_p10)
}
  0x21   : > { %s5423_s15 = smov 1024   ;;  %s5424_s20 = smov 512  }
  0x22   : > { %s5425_s22 = smov 32   ;;  %p263_p1 = scmp.lt.s32.totalorder %s5421_s27, 3 }
  0x23   : > { %4621 = dma.hbm_to_vmem [thread:$0]  (!%p5543_p13), %s254_s21, 1024, %s256_s23, %s244_s8, %s5423_s15, %s5424_s20, %s5425_s22  }
  0x24   : > { %p264_p2 = pnand %p3935_p0, %p263_p1 }
  0x26   : > { %267 = sbr.rel (%p264_p2) target bundleno = 1078 (0x436), region = 44 }
  0x2b   : > { %s5562_s16 = sand.u32 1, %s5413_s25  }
  0x2c   : > { %s5565_s10 = sshll.u32 %s5562_s16, 6  ;;  %s270_s9 = scalar_lea.sflag [#allocation4], %s5562_s16 }
  0x2d   : > { %s5569_s17 = scalar_lea.vmem [#allocation3], %s5565_s10 }
  0x2e   : > { %5396 = dma.done.wait (%p5521_p6), %s270_s9, 1024  }
  0x2f   : > { %5398 = vsyncadd (%p5521_p6), %s270_s9, 4294966272  ;;  %v316_v0 = vld [vmem:[%s5569_s17 + $0x10] sm:$0xff]  ;;  %v5578_v2 = vld [vmem:[%s5569_s17 + $0x8] sm:$0xff]  ;;  %s5426_s12 = smov 112   ;;  %s8409_s21 = smov 113   ;;  %v338_v45 = vlaneseq  ;;  %vm1209_vm8 = vcmask 130048  }
  0x30   : > { %v320_v1 = vld [vmem:[%s5569_s17 + $0x30] sm:$0xff]  ;;  %v5583_v4 = vld [vmem:[%s5569_s17 + $0x28] sm:$0xff]  ;;  %v5586_v5 = vld [vmem:[%s5569_s17] sm:$0xff]  ;;  %s8405_s23 = smov 127   ;;  %s5429_s29 = smov 1  }
  0x31   : > { %v5580_v3 = vpack.i.bf16 %v320_v1, %v316_v0  ;;  %v5589_v6 = vld [vmem:[%s5569_s17 + $0x20] sm:$0xff]  ;;  %v4698_v7 = vpack.i.bf16 %v5583_v4, %v5578_v2  ;;  %v317_v9 = vld [vmem:[%s5569_s17 + $0x18] sm:$0xff]  ;;  %s8407_s8 = smov 15   ;;  %s5431_s19 = smov 16   ;;  %v3942_v28 = vld [vmem:[%s8377_s1 + $0x14] sm:$0xf] }
  0x32   : > { %v4678_v8 = vpack.i.bf16 %v5589_v6, %v5586_v5  ;;  %v321_v10 = vld [vmem:[%s5569_s17 + $0x38] sm:$0xff]  ;;  %s8403_s22 = smov 111   ;;  %v3940_v18 = vld [vmem:[%s8377_s1 + $0x8] sm:$0xf]  ;;  %s5433_s11 = smov 17   ;;  %v5700_v51 = vand.u32 127, %v338_v45 }
  0x33   : > { %4689 = vrot.lane.b32.xlu1 %v5580_v3, %s5426_s12  ;;  %4699 = vrot.lane.b32.xlu2 %v4698_v7, %s8409_s21  ;;  %v4733_v11 = vpack.i.bf16 %v321_v10, %v317_v9  ;;  %v353_v12 = vld [vmem:[%s8377_s1] sm:$0xf]  ;;  %v3939_v17 = vld [vmem:[%s8377_s1 + $0x4] sm:$0xf]  ;;  %s8587_s20 = smov 113  }
  0x34   : > { %4679 = vrot.lane.b32.xlu0 %v4678_v8, %s5426_s12  ;;  %355 = vst [vmem:[#allocation1] ss:$9 sm:$0xff] %v353_v12  ;;  %v3941_v23 = vld [vmem:[%s8377_s1 + $0xc] sm:$0xf]  ;;  %v3943_v33 = vld [vmem:[%s8377_s1 + $0x18] sm:$0xf] }
  0x35   : > { %v3944_v38 = vld [vmem:[%s8377_s1 + $0x1c] sm:$0xf]  ;;  %vm732_vm0 = vcmp.lt.s32.totalorder %v5700_v51, 113  ;;  %vm809_vm1 = vcmp.lt.s32.totalorder %v5700_v51, 112  ;;  %vm655_vm2 = vcmp.lt.s32.totalorder %v5700_v51, 127  ;;  %vm570_vm3 = vcmp.lt.s32.totalorder %v5700_v51, 1 }
  0x36   : > { %vm493_vm4 = vcmp.lt.s32.totalorder %v5700_v51, 15  ;;  %vm416_vm5 = vcmp.lt.s32.totalorder %v5700_v51, 16  ;;  %vm8411_vm6 = vcmp.lt.s32.totalorder %v5700_v51, 111  ;;  %vm340_vm7 = vcmp.lt.s32.totalorder %v5700_v51, 17 }
  0x3b   : > { %4694 = vrot.lane.b32.xlu1 %v4678_v8, %s8409_s21  ;;  %4704 = vrot.lane.b32.xlu2 %v5580_v3, %s8409_s21  ;;  %v5621_v13 = vld [vmem:[#allocation1] sm:$0xff]  ;;  %v5623_v14 = vld [vmem:[#allocation1 + $0x9] sm:$0xff]  ;;  %v5625_v15 = vld [vmem:[#allocation1 + $0x12] sm:$0xff] }
  0x3c   : > { %4684 = vrot.lane.b32.xlu0 %v4698_v7, %s5426_s12  ;;  %v5627_v16 = vld [vmem:[#allocation1 + $0x1b] sm:$0xff] }
  0x3d   : > { %432 = vst [vmem:[#allocation1] ss:$9 sm:$0xff] %v3939_v17 }
  0x43   : > { %4714 = vrot.lane.b32.xlu1 %v4698_v7, %s8405_s23  ;;  %4719 = vrot.lane.b32.xlu2 %v5580_v3, %s8405_s23 }
  0x44   : > { %4709 = vrot.lane.b32.xlu0 %v4678_v8, %s8405_s23  ;;  %v5639_v19 = vld [vmem:[#allocation1] sm:$0xff]  ;;  %v5641_v20 = vld [vmem:[#allocation1 + $0x9] sm:$0xff]  ;;  %v5643_v21 = vld [vmem:[#allocation1 + $0x12] sm:$0xff] }
  0x45   : > { %v5645_v22 = vld [vmem:[#allocation1 + $0x1b] sm:$0xff] }
  0x46   : > { %509 = vst [vmem:[#allocation1] ss:$9 sm:$0xff] %v3940_v18 }
  0x4b   : > { %4729 = vrot.lane.b32.xlu1 %v4698_v7, %s5429_s29  ;;  %4734 = vrot.lane.b32.xlu2 %v4733_v11, %s5429_s29 }
  0x4c   : > { %4724 = vrot.lane.b32.xlu0 %v4678_v8, %s5429_s29 }
  0x4d   : > { %v5653_v24 = vld [vmem:[#allocation1] sm:$0xff]  ;;  %v5655_v25 = vld [vmem:[#allocation1 + $0x9] sm:$0xff]  ;;  %v5657_v26 = vld [vmem:[#allocation1 + $0x12] sm:$0xff] }
  0x4e   : > { %v5659_v27 = vld [vmem:[#allocation1 + $0x1b] sm:$0xff] }
  0x4f   : > { %586 = vst [vmem:[#allocation1] ss:$9 sm:$0xff] %v3941_v23 }
  0x53   : > { %4744 = vrot.lane.b32.xlu1 %v4698_v7, %s8407_s8  ;;  %4749 = vrot.lane.b32.xlu2 %v4733_v11, %s8407_s8 }
  0x54   : > { %4739 = vrot.lane.b32.xlu0 %v4678_v8, %s8407_s8 }
  0x56   : > { %v587_v29 = vld [vmem:[#allocation1] sm:$0xff]  ;;  %v588_v30 = vld [vmem:[#allocation1 + $0x9] sm:$0xff]  ;;  %v5667_v31 = vld [vmem:[#allocation1 + $0x12] sm:$0xff] }
  0x57   : > { %v5671_v32 = vld [vmem:[#allocation1 + $0x1b] sm:$0xff] }
  0x58   : > { %671 = vst [vmem:[#allocation1] ss:$9 sm:$0xff] %v3942_v28 }
  0x5b   : > { %4759 = vrot.lane.b32.xlu1 %v4698_v7, %s5431_s19  ;;  %4764 = vrot.lane.b32.xlu2 %v4733_v11, %s5431_s19 }
  0x5c   : > { %4754 = vrot.lane.b32.xlu0 %v4678_v8, %s5431_s19 }
  0x5f   : > { %v672_v34 = vld [vmem:[#allocation1] sm:$0xff]  ;;  %v673_v35 = vld [vmem:[#allocation1 + $0x9] sm:$0xff]  ;;  %v5682_v36 = vld [vmem:[#allocation1 + $0x12] sm:$0xff] }
  0x60   : > { %v5685_v37 = vld [vmem:[#allocation1 + $0x1b] sm:$0xff]  ;;  %v676_v56 = vpack.i.b16 %v672_v34, %v672_v34  ;;  %v679_v57 = vpack.i.b16 %v673_v35, %v673_v35 }
  0x61   : > { %748 = vst [vmem:[#allocation1] ss:$9 sm:$0xff] %v3943_v33 }
  0x62   : > { %v5722_v9 = vperm.slane %v676_v56, 0  ;;  %v5724_v10 = vperm.slane %v679_v57, 0 }
  0x63   : > { %4774 = vrot.lane.b32.xlu1 %v4698_v7, %s8403_s22  ;;  %4779 = vrot.lane.b32.xlu2 %v5580_v3, %s8403_s22 }
  0x64   : > { %4769 = vrot.lane.b32.xlu0 %v4678_v8, %s8403_s22 }
  0x68   : > { %v749_v39 = vld [vmem:[#allocation1] sm:$0xff]  ;;  %v750_v40 = vld [vmem:[#allocation1 + $0x9] sm:$0xff]  ;;  %v5690_v41 = vld [vmem:[#allocation1 + $0x12] sm:$0xff] }
  0x69   : > { %v5692_v42 = vld [vmem:[#allocation1 + $0x1b] sm:$0xff]  ;;  %v753_v49 = vpack.i.b16 %v749_v39, %v749_v39  ;;  %v756_v50 = vpack.i.b16 %v750_v40, %v750_v40  ;;  %v696_v39 = vunpack.c.l.bf16 %v5722_v9  ;;  %v697_v40 = vunpack.c.l.bf16 %v5724_v10 }
  0x6a   : > { %825 = vst [vmem:[#allocation1] ss:$9 sm:$0xff] %v3944_v38 }
  0x6b   : > { %4789 = vrot.lane.b32.xlu1 %v4698_v7, %s5433_s11  ;;  %4794 = vrot.lane.b32.xlu2 %v4733_v11, %s5433_s11  ;;  %v5708_v61 = vperm.slane %v753_v49, 0  ;;  %v5710_v62 = vperm.slane %v756_v50, 0  ;;  %v591_v7 = vpack.i.b16 %v587_v29, %v587_v29  ;;  %v631_v29 = vpack.c.bf16 %v5578_v2, %v5586_v5 }
  0x6c   : > { %4784 = vrot.lane.b32.xlu0 %v4678_v8, %s5433_s11  ;;  %v594_v8 = vpack.i.b16 %v588_v30, %v588_v30  ;;  %v633_v30 = vpack.c.bf16 %v5583_v4, %v5589_v6  ;;  %v517_v2 = vpack.i.b16 %v5655_v25, %v5655_v25 }
  0x6d   : > { %v773_v17 = vunpack.c.l.bf16 %v5708_v61  ;;  %v774_v18 = vunpack.c.l.bf16 %v5710_v62  ;;  %v5744_v35 = vperm.slane %v591_v7, 0  ;;  %635 = vst [vmem:[#allocation2 + $0x80] sm:$0xff] %v631_v29 }
  0x6e   : > { %v5746_v38 = vperm.slane %v594_v8, 0  ;;  %637 = vst [vmem:[#allocation2 + $0x90] sm:$0xff] %v633_v30  ;;  %v5779_v29 = vperm.slane %v517_v2, 0 }
  0x71   : > { %v826_v47 = vld [vmem:[#allocation1] sm:$0xff]  ;;  %v827_v48 = vld [vmem:[#allocation1 + $0x9] sm:$0xff]  ;;  %v5803_v57 = vld [vmem:[#allocation1 + $0x12] sm:$0xff] }
  0x72   : > { %v830_v52 = vpack.i.b16 %v826_v47, %v826_v47  ;;  %v833_v53 = vpack.i.b16 %v827_v48, %v827_v48 }
  0x73   : > { %4804 = vrot.lane.b32.xlu1 %v4733_v11, %s8409_s21  ;;  %4809 = vrot.lane.b32.xlu2 %v4733_v11, %s8405_s23  ;;  %s8597_s21 = smov 127   ;;  %s5343_s23 = scalar_lea.hbm %s8382_s6, 128 }
  0x74   : > { %4799 = vrot.lane.b32.xlu0 %v4733_v11, %s5426_s12  ;;  %v5717_v1 = vperm.slane %v830_v52, 0 }
  0x76   : > { %v850_v23 = vunpack.c.l.bf16 %v5717_v1 }
  0x7b   : > { %4819 = vrot.lane.b32.xlu1 %v5580_v3, %s8407_s8  ;;  %4824 = vrot.lane.b32.xlu2 %v5580_v3, %s5431_s19  ;;  %s8602_s8 = smov 111  }
  0x7c   : > { %4814 = vrot.lane.b32.xlu0 %v5580_v3, %s5429_s29 }
  0x83   : > { %4834 = vrot.lane.b32.xlu1 %v5580_v3, %s5433_s11  ;;  %v5719_v3 = vperm.slane %v833_v53, 0 }
  0x84   : > { %4829 = vrot.lane.b32.xlu0 %v4733_v11, %s8403_s22  ;;  %s8176_s22 = scalar_lea.vmem [#allocation7], %s5565_s10 }
  0x85   : > { %v851_v28 = vunpack.c.l.bf16 %v5719_v3 }
  0x8d   : > { %v5694_v43 = vpop.permute.xlu2 %4699 }
  0x8e   : > { %v4702_v54 = vunpack.i.h.bf16 %v5694_v43  ;;  %v4701_v55 = vunpack.i.l.bf16 %v5694_v43  ;;  %v514_v43 = vpack.i.b16 %v5653_v24, %v5653_v24 }
  0x90   : > { %v5777_v8 = vperm.slane %v514_v43, 0 }
  0x95   : > { %v5696_v44 = vpop.permute.xlu2 %4704 }
  0x96   : > { %v8389_v58 = vunpack.i.h.bf16 %v5696_v44  ;;  %v8384_v59 = vunpack.i.l.bf16 %v5696_v44 }
  0x98   : > { %v735_v11 = vsel %vm732_vm0, %v4701_v55, %v8384_v59  ;;  %v736_v12 = vsel %vm732_vm0, %v4702_v54, %v8389_v58  ;;  %v685_v58 = vpack.i.b16 %v5685_v37, %v5685_v37 }
  0x9d   : > { %v5698_v46 = vpop.permute.xlu2 %4719 }
  0x9e   : > { %v8397_v33 = vunpack.i.h.bf16 %v5698_v46  ;;  %v8399_v34 = vunpack.i.l.bf16 %v5698_v46 }
  0xa5   : > { %v5706_v60 = vpop.permute.xlu1 %4689  ;;  %v5713_v63 = vpop.permute.xlu2 %4734 }
  0xa6   : > { %v5715_v0 = vpop.permute.xlu0 %4679  ;;  %v8386_v4 = vunpack.i.h.bf16 %v5706_v60  ;;  %v8387_v5 = vunpack.i.l.bf16 %v5706_v60  ;;  %v8394_v6 = vunpack.i.h.bf16 %v5713_v63  ;;  %v8398_v45 = vunpack.i.l.bf16 %v5713_v63 }
  0xa7   : > { %v8391_v48 = vunpack.i.h.bf16 %v5715_v0  ;;  %v8390_v49 = vunpack.i.l.bf16 %v5715_v0 }
  0xad   : > { %v5758_v47 = vpop.permute.xlu1 %4694  ;;  %v5762_v24 = vpop.permute.xlu2 %4749 }
  0xae   : > { %v8385_v25 = vunpack.i.h.bf16 %v5758_v47  ;;  %v8388_v50 = vunpack.i.l.bf16 %v5758_v47  ;;  %v4685_v52 = vpop.permute.xlu0 %4684 }
  0xaf   : > { %v4687_v53 = vunpack.i.h.bf16 %v4685_v52  ;;  %v4686_v56 = vunpack.i.l.bf16 %v4685_v52 }
  0xb0   : > { %v738_v62 = vsel %vm732_vm0, %v8385_v25, %v4702_v54  ;;  %v737_v7 = vsel %vm732_vm0, %v8388_v50, %v4701_v55  ;;  %v682_v50 = vpack.i.b16 %v5682_v36, %v5682_v36 }
  0xb1   : > { %v743_v30 = vpack.c.bf16 %v736_v12, %v738_v62  ;;  %v741_v52 = vpack.c.bf16 %v735_v11, %v737_v7  ;;  %v813_v59 = vsel %vm809_vm1, %v4687_v53, %v8386_v4  ;;  %v812_v54 = vsel %vm809_vm1, %v4686_v56, %v8387_v5 }
  0xb2   : > { %v814_v12 = vsel %vm809_vm1, %v8390_v49, %v4686_v56  ;;  %v815_v11 = vsel %vm809_vm1, %v8391_v48, %v4687_v53  ;;  %v5805_v53 = vld [vmem:[#allocation1 + $0x1b] sm:$0xff] }
  0xb3   : > { %v769_v43 = vunpack.c.l.bf16 %v743_v30  ;;  %v770_v2 = vunpack.c.h.bf16 %v743_v30  ;;  %v765_v62 = vunpack.c.l.bf16 %v741_v52  ;;  %v766_v7 = vunpack.c.h.bf16 %v741_v52  ;;  %v3945_v30 = vld [vmem:[%s8377_s1 + $0x20] sm:$0xf] }
  0xb4   : > { %v818_v4 = vpack.c.bf16 %v812_v54, %v814_v12  ;;  %v820_v5 = vpack.c.bf16 %v813_v59, %v815_v11  ;;  %902 = vst [vmem:[#allocation1] ss:$9 sm:$0xff] %v3945_v30 }
  0xb5   : > { %v781_v25 = vmul.f32 %v773_v17, %v769_v43  ;;  %v782_v55 = vmul.f32 %v774_v18, %v770_v2  ;;  %v777_v56 = vmul.f32 %v773_v17, %v765_v62  ;;  %v778_v49 = vmul.f32 %v774_v18, %v766_v7  ;;  %v4715_v61 = vpop.permute.xlu1 %4714  ;;  %v5810_v12 = vpop.permute.xlu2 %4764 }
  0xb6   : > { %v842_v59 = vunpack.c.l.bf16 %v818_v4  ;;  %v843_v52 = vunpack.c.h.bf16 %v818_v4  ;;  %v846_v54 = vunpack.c.l.bf16 %v820_v5  ;;  %v847_v36 = vunpack.c.h.bf16 %v820_v5  ;;  %v5812_v37 = vpop.permute.xlu0 %4709 }
  0xb7   : > { %v787_v17 = vpack.c.bf16 %v782_v55, %v781_v25  ;;  %v785_v18 = vpack.c.bf16 %v778_v49, %v777_v56  ;;  %v4717_v49 = vunpack.i.h.bf16 %v4715_v61  ;;  %v4716_v25 = vunpack.i.l.bf16 %v4715_v61 }
  0xb8   : > { %v854_v2 = vmul.f32 %v850_v23, %v842_v59  ;;  %v855_v62 = vmul.f32 %v851_v28, %v843_v52  ;;  %v858_v4 = vmul.f32 %v850_v23, %v846_v54  ;;  %v859_v5 = vmul.f32 %v851_v28, %v847_v36  ;;  %v5849_v36 = vld [vmem:[#allocation2 + $0x80] sm:$0xf] }
  0xb9   : > { %791 = vst [vmem:[#allocation2 + $0xd0] sm:$0xff] %v787_v17  ;;  %v8392_v55 = vunpack.i.h.bf16 %v5812_v37  ;;  %v8396_v7 = vunpack.i.l.bf16 %v5812_v37  ;;  %v5827_v59 = vperm.slane %v682_v50, 0  ;;  %v5829_v52 = vperm.slane %v685_v58, 0  ;;  %v5851_v17 = vld [vmem:[#allocation2 + $0x8c] sm:$0xf0] }
  0xba   : > { %789 = vst [vmem:[#allocation2 + $0xc0] sm:$0xff] %v785_v18  ;;  %v862_v56 = vpack.c.bf16 %v855_v62, %v854_v2  ;;  %v864_v30 = vpack.c.bf16 %v859_v5, %v858_v4  ;;  %v659_v1 = vsel %vm655_vm2, %v4717_v49, %v8397_v33  ;;  %v658_v3 = vsel %vm655_vm2, %v4716_v25, %v8399_v34 }
  0xbb   : > { %v661_v23 = vsel %vm655_vm2, %v8392_v55, %v4717_v49  ;;  %v660_v58 = vsel %vm655_vm2, %v8396_v7, %v4716_v25  ;;  %v437_v4 = vpack.i.b16 %v5639_v19, %v5639_v19  ;;  %v440_v5 = vpack.i.b16 %v5641_v20, %v5641_v20 }
  0xbc   : > { %866 = vst [vmem:[#allocation2 + $0xe0] sm:$0xff] %v862_v56  ;;  %v666_v61 = vpack.c.bf16 %v659_v1, %v661_v23  ;;  %v664_v54 = vpack.c.bf16 %v658_v3, %v660_v58 }
  0xbd   : > { %868 = vst [vmem:[#allocation2 + $0xf0] sm:$0xff] %v864_v30  ;;  %v5853_v18 = vpop.permute.xlu1 %4729  ;;  %v5861_v3 = vpop.permute.xlu2 %4779 }
  0xbe   : > { %v692_v49 = vunpack.c.l.bf16 %v666_v61  ;;  %v693_v25 = vunpack.c.h.bf16 %v666_v61  ;;  %v688_v56 = vunpack.c.l.bf16 %v664_v54  ;;  %v689_v1 = vunpack.c.h.bf16 %v664_v54  ;;  %v4725_v23 = vpop.permute.xlu0 %4724 }
  0xbf   : > { %v8393_v58 = vunpack.i.h.bf16 %v5853_v18  ;;  %v8395_v48 = vunpack.i.l.bf16 %v5853_v18  ;;  %v4727_v50 = vunpack.i.h.bf16 %v4725_v23  ;;  %v4726_v28 = vunpack.i.l.bf16 %v4725_v23 }
  0xc0   : > { %v704_v19 = vmul.f32 %v696_v39, %v692_v49  ;;  %v705_v20 = vmul.f32 %v697_v40, %v693_v25  ;;  %v700_v61 = vmul.f32 %v696_v39, %v688_v56  ;;  %v701_v54 = vmul.f32 %v697_v40, %v689_v1  ;;  %v5877_v30 = vld [vmem:[#allocation2 + $0xcc] sm:$0xf0]  ;;  %v5879_v2 = vld [vmem:[#allocation2 + $0xd0] sm:$0xf0]  ;;  %v5889_v56 = vld [vmem:[#allocation2 + $0x84] sm:$0xf] }
  0xc1   : > { %v4060_v62 = vld [vmem:[#allocation2 + $0xc0] sm:$0xf]  ;;  %v5881_v55 = vld [vmem:[#allocation2 + $0xc4] sm:$0xf]  ;;  %v5883_v49 = vperm.slane %v437_v4, 0  ;;  %v5885_v25 = vperm.slane %v440_v5, 0  ;;  %v576_v23 = vsel %vm570_vm3, %v4727_v50, %v8393_v58  ;;  %v578_v4 = vsel %vm570_vm3, %v8394_v6, %v4727_v50 }
  0xc2   : > { %v710_v9 = vpack.c.bf16 %v705_v20, %v704_v19  ;;  %v708_v39 = vpack.c.bf16 %v701_v54, %v700_v61  ;;  %v4061_v40 = vor.u32 %v5877_v30, %v4060_v62  ;;  %v5891_v1 = vld [vmem:[#allocation2 + $0x90] sm:$0xf0]  ;;  %v575_v5 = vsel %vm570_vm3, %v4726_v28, %v8395_v48 }
  0xc3   : > { %v577_v62 = vsel %vm570_vm3, %v8398_v45, %v4726_v28  ;;  %v4076_v30 = vld [vmem:[#allocation2 + $0xe0] sm:$0xf]  ;;  %v4510_v19 = vld [vmem:[#allocation2 + $0xe4] sm:$0xf]  ;;  %v581_v20 = vpack.c.bf16 %v576_v23, %v578_v4  ;;  %v4065_v50 = vor.u32 %v5881_v55, %v5879_v2  ;;  %v903_v55 = vld [vmem:[#allocation1] sm:$0xff] }
  0xc4   : > { %714 = vst [vmem:[#allocation2 + $0xb0] sm:$0xff] %v710_v9  ;;  %v579_v61 = vpack.c.bf16 %v575_v5, %v577_v62  ;;  %v4512_v54 = vld [vmem:[#allocation2 + $0xec] sm:$0xf0]  ;;  %v4078_v58 = vld [vmem:[#allocation2 + $0xf0] sm:$0xf0]  ;;  %v904_v2 = vld [vmem:[#allocation1 + $0x9] sm:$0xff]  ;;  %v907_v43 = vpack.i.b16 %v903_v55, %v903_v55 }
  0xc5   : > { %712 = vst [vmem:[#allocation2 + $0xa0] sm:$0xff] %v708_v39  ;;  %v4077_v10 = vor.u32 %v4512_v54, %v4076_v30  ;;  %v4081_v48 = vor.u32 %v4510_v19, %v4078_v58  ;;  %v5912_v7 = vpop.permute.xlu1 %4744  ;;  %v607_v9 = vunpack.c.l.bf16 %v581_v20  ;;  %v608_v23 = vunpack.c.h.bf16 %v581_v20  ;;  %v5917_v62 = vpop.permute.xlu2 %4794 }
  0xc6   : > { %v603_v4 = vunpack.c.l.bf16 %v579_v61  ;;  %v604_v5 = vunpack.c.h.bf16 %v579_v61  ;;  %v4740_v45 = vpop.permute.xlu0 %4739  ;;  %v8400_v19 = vunpack.i.l.bf16 %v5912_v7  ;;  %v8506_v54 = vunpack.c.l.bf16 %v5744_v35 }
  0xc7   : > { %1216 = vmatpush.bf16.msra.mxu0 %v4077_v10  ;;  %1254 = vmatpush.bf16.msra.mxu2 %v4081_v48  ;;  %v8507_v61 = vunpack.c.l.bf16 %v5746_v38  ;;  %v4742_v34 = vunpack.i.h.bf16 %v4740_v45  ;;  %v4741_v58 = vunpack.i.l.bf16 %v4740_v45  ;;  %v910_v39 = vpack.i.b16 %v904_v2, %v904_v2 }
  0xc8   : > { %v619_v20 = vmul.f32 %v8506_v54, %v607_v9  ;;  %v8508_v6 = vmov %v8506_v54  ;;  %v443_v9 = vpack.i.b16 %v5643_v21, %v5643_v21  ;;  %v8510_v35 = vunpack.i.h.bf16 %v5912_v7 }
  0xc9   : > { %v620_v33 = vmul.f32 %v8507_v61, %v608_v23  ;;  %v615_v28 = vmul.f32 %v8508_v6, %v603_v4  ;;  %v8509_v10 = vmov %v8507_v61  ;;  %v8511_v6 = vunpack.i.h.bf16 %v5762_v24 }
  0xca   : > { %v616_v48 = vmul.f32 %v8509_v10, %v604_v5  ;;  %v499_v38 = vsel %vm493_vm4, %v4742_v34, %v8510_v35  ;;  %v8512_v21 = vunpack.i.l.bf16 %v5762_v24 }
  0xcb   : > { %v625_v11 = vpack.c.bf16 %v620_v33, %v619_v20  ;;  %v501_v45 = vsel %vm493_vm4, %v8511_v6, %v4742_v34  ;;  %v498_v33 = vsel %vm493_vm4, %v4741_v58, %v8400_v19  ;;  %1217 = vmatpush.bf16.msra.mxu0 %v4061_v40  ;;  %v4504_v4 = vld [vmem:[#allocation2 + $0xac] sm:$0xf0]  ;;  %v4046_v5 = vld [vmem:[#allocation2 + $0xb0] sm:$0xf0]  ;;  %1255 = vmatpush.bf16.msra.mxu2 %v4065_v50  ;;  %v5952_v34 = vperm.slane %v907_v43, 0 }
  0xcc   : > { %v623_v30 = vpack.c.bf16 %v616_v48, %v615_v28  ;;  %v500_v28 = vsel %vm493_vm4, %v8512_v21, %v4741_v58  ;;  %v504_v55 = vpack.c.bf16 %v499_v38, %v501_v45  ;;  %v4044_v54 = vld [vmem:[#allocation2 + $0xa0] sm:$0xf]  ;;  %v4502_v20 = vld [vmem:[#allocation2 + $0xa4] sm:$0xf]  ;;  %v5958_v58 = vperm.slane %v910_v39, 0 }
  0xcd   : > { %629 = vst [vmem:[#allocation2 + $0x70] sm:$0xff] %v625_v11  ;;  %v502_v2 = vpack.c.bf16 %v498_v33, %v500_v28  ;;  %v4045_v10 = vor.u32 %v4504_v4, %v4044_v54  ;;  %v4049_v48 = vor.u32 %v4502_v20, %v4046_v5  ;;  %v5956_v35 = vpop.permute.xlu1 %4759  ;;  %v5960_v40 = vperm.slane %v443_v9, 0  ;;  %v4810_v45 = vpop.permute.xlu2 %4809 }
  0xce   : > { %627 = vst [vmem:[#allocation2 + $0x60] sm:$0xff] %v623_v30  ;;  %v530_v11 = vunpack.c.l.bf16 %v504_v55  ;;  %v531_v38 = vunpack.c.h.bf16 %v504_v55  ;;  %v4755_v33 = vpop.permute.xlu0 %4754  ;;  %v4812_v43 = vunpack.i.h.bf16 %v4810_v45  ;;  %v4811_v21 = vunpack.i.l.bf16 %v4810_v45 }
  0xcf   : > { %v526_v6 = vunpack.c.l.bf16 %v502_v2  ;;  %v527_v50 = vunpack.c.h.bf16 %v502_v2  ;;  %1218 = vmatpush.bf16.msra.mxu0 %v4045_v10  ;;  %v8402_v28 = vunpack.i.h.bf16 %v5956_v35  ;;  %v8401_v30 = vunpack.i.l.bf16 %v5956_v35  ;;  %1256 = vmatpush.bf16.msra.mxu2 %v4049_v48 }
  0xd0   : > { %v8513_v39 = vunpack.c.l.bf16 %v5777_v8  ;;  %v8514_v9 = vunpack.c.l.bf16 %v5779_v29  ;;  %v8517_v10 = vunpack.i.l.bf16 %v5698_v46  ;;  %v8518_v19 = vunpack.i.h.bf16 %v5698_v46 }
  0xd1   : > { %v8521_v46 = vor.u32 %v5851_v17, %v5849_v36  ;;  %v8523_v17 = vunpack.i.h.bf16 %v5810_v12 }
  0xd2   : > { %v542_v4 = vmul.f32 %v8513_v39, %v530_v11  ;;  %v543_v5 = vmul.f32 %v8514_v9, %v531_v38  ;;  %v8515_v55 = vmov %v8513_v39  ;;  %v8516_v54 = vmov %v8514_v9 }
  0xd3   : > { %v538_v2 = vmul.f32 %v8515_v55, %v526_v6  ;;  %v539_v20 = vmul.f32 %v8516_v54, %v527_v50  ;;  %v656_v45 = vsel %vm655_vm2, %v8517_v10, %v4811_v21  ;;  %v657_v11 = vsel %vm655_vm2, %v8518_v19, %v4812_v43  ;;  %1219 = vmatpush.bf16.msra.mxu0 %v8521_v46 }
  0xd4   : > { %v8519_v39 = vunpack.i.l.bf16 %v5812_v37  ;;  %v8520_v38 = vunpack.i.h.bf16 %v5812_v37  ;;  %v548_v48 = vpack.c.bf16 %v543_v5, %v542_v4  ;;  %v4757_v55 = vunpack.i.h.bf16 %v4755_v33  ;;  %v4496_v19 = vld [vmem:[#allocation2 + $0x6c] sm:$0xf0]  ;;  %v4014_v10 = vld [vmem:[#allocation2 + $0x70] sm:$0xf0] }
  0xd5   : > { %v546_v6 = vpack.c.bf16 %v539_v20, %v538_v2  ;;  %v4756_v54 = vunpack.i.l.bf16 %v4755_v33  ;;  %v8522_v5 = vor.u32 %v5889_v56, %v5891_v1  ;;  %v4012_v33 = vld [vmem:[#allocation2 + $0x60] sm:$0xf]  ;;  %v4494_v2 = vld [vmem:[#allocation2 + $0x64] sm:$0xf]  ;;  %v8524_v56 = vunpack.i.l.bf16 %v5810_v12 }
  0xd6   : > { %v662_v8 = vsel %vm655_vm2, %v4811_v21, %v8519_v39  ;;  %v663_v29 = vsel %vm655_vm2, %v4812_v43, %v8520_v38  ;;  %552 = vst [vmem:[#allocation2 + $0x50] sm:$0xff] %v548_v48  ;;  %v422_v36 = vsel %vm416_vm5, %v4757_v55, %v8402_v28  ;;  %v424_v20 = vsel %vm416_vm5, %v8523_v17, %v4757_v55  ;;  %v6021_v21 = vpop.permute.xlu0 %4769 }
  0xd7   : > { %v665_v50 = vpack.c.bf16 %v662_v8, %v656_v45  ;;  %v667_v9 = vpack.c.bf16 %v663_v29, %v657_v11  ;;  %1257 = vmatpush.bf16.msra.mxu2 %v8522_v5  ;;  %550 = vst [vmem:[#allocation2 + $0x40] sm:$0xff] %v546_v6  ;;  %v421_v45 = vsel %vm416_vm5, %v4756_v54, %v8401_v30  ;;  %v4775_v11 = vpop.permute.xlu1 %4774  ;;  %v8525_v8 = vunpack.c.l.bf16 %v5827_v59 }
  0xd8   : > { %v423_v1 = vsel %vm416_vm5, %v8524_v56, %v4756_v54  ;;  %v8526_v29 = vunpack.c.l.bf16 %v5829_v52  ;;  %v427_v46 = vpack.c.bf16 %v422_v36, %v424_v20  ;;  %v4013_v17 = vor.u32 %v4496_v19, %v4012_v33 }
  0xd9   : > { %v690_v37 = vunpack.c.l.bf16 %v665_v50  ;;  %v691_v39 = vunpack.c.h.bf16 %v665_v50  ;;  %v694_v43 = vunpack.c.l.bf16 %v667_v9  ;;  %v695_v4 = vunpack.c.h.bf16 %v667_v9 }
  0xda   : > { %v8527_v6 = vmov %v8525_v8  ;;  %v8528_v9 = vmov %v8526_v29  ;;  %v425_v5 = vpack.c.bf16 %v421_v45, %v423_v1  ;;  %v4017_v30 = vor.u32 %v4494_v2, %v4014_v10  ;;  %1220 = vmatpush.bf16.msra.mxu0 %v4013_v17 }
  0xdb   : > { %v702_v38 = vmul.f32 %v8525_v8, %v690_v37  ;;  %v703_v48 = vmul.f32 %v8526_v29, %v691_v39  ;;  %v706_v50 = vmul.f32 %v8527_v6, %v694_v43  ;;  %v707_v55 = vmul.f32 %v8528_v9, %v695_v4 }
  0xdc   : > { %v4777_v61 = vunpack.i.h.bf16 %v4775_v11  ;;  %v4776_v28 = vunpack.i.l.bf16 %v4775_v11  ;;  %v453_v37 = vunpack.c.l.bf16 %v427_v46  ;;  %v454_v8 = vunpack.c.h.bf16 %v427_v46  ;;  %1258 = vmatpush.bf16.msra.mxu2 %v4017_v30 }
  0xdd   : > { %v709_v54 = vpack.c.bf16 %v703_v48, %v702_v38  ;;  %v711_v56 = vpack.c.bf16 %v707_v55, %v706_v50  ;;  %v449_v23 = vunpack.c.l.bf16 %v425_v5  ;;  %v450_v39 = vunpack.c.h.bf16 %v425_v5  ;;  %v4492_v38 = vld [vmem:[#allocation2 + $0x4c] sm:$0xf0]  ;;  %v3998_v29 = vld [vmem:[#allocation2 + $0x50] sm:$0xf0]  ;;  %v4825_v48 = vpop.permute.xlu2 %4824 }
  0xde   : > { %v8529_v59 = vunpack.i.h.bf16 %v5861_v3  ;;  %v8530_v19 = vunpack.i.l.bf16 %v5861_v3  ;;  %v4772_v43 = vunpack.i.h.bf16 %v6021_v21  ;;  %v4771_v4 = vunpack.i.l.bf16 %v6021_v21  ;;  %v3996_v9 = vld [vmem:[#allocation2 + $0x40] sm:$0xf]  ;;  %v4490_v55 = vld [vmem:[#allocation2 + $0x44] sm:$0xf] }
  0xdf   : > { %713 = vst [vmem:[#allocation2 + $0xa8] sm:$0xff] %v709_v54  ;;  %v8531_v33 = vunpack.c.l.bf16 %v5883_v49  ;;  %v8532_v30 = vunpack.c.l.bf16 %v5885_v25  ;;  %v8535_v49 = vpack.i.b16 %v5645_v22, %v5645_v22  ;;  %v4826_v22 = vunpack.i.l.bf16 %v4825_v48 }
  0xe0   : > { %v890_v52 = vsel %vm8411_vm6, %v4777_v61, %v8529_v59  ;;  %v889_v10 = vsel %vm8411_vm6, %v4776_v28, %v8530_v19  ;;  %715 = vst [vmem:[#allocation2 + $0xb8] sm:$0xff] %v711_v56  ;;  %v892_v6 = vsel %vm8411_vm6, %v4772_v43, %v4777_v61  ;;  %v891_v50 = vsel %vm8411_vm6, %v4771_v4, %v4776_v28  ;;  %v6053_v56 = vpop.permute.xlu1 %4789 }
  0xe1   : > { %v465_v2 = vmul.f32 %v8531_v33, %v453_v37  ;;  %v466_v36 = vmul.f32 %v8532_v30, %v454_v8  ;;  %v8533_v20 = vmov %v8531_v33  ;;  %v8534_v1 = vmov %v8532_v30 }
  0xe2   : > { %v461_v45 = vmul.f32 %v8533_v20, %v449_v23  ;;  %v462_v11 = vmul.f32 %v8534_v1, %v450_v39  ;;  %v448_v25 = vperm.slane %v8535_v49, 0  ;;  %v459_v23 = vunpack.c.l.bf16 %v5960_v40 }
  0xe3   : > { %v471_v46 = vpack.c.bf16 %v466_v36, %v465_v2  ;;  %v897_v17 = vpack.c.bf16 %v890_v52, %v892_v6  ;;  %v895_v54 = vpack.c.bf16 %v889_v10, %v891_v50  ;;  %v3997_v61 = vor.u32 %v4492_v38, %v3996_v9 }
  0xe4   : > { %v469_v5 = vpack.c.bf16 %v462_v11, %v461_v45  ;;  %v4001_v37 = vor.u32 %v4490_v55, %v3998_v29  ;;  %v460_v8 = vunpack.c.l.bf16 %v448_v25  ;;  %v4827_v39 = vunpack.i.h.bf16 %v4825_v48 }
  0xe5   : > { %475 = vst [vmem:[#allocation2 + $0x30] sm:$0xff] %v471_v46  ;;  %v923_v28 = vunpack.c.l.bf16 %v897_v17  ;;  %v924_v59 = vunpack.c.h.bf16 %v897_v17  ;;  %v919_v19 = vunpack.c.l.bf16 %v895_v54  ;;  %v920_v33 = vunpack.c.h.bf16 %v895_v54  ;;  %1221 = vmatpush.bf16.msra.mxu0 %v3997_v61  ;;  %v4785_v46 = vpop.permute.xlu0 %4784 }
  0xe6   : > { %473 = vst [vmem:[#allocation2 + $0x20] sm:$0xff] %v469_v5  ;;  %1259 = vmatpush.bf16.msra.mxu2 %v4001_v37  ;;  %v8536_v40 = vunpack.i.h.bf16 %v5810_v12  ;;  %v8537_v10 = vunpack.i.h.bf16 %v5956_v35  ;;  %v4792_v30 = vunpack.i.h.bf16 %v6053_v56  ;;  %v8538_v36 = vunpack.c.l.bf16 %v5952_v34 }
  0xe7   : > { %v8539_v45 = vunpack.c.l.bf16 %v5958_v58  ;;  %v8542_v6 = vunpack.i.l.bf16 %v5810_v12  ;;  %v8543_v9 = vunpack.i.l.bf16 %v5956_v35  ;;  %v4791_v25 = vunpack.i.l.bf16 %v6053_v56  ;;  %v3948_v56 = vld [vmem:[%s8378_s2] sm:$0xf] }
  0xe8   : > { %v418_v52 = vsel %vm416_vm5, %v4827_v39, %v8536_v40  ;;  %v420_v2 = vsel %vm416_vm5, %v8537_v10, %v4827_v39  ;;  %v935_v20 = vmul.f32 %v8538_v36, %v923_v28  ;;  %v8540_v11 = vmov %v8538_v36 }
  0xe9   : > { %v936_v1 = vmul.f32 %v8539_v45, %v924_v59  ;;  %v931_v38 = vmul.f32 %v8540_v11, %v919_v19  ;;  %v8541_v29 = vmov %v8539_v45  ;;  %v417_v50 = vsel %vm416_vm5, %v4826_v22, %v8542_v6 }
  0xea   : > { %v932_v48 = vmul.f32 %v8541_v29, %v920_v33  ;;  %v419_v55 = vsel %vm416_vm5, %v8543_v9, %v4826_v22  ;;  %v428_v49 = vpack.c.bf16 %v418_v52, %v420_v2  ;;  %v8544_v12 = vpack.i.b16 %v5621_v13, %v5621_v13 }
  0xeb   : > { %v941_v5 = vpack.c.bf16 %v936_v1, %v935_v20  ;;  %v426_v17 = vpack.c.bf16 %v417_v50, %v419_v55  ;;  %v363_v35 = vpack.i.b16 %v5623_v14, %v5623_v14  ;;  %v4787_v28 = vunpack.i.h.bf16 %v4785_v46 }
  0xec   : > { %v939_v34 = vpack.c.bf16 %v932_v48, %v931_v38  ;;  %v455_v58 = vunpack.c.l.bf16 %v428_v49  ;;  %v456_v54 = vunpack.c.h.bf16 %v428_v49  ;;  %v362_v61 = vperm.slane %v8544_v12, 0  ;;  %v4488_v52 = vld [vmem:[#allocation2 + $0x2c] sm:$0xf0]  ;;  %v3982_v10 = vld [vmem:[#allocation2 + $0x30] sm:$0xf0] }
  0xed   : > { %945 = vst [vmem:[#allocation2 + $0x110] sm:$0xff] %v941_v5  ;;  %v451_v37 = vunpack.c.l.bf16 %v426_v17  ;;  %v452_v39 = vunpack.c.h.bf16 %v426_v17  ;;  %v4786_v59 = vunpack.i.l.bf16 %v4785_v46  ;;  %v365_v22 = vperm.slane %v363_v35, 0  ;;  %v3980_v45 = vld [vmem:[#allocation2 + $0x20] sm:$0xf]  ;;  %v4486_v1 = vld [vmem:[#allocation2 + $0x24] sm:$0xf] }
  0xee   : > { %943 = vst [vmem:[#allocation2 + $0x100] sm:$0xff] %v939_v34  ;;  %v467_v19 = vmul.f32 %v459_v23, %v455_v58  ;;  %v468_v33 = vmul.f32 %v460_v8, %v456_v54  ;;  %v380_v40 = vunpack.c.l.bf16 %v362_v61  ;;  %v346_v13 = vsel %vm340_vm7, %v4787_v28, %v4792_v30 }
  0xef   : > { %v463_v2 = vmul.f32 %v459_v23, %v451_v37  ;;  %v464_v36 = vmul.f32 %v460_v8, %v452_v39  ;;  %v8545_v14 = vunpack.i.h.bf16 %v5917_v62  ;;  %v381_v38 = vunpack.c.l.bf16 %v365_v22  ;;  %v4805_v8 = vpop.permute.xlu1 %4804 }
  0xf0   : > { %v472_v11 = vpack.c.bf16 %v468_v33, %v467_v19  ;;  %v345_v23 = vsel %vm340_vm7, %v4786_v59, %v4791_v25  ;;  %v8546_v6 = vunpack.i.l.bf16 %v5917_v62  ;;  %v3981_v9 = vor.u32 %v4488_v52, %v3980_v45 }
  0xf1   : > { %v348_v20 = vsel %vm340_vm7, %v8545_v14, %v4787_v28  ;;  %v470_v48 = vpack.c.bf16 %v464_v36, %v463_v2  ;;  %v3985_v55 = vor.u32 %v4486_v1, %v3982_v10  ;;  %v759_v34 = vpack.i.b16 %v5690_v41, %v5690_v41  ;;  %v4800_v36 = vpop.permute.xlu0 %4799 }
  0xf2   : > { %v351_v29 = vpack.c.bf16 %v346_v13, %v348_v20  ;;  %v347_v50 = vsel %vm340_vm7, %v8546_v6, %v4786_v59  ;;  %476 = vst [vmem:[#allocation2 + $0x38] sm:$0xff] %v472_v11  ;;  %1222 = vmatpush.bf16.msra.mxu0 %v3981_v9  ;;  %v762_v17 = vpack.i.b16 %v5692_v42, %v5692_v42  ;;  %v4807_v58 = vunpack.i.h.bf16 %v4805_v8  ;;  %v6127_v6 = vld [vmem:[#allocation1 + $0x12] sm:$0xff] }
  0xf3   : > { %v349_v5 = vpack.c.bf16 %v345_v23, %v347_v50  ;;  %474 = vst [vmem:[#allocation2 + $0x28] sm:$0xff] %v470_v48  ;;  %1260 = vmatpush.bf16.msra.mxu2 %v3985_v55  ;;  %v4806_v54 = vunpack.i.l.bf16 %v4805_v8  ;;  %v836_v12 = vpack.i.b16 %v5803_v57, %v5803_v57  ;;  %v761_v28 = vperm.slane %v759_v34, 0  ;;  %v6129_v50 = vld [vmem:[#allocation1 + $0x1b] sm:$0xff] }
  0xf4   : > { %v376_v49 = vunpack.c.l.bf16 %v351_v29  ;;  %v377_v46 = vunpack.c.h.bf16 %v351_v29  ;;  %v764_v59 = vperm.slane %v762_v17, 0  ;;  %v8547_v19 = vunpack.i.h.bf16 %v5696_v44  ;;  %v4516_v34 = vld [vmem:[#allocation2 + $0x10c] sm:$0xf0] }
  0xf5   : > { %v372_v37 = vunpack.c.l.bf16 %v349_v5  ;;  %v373_v39 = vunpack.c.h.bf16 %v349_v5  ;;  %v8548_v33 = vunpack.i.l.bf16 %v5696_v44  ;;  %v8549_v57 = vunpack.i.l.bf16 %v5758_v47  ;;  %v4092_v5 = vld [vmem:[#allocation2 + $0x100] sm:$0xf] }
  0xf6   : > { %v388_v61 = vmul.f32 %v380_v40, %v376_v49  ;;  %v389_v35 = vmul.f32 %v381_v38, %v377_v46  ;;  %v734_v41 = vsel %vm732_vm0, %v8547_v19, %v4807_v58  ;;  %v775_v13 = vunpack.c.l.bf16 %v761_v28 }
  0xf7   : > { %v733_v42 = vsel %vm732_vm0, %v8548_v33, %v4806_v54  ;;  %v384_v52 = vmul.f32 %v380_v40, %v372_v37  ;;  %v385_v10 = vmul.f32 %v381_v38, %v373_v39  ;;  %v739_v2 = vsel %vm732_vm0, %v4806_v54, %v8549_v57  ;;  %v4094_v37 = vld [vmem:[#allocation2 + $0x110] sm:$0xf0]  ;;  %v4820_v33 = vpop.permute.xlu1 %4819 }
  0xf8   : > { %v394_v22 = vpack.c.bf16 %v389_v35, %v388_v61  ;;  %v776_v14 = vunpack.c.l.bf16 %v764_v59  ;;  %v8550_v20 = vunpack.i.h.bf16 %v5758_v47  ;;  %v742_v44 = vpack.c.bf16 %v739_v2, %v733_v42  ;;  %v1744_v47 = vld [vmem:[%s8377_s1] sm:$0xf]  ;;  %v4514_v35 = vld [vmem:[#allocation2 + $0x104] sm:$0xf] }
  0xf9   : > { %v392_v1 = vpack.c.bf16 %v385_v10, %v384_v52  ;;  %v838_v29 = vperm.slane %v836_v12, 0  ;;  %v839_v40 = vpack.i.b16 %v5805_v53, %v5805_v53  ;;  %v4802_v8 = vunpack.i.h.bf16 %v4800_v36  ;;  %1746 = vst [vmem:[#allocation1] ss:$9 sm:$0xff] %v1744_v47 }
  0xfa   : > { %v740_v45 = vsel %vm732_vm0, %v4807_v58, %v8550_v20  ;;  %398 = vst [vmem:[#allocation2 + $0x10] sm:$0xff] %v394_v22  ;;  %v767_v38 = vunpack.c.l.bf16 %v742_v44  ;;  %v768_v23 = vunpack.c.h.bf16 %v742_v44  ;;  %v4801_v48 = vunpack.i.l.bf16 %v4800_v36 }
  0xfb   : > { %v744_v11 = vpack.c.bf16 %v740_v45, %v734_v41  ;;  %396 = vst [vmem:[#allocation2] sm:$0xff] %v392_v1  ;;  %v841_v49 = vperm.slane %v839_v40, 0  ;;  %v852_v46 = vunpack.c.l.bf16 %v838_v29  ;;  %v8551_v58 = vunpack.i.h.bf16 %v5706_v60  ;;  %v4130_v40 = vld [vmem:[%s8377_s1 + $0x4] sm:$0xf] }
  0xfc   : > { %v779_v53 = vmul.f32 %v775_v13, %v767_v38  ;;  %v780_v17 = vmul.f32 %v776_v14, %v768_v23  ;;  %v8552_v12 = vunpack.i.l.bf16 %v5706_v60  ;;  %v8553_v19 = vunpack.i.l.bf16 %v5715_v0 }
  0xfd   : > { %v771_v9 = vunpack.c.l.bf16 %v744_v11  ;;  %v772_v55 = vunpack.c.h.bf16 %v744_v11  ;;  %v811_v54 = vsel %vm809_vm1, %v8551_v58, %v4802_v8  ;;  %v853_v59 = vunpack.c.l.bf16 %v841_v49 }
  0xfe   : > { %v810_v61 = vsel %vm809_vm1, %v8552_v12, %v4801_v48  ;;  %v816_v41 = vsel %vm809_vm1, %v4801_v48, %v8553_v19  ;;  %v786_v42 = vpack.c.bf16 %v780_v17, %v779_v53  ;;  %v8554_v22 = vunpack.i.h.bf16 %v5715_v0  ;;  %v4815_v53 = vpop.permute.xlu0 %4814 }
  0xff   : > { %v783_v39 = vmul.f32 %v775_v13, %v771_v9  ;;  %v784_v28 = vmul.f32 %v776_v14, %v772_v55  ;;  %v819_v52 = vpack.c.bf16 %v816_v41, %v810_v61  ;;  %v4093_v10 = vor.u32 %v4516_v34, %v4092_v5 }
 0x100   : > { %v817_v60 = vsel %vm809_vm1, %v4802_v8, %v8554_v22  ;;  %v4097_v36 = vor.u32 %v4514_v35, %v4094_v37  ;;  %v520_v13 = vpack.i.b16 %v5657_v26, %v5657_v26  ;;  %790 = vst [vmem:[#allocation2 + $0xc8] sm:$0xff] %v786_v42  ;;  %v523_v45 = vpack.i.b16 %v5659_v27, %v5659_v27  ;;  %v6165_v17 = vld [vmem:[#allocation1] sm:$0xff]  ;;  %v6167_v58 = vld [vmem:[#allocation1 + $0x9] sm:$0xff] }
 0x101   : > { %v788_v57 = vpack.c.bf16 %v784_v28, %v783_v39  ;;  %v821_v2 = vpack.c.bf16 %v817_v60, %v811_v54  ;;  %v844_v14 = vunpack.c.l.bf16 %v819_v52  ;;  %v845_v20 = vunpack.c.h.bf16 %v819_v52  ;;  %1242 = vmatpush.bf16.msra.mxu1 %v4093_v10  ;;  %v4484_v47 = vld [vmem:[#allocation2 + $0xc] sm:$0xf0] }
 0x102   : > { %v4822_v44 = vunpack.i.h.bf16 %v4820_v33  ;;  %1280 = vmatpush.bf16.msra.mxu3 %v4097_v36  ;;  %v522_v11 = vperm.slane %v520_v13, 0  ;;  %v4821_v29 = vunpack.i.l.bf16 %v4820_v33  ;;  %v525_v23 = vperm.slane %v523_v45, 0  ;;  %v3964_v27 = vld [vmem:[#allocation2] sm:$0xf]  ;;  %v6169_v54 = vld [vmem:[#allocation1 + $0x12] sm:$0xff]  ;;  %v6179_v39 = vld [vmem:[#allocation1 + $0x1b] sm:$0xff] }
 0x103   : > { %792 = vst [vmem:[#allocation2 + $0xd8] sm:$0xff] %v788_v57  ;;  %v848_v0 = vunpack.c.l.bf16 %v821_v2  ;;  %v849_v1 = vunpack.c.h.bf16 %v821_v2  ;;  %v856_v38 = vmul.f32 %v852_v46, %v844_v14  ;;  %v857_v26 = vmul.f32 %v853_v59, %v845_v20  ;;  %v4482_v20 = vld [vmem:[#allocation2 + $0x4] sm:$0xf]  ;;  %v3966_v45 = vld [vmem:[#allocation2 + $0x10] sm:$0xf0] }
 0x104   : > { %v8555_v8 = vunpack.i.h.bf16 %v5762_v24  ;;  %v536_v49 = vunpack.c.l.bf16 %v522_v11  ;;  %v8556_v5 = vunpack.i.l.bf16 %v5762_v24  ;;  %v537_v61 = vunpack.c.l.bf16 %v525_v23  ;;  %1873 = vst [vmem:[#allocation1] ss:$9 sm:$0xff] %v4130_v40 }
 0x105   : > { %v860_v9 = vmul.f32 %v852_v46, %v848_v0  ;;  %v861_v55 = vmul.f32 %v853_v59, %v849_v1  ;;  %v863_v12 = vpack.c.bf16 %v857_v26, %v856_v38  ;;  %v8557_v35 = vunpack.i.l.bf16 %v5912_v7 }
 0x106   : > { %v495_v48 = vsel %vm493_vm4, %v4822_v44, %v8555_v8  ;;  %v494_v34 = vsel %vm493_vm4, %v4821_v29, %v8556_v5  ;;  %v8558_v37 = vunpack.i.h.bf16 %v5912_v7  ;;  %v597_v41 = vpack.i.b16 %v5667_v31, %v5667_v31  ;;  %v4835_v8 = vpop.permute.xlu1 %4834 }
 0x107   : > { %v496_v46 = vsel %vm493_vm4, %v8557_v35, %v4821_v29  ;;  %v865_v28 = vpack.c.bf16 %v861_v55, %v860_v9  ;;  %867 = vst [vmem:[#allocation2 + $0xe8] sm:$0xff] %v863_v12  ;;  %v600_v33 = vpack.i.b16 %v5671_v32, %v5671_v32  ;;  %v4817_v42 = vunpack.i.h.bf16 %v4815_v53 }
 0x108   : > { %v497_v24 = vsel %vm493_vm4, %v8558_v37, %v4822_v44  ;;  %v503_v59 = vpack.c.bf16 %v494_v34, %v496_v46  ;;  %v4816_v22 = vunpack.i.l.bf16 %v4815_v53  ;;  %v3965_v60 = vor.u32 %v4484_v47, %v3964_v27 }
 0x109   : > { %v505_v19 = vpack.c.bf16 %v495_v48, %v497_v24  ;;  %869 = vst [vmem:[#allocation2 + $0xf8] sm:$0xff] %v865_v28  ;;  %v599_v2 = vperm.slane %v597_v41, 0  ;;  %v602_v36 = vperm.slane %v600_v33, 0  ;;  %v8559_v13 = vunpack.i.h.bf16 %v5713_v63 }
 0x10a   : > { %v528_v7 = vunpack.c.l.bf16 %v503_v59  ;;  %v529_v52 = vunpack.c.h.bf16 %v503_v59  ;;  %v8560_v14 = vunpack.i.h.bf16 %v5853_v18  ;;  %1223 = vmatpush.bf16.msra.mxu0 %v3965_v60  ;;  %v8561_v26 = vunpack.i.l.bf16 %v5713_v63 }
 0x10b   : > { %v532_v10 = vunpack.c.l.bf16 %v505_v19  ;;  %v533_v57 = vunpack.c.h.bf16 %v505_v19  ;;  %v572_v31 = vsel %vm570_vm3, %v4817_v42, %v8559_v13  ;;  %v613_v29 = vunpack.c.l.bf16 %v599_v2  ;;  %v6206_v12 = vld [vmem:[#allocation1] sm:$0xff]  ;;  %v6210_v35 = vld [vmem:[#allocation1 + $0x12] sm:$0xff]  ;;  %v4830_v2 = vpop.permute.xlu0 %4829 }
 0x10c   : > { %v574_v32 = vsel %vm570_vm3, %v8560_v14, %v4817_v42  ;;  %v540_v44 = vmul.f32 %v536_v49, %v528_v7  ;;  %v541_v0 = vmul.f32 %v537_v61, %v529_v52  ;;  %v614_v40 = vunpack.c.l.bf16 %v602_v36  ;;  %8563 = vst [vmem:[#allocation13_spill] sm:$0xff] %v6210_v35  ;;  %v6216_v28 = vld [vmem:[#allocation1 + $0x1b] sm:$0xff] }
 0x10d   : > { %v544_v1 = vmul.f32 %v536_v49, %v532_v10  ;;  %v545_v11 = vmul.f32 %v537_v61, %v533_v57  ;;  %v582_v38 = vpack.c.bf16 %v572_v31, %v574_v32  ;;  %v571_v23 = vsel %vm570_vm3, %v4816_v22, %v8561_v26  ;;  %v4131_v49 = vld [vmem:[%s8377_s1 + $0x8] sm:$0xf]  ;;  %8564 = vst [vmem:[#allocation14_spill] sm:$0xff] %v6216_v28 }
 0x10e   : > { %v547_v48 = vpack.c.bf16 %v541_v0, %v540_v44  ;;  %v8562_v47 = vunpack.i.l.bf16 %v5853_v18  ;;  %v3969_v55 = vor.u32 %v4482_v20, %v3966_v45  ;;  %v366_v63 = vpack.i.b16 %v5625_v15, %v5625_v15  ;;  %v6208_v61 = vld [vmem:[#allocation1 + $0x9] sm:$0xff] }
 0x10f   : > { %v549_v27 = vpack.c.bf16 %v545_v11, %v544_v1  ;;  %v609_v5 = vunpack.c.l.bf16 %v582_v38  ;;  %v610_v34 = vunpack.c.h.bf16 %v582_v38  ;;  %v369_v18 = vpack.i.b16 %v5627_v16, %v5627_v16  ;;  %2000 = vst [vmem:[#allocation1] ss:$9 sm:$0xff] %v4131_v49  ;;  %v4518_v11 = vld [vmem:[%s8378_s2 + $0x4] sm:$0xf] }
 0x110   : > { %v573_v9 = vsel %vm570_vm3, %v8562_v47, %v4816_v22  ;;  %551 = vst [vmem:[#allocation2 + $0x48] sm:$0xff] %v547_v48  ;;  %1261 = vmatpush.bf16.msra.mxu2 %v3969_v55  ;;  %v4837_v46 = vunpack.i.h.bf16 %v4835_v8  ;;  %v4836_v37 = vunpack.i.l.bf16 %v4835_v8  ;;  %v913_v24 = vpack.i.b16 %v6127_v6, %v6127_v6  ;;  %v4084_v8 = vld [vmem:[#allocation2 + $0xe8] sm:$0xf] }
 0x111   : > { %v580_v53 = vpack.c.bf16 %v571_v23, %v573_v9  ;;  %553 = vst [vmem:[#allocation2 + $0x58] sm:$0xff] %v549_v27  ;;  %v621_v15 = vmul.f32 %v613_v29, %v609_v5  ;;  %v622_v59 = vmul.f32 %v614_v40, %v610_v34  ;;  %v368_v33 = vperm.slane %v366_v63, 0  ;;  %v4132_v23 = vld [vmem:[%s8377_s1 + $0xc] sm:$0xf]  ;;  %v4513_v5 = vld [vmem:[#allocation2 + $0xf4] sm:$0xf0] }
 0x112   : > { %v371_v42 = vperm.slane %v369_v18, 0  ;;  %v8565_v22 = vunpack.i.h.bf16 %v5917_v62  ;;  %v8566_v16 = vunpack.i.l.bf16 %v5917_v62  ;;  %v343_v57 = vsel %vm340_vm7, %v4791_v25, %v4836_v37  ;;  %v4511_v34 = vld [vmem:[#allocation2 + $0xec] sm:$0xf] }
 0x113   : > { %v605_v19 = vunpack.c.l.bf16 %v580_v53  ;;  %v606_v41 = vunpack.c.h.bf16 %v580_v53  ;;  %v626_v6 = vpack.c.bf16 %v622_v59, %v621_v15  ;;  %v382_v36 = vunpack.c.l.bf16 %v368_v33  ;;  %v4086_v53 = vld [vmem:[#allocation2 + $0xf8] sm:$0xf0] }
 0x114   : > { %v342_v60 = vsel %vm340_vm7, %v4837_v46, %v8565_v22  ;;  %v341_v7 = vsel %vm340_vm7, %v4836_v37, %v8566_v16  ;;  %v383_v13 = vunpack.c.l.bf16 %v371_v42  ;;  %v344_v62 = vsel %vm340_vm7, %v4792_v30, %v4837_v46  ;;  %v4519_v30 = vld [vmem:[%s8378_s2 + $0x4] sm:$0xf0] }
 0x115   : > { %v617_v52 = vmul.f32 %v613_v29, %v605_v19  ;;  %v618_v10 = vmul.f32 %v614_v40, %v606_v41  ;;  %v350_v31 = vpack.c.bf16 %v341_v7, %v343_v57  ;;  %630 = vst [vmem:[#allocation2 + $0x78] sm:$0xff] %v626_v6  ;;  %v352_v32 = vpack.c.bf16 %v342_v60, %v344_v62 }
 0x116   : > { %v6234_v20 = vperm.slane %v913_v24, 0  ;;  %v916_v45 = vpack.i.b16 %v6129_v50, %v6129_v50  ;;  %v4832_v25 = vunpack.i.h.bf16 %v4830_v2  ;;  %v4831_v1 = vunpack.i.l.bf16 %v4830_v2  ;;  %v3950_v50 = vld [vmem:[%s8378_s2 + $0x8] sm:$0xf0]  ;;  %v6262_v37 = vld [vmem:[#allocation1] sm:$0xff]  ;;  %v6266_v15 = vld [vmem:[#allocation1 + $0x12] sm:$0xff] }
 0x117   : > { %v624_v14 = vpack.c.bf16 %v618_v10, %v617_v52  ;;  %v374_v44 = vunpack.c.l.bf16 %v350_v31  ;;  %v375_v0 = vunpack.c.h.bf16 %v350_v31  ;;  %v378_v29 = vunpack.c.l.bf16 %v352_v32  ;;  %v6264_v24 = vld [vmem:[#allocation1 + $0x9] sm:$0xff]  ;;  %8569 = vst [vmem:[#allocation15_spill] sm:$0xff] %v6266_v15  ;;  %v6272_v19 = vld [vmem:[#allocation1 + $0x1b] sm:$0xff] }
 0x118   : > { %v379_v40 = vunpack.c.h.bf16 %v352_v32  ;;  %v918_v38 = vperm.slane %v916_v45, 0  ;;  %v929_v26 = vunpack.c.l.bf16 %v6234_v20  ;;  %v8567_v47 = vunpack.i.h.bf16 %v5861_v3  ;;  %8570 = vst [vmem:[#allocation16_spill] sm:$0xff] %v6272_v19  ;;  %v4068_v52 = vld [vmem:[#allocation2 + $0xc8] sm:$0xf]  ;;  %v4509_v2 = vld [vmem:[#allocation2 + $0xd4] sm:$0xf0] }
 0x119   : > { %628 = vst [vmem:[#allocation2 + $0x68] sm:$0xff] %v624_v14  ;;  %v386_v48 = vmul.f32 %v382_v36, %v374_v44  ;;  %v387_v27 = vmul.f32 %v383_v13, %v375_v0  ;;  %v8568_v55 = vunpack.i.l.bf16 %v5861_v3  ;;  %v390_v63 = vmul.f32 %v382_v36, %v378_v29  ;;  %v4070_v36 = vld [vmem:[#allocation2 + $0xd8] sm:$0xf0] }
 0x11a   : > { %v888_v9 = vsel %vm8411_vm6, %v8567_v47, %v4832_v25  ;;  %v391_v18 = vmul.f32 %v383_v13, %v379_v40  ;;  %v930_v46 = vunpack.c.l.bf16 %v918_v38  ;;  %v893_v3 = vsel %vm8411_vm6, %v4831_v1, %v4771_v4  ;;  %2127 = vst [vmem:[#allocation1] ss:$9 sm:$0xff] %v4132_v23  ;;  %v989_v13 = vld [vmem:[%s8379_s3 + $0x10] sm:$0xff]  ;;  %v4054_v38 = vld [vmem:[#allocation2 + $0xb8] sm:$0xf0] }
 0x11b   : > { %v887_v49 = vsel %vm8411_vm6, %v8568_v55, %v4831_v1  ;;  %v393_v59 = vpack.c.bf16 %v387_v27, %v386_v48  ;;  %v894_v41 = vsel %vm8411_vm6, %v4832_v25, %v4772_v43  ;;  %v6278_v42 = vor.u32 %v4519_v30, %v3948_v56  ;;  %v4507_v43 = vld [vmem:[#allocation2 + $0xcc] sm:$0xf]  ;;  %v4052_v25 = vld [vmem:[#allocation2 + $0xa8] sm:$0xf]  ;;  %v4505_v1 = vld [vmem:[#allocation2 + $0xb4] sm:$0xf0] }
 0x11c   : > { %v896_v33 = vpack.c.bf16 %v893_v3, %v887_v49  ;;  %v395_v22 = vpack.c.bf16 %v391_v18, %v390_v63  ;;  %v898_v60 = vpack.c.bf16 %v894_v41, %v888_v9  ;;  %v6280_v16 = vor.u32 %v4518_v11, %v3950_v50  ;;  %v5289_v56 = vld [vmem:[%s5569_s17 + $0x10] sm:$0xff]  ;;  %v5290_v30 = vld [vmem:[%s5569_s17 + $0x18] sm:$0xff]  ;;  %v4503_v40 = vld [vmem:[#allocation2 + $0xac] sm:$0xf] }
 0x11d   : > { %397 = vst [vmem:[#allocation2 + $0x8] sm:$0xff] %v393_v59  ;;  %1224 = vmatmul.bf16.vlgmr.msra.gmra.mxu0 %v6278_v42  ;;  %1262 = vmatmul.bf16.vlgmr.msra.gmra.mxu2 %v6278_v42  ;;  %v4085_v21 = vor.u32 %v4513_v5, %v4084_v8  ;;  %v4089_v6 = vor.u32 %v4511_v34, %v4086_v53  ;;  %v5434_v20 = vmov 0   ;;  %v990_v50 = vld [vmem:[%s8379_s3 + $0x18] sm:$0xff]  ;;  %v5292_v23 = vld [vmem:[%s5569_s17 + $0x38] sm:$0xff]  ;;  %v3956_v9 = vld [vmem:[%s8378_s2 + $0x10] sm:$0xf] }
 0x11e   : > { %v921_v7 = vunpack.c.l.bf16 %v896_v33  ;;  %v922_v4 = vunpack.c.h.bf16 %v896_v33  ;;  %399 = vst [vmem:[#allocation2 + $0x18] sm:$0xff] %v395_v22  ;;  %v925_v10 = vunpack.c.l.bf16 %v898_v60  ;;  %v926_v57 = vunpack.c.h.bf16 %v898_v60  ;;  %4108 = vmatmul.msk.bf16.vlgmr.msra.gmra.mxu3 %vm1209_vm8, %v6280_v16  ;;  %4106 = vmatmul.msk.bf16.vlgmr.msra.gmra.mxu1 %vm1209_vm8, %v6280_v16  ;;  %v987_v48 = vld [vmem:[%s8379_s3] sm:$0xff]  ;;  %v4521_v55 = vld [vmem:[%s8378_s2 + $0x14] sm:$0xf0]  ;;  %v4520_v49 = vld [vmem:[%s8378_s2 + $0x14] sm:$0xf] }
 0x11f   : > { %1292 = vmatpush.bf16.msrb.mxu1 %v4085_v21  ;;  %1330 = vmatpush.bf16.msrb.mxu0 %v4089_v6  ;;  %v4069_v44 = vor.u32 %v4509_v2, %v4068_v52  ;;  %v4073_v0 = vor.u32 %v4507_v43, %v4070_v36  ;;  %v632_v11 = vpack.c.bf16 %v5290_v30, %v5289_v56  ;;  %v3958_v5 = vld [vmem:[%s8378_s2 + $0x18] sm:$0xf0]  ;;  %v4497_v6 = vld [vmem:[#allocation2 + $0x74] sm:$0xf0]  ;;  %v988_v52 = vld [vmem:[%s8379_s3 + $0x8] sm:$0xff] }
 0x120   : > { %v933_v62 = vmul.f32 %v929_v26, %v921_v7  ;;  %v934_v31 = vmul.f32 %v930_v46, %v922_v4  ;;  %v937_v14 = vmul.f32 %v929_v26, %v925_v10  ;;  %v938_v32 = vmul.f32 %v930_v46, %v926_v57  ;;  %4839 = vset.pattern.permute.xlu0 %v5434_v20  ;;  %v5291_v26 = vld [vmem:[%s5569_s17 + $0x30] sm:$0xff]  ;;  %v4020_v43 = vld [vmem:[#allocation2 + $0x68] sm:$0xf]  ;;  %v4495_v10 = vld [vmem:[#allocation2 + $0x6c] sm:$0xf]  ;;  %s8588_s17 = smov 15  }
 0x121   : > { %1003 = vperm.xlu0 %4839, %v989_v13   ;;  %v634_v8 = vpack.c.bf16 %v5292_v23, %v5291_v26  ;;  %4840 = vset.pattern.permute.xlu1 %v5434_v20  ;;  %v4053_v27 = vor.u32 %v4505_v1, %v4052_v25  ;;  %v4057_v47 = vor.u32 %v4503_v40, %v4054_v38  ;;  %v4022_v57 = vld [vmem:[#allocation2 + $0x78] sm:$0xf0]  ;;  %v4004_v13 = vld [vmem:[#allocation2 + $0x48] sm:$0xf] }
 0x122   : > { %v940_v45 = vpack.c.bf16 %v934_v31, %v933_v62  ;;  %v942_v29 = vpack.c.bf16 %v938_v32, %v937_v14  ;;  %4838 = vset.pattern.permute.xlu2 %v5434_v20  ;;  %1008 = vperm.xlu1 %4840, %v990_v50   ;;  %636 = vst [vmem:[#allocation2 + $0x88] sm:$0xff] %v632_v11  ;;  %v4493_v62 = vld [vmem:[#allocation2 + $0x54] sm:$0xf0]  ;;  %v4491_v31 = vld [vmem:[#allocation2 + $0x4c] sm:$0xf] }
 0x123   : > { %1293 = vmatpush.bf16.msrb.mxu1 %v4069_v44  ;;  %1331 = vmatpush.bf16.msrb.mxu0 %v4073_v0  ;;  %638 = vst [vmem:[#allocation2 + $0x98] sm:$0xff] %v634_v8  ;;  %v3957_v34 = vor.u32 %v4521_v55, %v3956_v9  ;;  %v3961_v53 = vor.u32 %v4520_v49, %v3958_v5  ;;  %v4006_v14 = vld [vmem:[#allocation2 + $0x58] sm:$0xf0]  ;;  %v4489_v44 = vld [vmem:[#allocation2 + $0x34] sm:$0xf0] }
 0x124   : > { %944 = vst [vmem:[#allocation2 + $0x108] sm:$0xff] %v940_v45  ;;  %993 = vperm.xlu2 %4838, %v987_v48   ;;  %v4021_v2 = vor.u32 %v4497_v6, %v4020_v43  ;;  %v4025_v36 = vor.u32 %v4495_v10, %v4022_v57  ;;  %v4005_v32 = vor.u32 %v4493_v62, %v4004_v13  ;;  %v3988_v45 = vld [vmem:[#allocation2 + $0x28] sm:$0xf]  ;;  %v4487_v0 = vld [vmem:[#allocation2 + $0x2c] sm:$0xf] }
 0x125   : > { %946 = vst [vmem:[#allocation2 + $0x118] sm:$0xff] %v942_v29  ;;  %v4009_v20 = vor.u32 %v4491_v31, %v4006_v14  ;;  %v3990_v25 = vld [vmem:[#allocation2 + $0x38] sm:$0xf0]  ;;  %v3989_v1 = vor.u32 %v4489_v44, %v3988_v45  ;;  %v3972_v30 = vld [vmem:[#allocation2 + $0x8] sm:$0xf] }
 0x126   : > { %v3993_v56 = vor.u32 %v4487_v0, %v3990_v25  ;;  %v4485_v11 = vld [vmem:[#allocation2 + $0x14] sm:$0xf0]  ;;  %v4483_v50 = vld [vmem:[#allocation2 + $0xc] sm:$0xf]  ;;  %v3974_v29 = vld [vmem:[#allocation2 + $0x18] sm:$0xf0] }
 0x127   : > { %1294 = vmatpush.bf16.msrb.mxu1 %v4053_v27  ;;  %1332 = vmatpush.bf16.msrb.mxu0 %v4057_v47  ;;  %v3973_v40 = vor.u32 %v4485_v11, %v3972_v30  ;;  %v3977_v38 = vor.u32 %v4483_v50, %v3974_v29 }
 0x129   : > { %v4036_v59 = vld [vmem:[#allocation2 + $0x88] sm:$0xf]  ;;  %v4499_v41 = vld [vmem:[#allocation2 + $0x8c] sm:$0xf] }
 0x12a   : > { %v4501_v60 = vld [vmem:[#allocation2 + $0x94] sm:$0xf0]  ;;  %v4038_v7 = vld [vmem:[#allocation2 + $0x98] sm:$0xf0] }
 0x12b   : > { %v4100_v63 = vld [vmem:[#allocation2 + $0x108] sm:$0xf]  ;;  %v4515_v18 = vld [vmem:[#allocation2 + $0x10c] sm:$0xf]  ;;  %v4037_v4 = vor.u32 %v4501_v60, %v4036_v59  ;;  %v4041_v21 = vor.u32 %v4499_v41, %v4038_v7 }
 0x12c   : > { %v4517_v46 = vld [vmem:[#allocation2 + $0x114] sm:$0xf0]  ;;  %v4102_v3 = vld [vmem:[#allocation2 + $0x118] sm:$0xf0]  ;;  %998 = vperm.xlu2 %4838, %v988_v52  }
 0x12d   : > { %v4101_v33 = vor.u32 %v4517_v46, %v4100_v63  ;;  %v4105_v22 = vor.u32 %v4515_v18, %v4102_v3  ;;  %1229 = vmatmul.bf16.gmra.mxu0 %v3957_v34  ;;  %1267 = vmatmul.bf16.gmra.mxu2 %v3957_v34 }
 0x12e   : > { %4109 = vmatmul.msk.bf16.gmra.mxu3 %vm1209_vm8, %v3961_v53  ;;  %4107 = vmatmul.msk.bf16.gmra.mxu1 %vm1209_vm8, %v3961_v53 }
 0x12f   : > { %1318 = vmatpush.bf16.msrb.mxu3 %v4101_v33  ;;  %1356 = vmatpush.bf16.msrb.mxu2 %v4105_v22 }
 0x130   : > { %1295 = vmatpush.bf16.msrb.mxu1 %v4037_v4  ;;  %1333 = vmatpush.bf16.msrb.mxu0 %v4041_v21 }
 0x134   : > { %1296 = vmatpush.bf16.msrb.mxu1 %v4021_v2  ;;  %1334 = vmatpush.bf16.msrb.mxu0 %v4025_v36 }
 0x138   : > { %1297 = vmatpush.bf16.msrb.mxu1 %v4005_v32  ;;  %1335 = vmatpush.bf16.msrb.mxu0 %v4009_v20 }
 0x13c   : > { %1298 = vmatpush.bf16.msrb.mxu1 %v3989_v1  ;;  %1336 = vmatpush.bf16.msrb.mxu0 %v3993_v56 }
 0x13d   : > { %4112 = vmatmul.msk.bf16.vlgmr.msrb.gmra.mxu2 %vm1209_vm8, %v6280_v16 }
 0x13e   : > { %4110 = vmatmul.msk.bf16.vlgmr.msrb.gmra.mxu3 %vm1209_vm8, %v6280_v16 }
 0x140   : > { %1299 = vmatpush.bf16.msrb.mxu1 %v3973_v40  ;;  %1337 = vmatpush.bf16.msrb.mxu0 %v3977_v38 }
 0x143   : > { %1300 = vmatmul.bf16.vlgmr.msrb.gmra.mxu1 %v6278_v42  ;;  %1338 = vmatmul.bf16.vlgmr.msrb.gmra.mxu0 %v6278_v42 }
 0x14d   : > { %4113 = vmatmul.msk.bf16.gmra.mxu2 %vm1209_vm8, %v3961_v53 }
 0x14e   : > { %4111 = vmatmul.msk.bf16.gmra.mxu3 %vm1209_vm8, %v3961_v53 }
 0x153   : > { %1305 = vmatmul.bf16.gmra.mxu1 %v3957_v34  ;;  %1343 = vmatmul.bf16.gmra.mxu0 %v3957_v34 }
 0x17e   : > { %v6326_v26 = vpop.permute.xlu2 %993 }
 0x186   : > { %v6332_v9 = vpop.permute.xlu2 %998 }
 0x193   : > { %v6342_v33 = vpop.permute.xlu0 %1003 }
 0x194   : > { %v6355_v45 = vpop.permute.xlu1 %1008 }
 0x19a   : > { %v1225_v23 = vpop.f32.mrf.mxu0 }
 0x19b   : > { %v1226_v8 = vadd.f32 %v1225_v23, %v6326_v26  ;;  %v1244_v16 = vpop.f32.mrf.mxu1 }
 0x19d   : > { %v6329_v48 = vadd.f32 %v1244_v16, %v1226_v8 }
 0x19f   : > { %v4114_v27 = vmul.f32 -1.442695, %v6329_v48 }
 0x1a0   : > { %v1263_v47 = vpop.f32.mrf.mxu2 }
 0x1a1   : > { %5161 = vpow2.f32 %v4114_v27  ;;  %v1264_v42 = vadd.f32 %v1263_v47, %v6326_v26  ;;  %v1282_v55 = vpop.f32.mrf.mxu3 }
 0x1a2   : > { %v1227_v49 = vpop.f32.mrf.mxu0 }
 0x1a3   : > { %v6335_v5 = vadd.f32 %v1282_v55, %v1264_v42  ;;  %v1228_v34 = vadd.f32 %v1227_v49, %v6332_v9  ;;  %v1246_v53 = vpop.f32.mrf.mxu1 }
 0x1a5   : > { %v4115_v63 = vmul.f32 -1.442695, %v6335_v5  ;;  %v6339_v18 = vadd.f32 %v1246_v53, %v1228_v34 }
 0x1a7   : > { %v5162_v46 = vpop.eup %5161  ;;  %5163 = vpow2.f32 %v4115_v63  ;;  %v4118_v3 = vmul.f32 -1.442695, %v6339_v18 }
 0x1a8   : > { %v1416_v59 = vadd.f32 1.0, %v5162_v46  ;;  %v1265_v41 = vpop.f32.mrf.mxu2 }
 0x1a9   : > { %5165 = vpow2.f32 %v4118_v3  ;;  %v1266_v22 = vadd.f32 %v1265_v41, %v6332_v9  ;;  %v1284_v60 = vpop.f32.mrf.mxu3 }
 0x1aa   : > { %5167 = vrcp.f32 %v1416_v59  ;;  %v1230_v7 = vpop.f32.mrf.mxu0  ;;  %v1441_v50 = vand.u32 2147483647, %v1416_v59  ;;  %v1443_v8 = vand.u32 2147483648, %v1416_v59  ;;  %vm1437_vm10 = vweird.f32 %v1416_v59 }
 0x1ab   : > { %v6345_v4 = vadd.f32 %v1284_v60, %v1266_v22  ;;  %v1231_v21 = vadd.f32 %v1230_v7, %v6342_v33  ;;  %v1249_v6 = vpop.f32.mrf.mxu1 }
 0x1ac   : > { %vm1442_vm12 = vcmp.eq.f32.partialorder %v1441_v50, 8.507059e+37  ;;  %v1444_v22 = vor.u32 1.1754944e-38, %v1443_v8 }
 0x1ad   : > { %v5164_v52 = vpop.eup %5163  ;;  %v4119_v43 = vmul.f32 -1.442695, %v6345_v4  ;;  %v6349_v10 = vadd.f32 %v1249_v6, %v1231_v21 }
 0x1ae   : > { %v1417_v57 = vadd.f32 1.0, %v5164_v52 }
 0x1af   : > { %v5166_v2 = vpop.eup %5165  ;;  %5169 = vpow2.f32 %v4119_v43  ;;  %v4122_v36 = vmul.f32 -1.442695, %v6349_v10 }
 0x1b0   : > { %v5168_v13 = vpop.eup %5167  ;;  %5171 = vrcp.f32 %v1417_v57  ;;  %v1268_v62 = vpop.f32.mrf.mxu2  ;;  %v6352_v14 = vadd.f32 1.0, %v5166_v2  ;;  %v1456_v27 = vand.u32 2147483647, %v1417_v57  ;;  %v1458_v47 = vand.u32 2147483648, %v1417_v57 }
 0x1b1   : > { %v1433_v31 = vmul.f32 %v5168_v13, %v1416_v59  ;;  %5173 = vpow2.f32 %v4122_v36  ;;  %v1287_v32 = vpop.f32.mrf.mxu3  ;;  %v1269_v20 = vadd.f32 %v1268_v62, %v6342_v33  ;;  %vm1438_vm9 = vweird.f32 %v5168_v13 }
 0x1b2   : > { %v1232_v44 = vpop.f32.mrf.mxu0  ;;  %5175 = vrcp.f32 %v6352_v14  ;;  %vm6368_vm11 = vmor %vm1437_vm10, %vm1438_vm9  ;;  %vm1452_vm14 = vweird.f32 %v1417_v57  ;;  %vm6381_vm15 = vcmp.eq.f32.partialorder %v1456_v27, 8.507059e+37  ;;  %v1459_v21 = vor.u32 1.1754944e-38, %v1458_v47 }
 0x1b3   : > { %v1434_v0 = vsub.f32 1.0, %v1433_v31  ;;  %v6358_v25 = vadd.f32 %v1287_v32, %v1269_v20  ;;  %v1233_v30 = vadd.f32 %v1232_v44, %v6355_v45  ;;  %v1251_v42 = vpop.f32.mrf.mxu1  ;;  %vm1497_vm9 = vweird.f32 %v6352_v14 }
 0x1b4   : > { %v1503_v31 = vand.u32 2147483648, %v6352_v14 }
 0x1b5   : > { %v5170_v1 = vpop.eup %5169  ;;  %v1435_v56 = vmul.f32 %v5168_v13, %v1434_v0  ;;  %v4123_v40 = vmul.f32 -1.442695, %v6358_v25  ;;  %v6374_v46 = vadd.f32 %v1251_v42, %v1233_v30 }
 0x1b6   : > { %v5172_v11 = vpop.eup %5171  ;;  %v6361_v29 = vadd.f32 1.0, %v5170_v1 }
 0x1b7   : > { %v5174_v38 = vpop.eup %5173  ;;  %v1436_v23 = vadd.f32 %v5168_v13, %v1435_v56  ;;  %v1448_v16 = vmul.f32 %v5172_v11, %v1417_v57  ;;  %vm1453_vm13 = vweird.f32 %v5172_v11  ;;  %v4126_v2 = vmul.f32 -1.442695, %v6374_v46 }
 0x1b8   : > { %5177 = vrcp.f32 %v6361_v29  ;;  %v1270_v55 = vpop.f32.mrf.mxu2  ;;  %v6365_v49 = vpop.eup %5175  ;;  %v6372_v63 = vadd.f32 1.0, %v5174_v38  ;;  %vm1454_vm8 = vmor %vm1452_vm14, %vm1453_vm13  ;;  %v1501_v57 = vand.u32 2147483647, %v6352_v14  ;;  %v1518_v42 = vand.u32 2147483648, %v6361_v29 }
 0x1b9   : > { %v1449_v53 = vsub.f32 1.0, %v1448_v16  ;;  %v1289_v3 = vpop.f32.mrf.mxu3  ;;  %v1440_v59 = vsel %vm6368_vm11, %v5168_v13, %v1436_v23  ;;  %v1493_v41 = vmul.f32 %v6365_v49, %v6352_v14  ;;  %5179 = vpow2.f32 %v4123_v40 }
 0x1ba   : > { %5181 = vrcp.f32 %v6372_v63  ;;  %v1445_v52 = vsel %vm1442_vm12, %v1444_v22, %v1440_v59  ;;  %v1271_v36 = vadd.f32 %v1270_v55, %v6355_v45  ;;  %vm1498_vm10 = vweird.f32 %v6365_v49 }
 0x1bb   : > { %v1450_v60 = vmul.f32 %v5172_v11, %v1449_v53  ;;  %v1494_v6 = vsub.f32 1.0, %v1493_v41  ;;  %5183 = vpow2.f32 %v4126_v2  ;;  %v6394_v0 = vmul.f32 %v1445_v52, %v6329_v48  ;;  %vm6410_vm11 = vmor %vm1497_vm9, %vm1498_vm10 }
 0x1bc   : > { %v6399_v30 = vadd.f32 %v1289_v3, %v1271_v36  ;;  %vm6414_vm12 = vcmp.eq.f32.partialorder %v1501_v57, 8.507059e+37  ;;  %v1504_v53 = vor.u32 1.1754944e-38, %v1503_v31  ;;  %vm1512_vm14 = vweird.f32 %v6361_v29 }
 0x1bd   : > { %v1451_v43 = vadd.f32 %v5172_v11, %v1450_v60  ;;  %v1495_v62 = vmul.f32 %v6365_v49, %v1494_v6  ;;  %vm1557_vm10 = vweird.f32 %v6372_v63 }
 0x1be   : > { %v5178_v13 = vpop.eup %5177  ;;  %v4127_v60 = vmul.f32 -1.442695, %v6399_v30 }
 0x1bf   : > { %v1455_v32 = vsel %vm1454_vm8, %v5172_v11, %v1451_v43  ;;  %v1508_v20 = vmul.f32 %v5178_v13, %v6361_v29  ;;  %v5180_v44 = vpop.eup %5179  ;;  %v1496_v56 = vadd.f32 %v6365_v49, %v1495_v62  ;;  %vm1513_vm13 = vweird.f32 %v5178_v13 }
 0x1c0   : > { %v1460_v1 = vsel %vm6381_vm15, %v1459_v21, %v1455_v32  ;;  %v1301_v50 = vpop.f32.mrf.mxu1  ;;  %v1339_v40 = vpop.f32.mrf.mxu0  ;;  %v6427_v59 = vadd.f32 1.0, %v5180_v44  ;;  %vm1514_vm15 = vmor %vm1512_vm14, %vm1513_vm13  ;;  %5185 = vpow2.f32 %v4127_v60 }
 0x1c1   : > { %v6401_v38 = vpop.eup %5181  ;;  %v1673_v11 = vmul.f32 %v1460_v1, %v6335_v5  ;;  %v1509_v23 = vsub.f32 1.0, %v1508_v20  ;;  %v1302_v8 = vadd.f32 %v1301_v50, %v6326_v26  ;;  %v1340_v16 = vadd.f32 %v1339_v40, %v6326_v26  ;;  %v1358_v48 = vpop.f32.mrf.mxu2 }
 0x1c2   : > { %v1516_v5 = vand.u32 2147483647, %v6361_v29  ;;  %v1320_v55 = vpop.f32.mrf.mxu3  ;;  %v1500_v34 = vsel %vm6410_vm11, %v6365_v49, %v1496_v56  ;;  %v1553_v3 = vmul.f32 %v6401_v38, %v6372_v63  ;;  %v5184_v41 = vpop.eup %5183  ;;  %v1519_v29 = vor.u32 1.1754944e-38, %v1518_v42 }
 0x1c3   : > { %v2196_v26 = vpack.c.bf16 %v1673_v11, %v6394_v0  ;;  %v1510_v14 = vmul.f32 %v5178_v13, %v1509_v23  ;;  %v6430_v7 = vadd.f32 %v1320_v55, %v1302_v8  ;;  %v6432_v21 = vadd.f32 %v1358_v48, %v1340_v16 }
 0x1c4   : > { %v1505_v49 = vsel %vm6414_vm12, %v1504_v53, %v1500_v34  ;;  %vm1517_vm8 = vcmp.eq.f32.partialorder %v1516_v5, 8.507059e+37  ;;  %v6436_v52 = vadd.f32 1.0, %v5184_v41  ;;  %v1554_v36 = vsub.f32 1.0, %v1553_v3 }
 0x1c5   : > { %2204 = vst [vmem:[#allocation2 + $0x100] sm:$0xff] %v2196_v26  ;;  %v1511_v22 = vadd.f32 %v5178_v13, %v1510_v14  ;;  %v4116_v43 = vmul.f32 -1.442695, %v6430_v7  ;;  %v4117_v62 = vmul.f32 -1.442695, %v6432_v21  ;;  %v6441_v31 = vmul.f32 %v1505_v49, %v6339_v18 }
 0x1c6   : > { %5187 = vrcp.f32 %v6427_v59  ;;  %v1555_v56 = vmul.f32 %v6401_v38, %v1554_v36  ;;  %v5186_v40 = vpop.eup %5185  ;;  %vm1558_vm9 = vweird.f32 %v6401_v38  ;;  %v1563_v26 = vand.u32 2147483648, %v6372_v63 }
 0x1c7   : > { %v1515_v6 = vsel %vm1514_vm15, %v5178_v13, %v1511_v22  ;;  %5189 = vpow2.f32 %v4116_v43  ;;  %v6458_v16 = vadd.f32 1.0, %v5186_v40  ;;  %vm6481_vm11 = vmor %vm1557_vm10, %vm1558_vm9  ;;  %v1561_v3 = vand.u32 2147483647, %v6372_v63 }
 0x1c8   : > { %v1520_v2 = vsel %vm1517_vm8, %v1519_v29, %v1515_v6  ;;  %v1303_v57 = vpop.f32.mrf.mxu1  ;;  %v1341_v20 = vpop.f32.mrf.mxu0  ;;  %5191 = vrcp.f32 %v6436_v52  ;;  %v1556_v5 = vadd.f32 %v6401_v38, %v1555_v56  ;;  %v1564_v6 = vor.u32 1.1754944e-38, %v1563_v26 }
 0x1c9   : > { %v1677_v32 = vmul.f32 %v1520_v2, %v6345_v4  ;;  %v1304_v13 = vadd.f32 %v1303_v57, %v6332_v9  ;;  %v1360_v1 = vpop.f32.mrf.mxu2  ;;  %5193 = vpow2.f32 %v4117_v62  ;;  %v1342_v50 = vadd.f32 %v1341_v20, %v6332_v9 }
 0x1ca   : > { %v1322_v18 = vpop.f32.mrf.mxu3  ;;  %v6452_v4 = vpack.i.bf16 %v6441_v31, %v6394_v0  ;;  %v1560_v22 = vsel %vm6481_vm11, %v6401_v38, %v1556_v5  ;;  %vm1562_vm12 = vcmp.eq.f32.partialorder %v1561_v3, 8.507059e+37 }
 0x1cb   : > { %v2198_v44 = vpack.c.bf16 %v1677_v32, %v6441_v31  ;;  %v6454_v23 = vadd.f32 %v1322_v18, %v1304_v13  ;;  %v6456_v8 = vpack.i.bf16 %v1677_v32, %v1673_v11  ;;  %v6460_v48 = vadd.f32 %v1360_v1, %v1342_v50 }
 0x1cc   : > { %v6462_v27 = vpop.eup %5187  ;;  %4842 = vrot.lane.b32.xlu1 %v6452_v4, %s5433_s11  ;;  %v1565_v36 = vsel %vm1562_vm12, %v1564_v6, %v1560_v22  ;;  %v1578_v1 = vand.u32 2147483648, %v6427_v59 }
 0x1cd   : > { %2206 = vst [vmem:[#allocation2 + $0x110] sm:$0xff] %v2198_v44  ;;  %v4120_v9 = vmul.f32 -1.442695, %v6454_v23  ;;  %4877 = vrot.lane.b32.xlu2 %v6456_v8, %s5426_s12  ;;  %v5190_v47 = vpop.eup %5189  ;;  %4872 = vrot.lane.b32.xlu0 %v6456_v8, %s5433_s11  ;;  %v4121_v34 = vmul.f32 -1.442695, %v6460_v48  ;;  %v1568_v41 = vmul.f32 %v6462_v27, %v6427_v59  ;;  %v6513_v50 = vmul.f32 %v1565_v36, %v6349_v10 }
 0x1ce   : > { %v6473_v11 = vpop.eup %5191  ;;  %v6475_v42 = vadd.f32 1.0, %v5190_v47  ;;  %v1576_v44 = vand.u32 2147483647, %v6427_v59 }
 0x1cf   : > { %5195 = vpow2.f32 %v4120_v9  ;;  %v5194_v55 = vpop.eup %5193  ;;  %v1613_v49 = vmul.f32 %v6473_v11, %v6436_v52  ;;  %v1569_v43 = vsub.f32 1.0, %v1568_v41 }
 0x1d0   : > { %5197 = vrcp.f32 %v6458_v16  ;;  %v1306_v14 = vpop.f32.mrf.mxu1  ;;  %v6492_v60 = vadd.f32 1.0, %v5194_v55  ;;  %v1471_v40 = vand.u32 2147483647, %v6475_v42  ;;  %v1473_v9 = vand.u32 2147483648, %v6475_v42 }
 0x1d1   : > { %5199 = vrcp.f32 %v6475_v42  ;;  %v1307_v29 = vadd.f32 %v1306_v14, %v6342_v33  ;;  %v1614_v20 = vsub.f32 1.0, %v1613_v49  ;;  %v6516_v18 = vmul.f32 %v6462_v27, %v1569_v43 }
 0x1d2   : > { %5201 = vpow2.f32 %v4121_v34  ;;  %v1325_v2 = vpop.f32.mrf.mxu3  ;;  %vm1467_vm13 = vweird.f32 %v6475_v42  ;;  %v1486_v53 = vand.u32 2147483647, %v6492_v60  ;;  %v1488_v41 = vand.u32 2147483648, %v6492_v60 }
 0x1d3   : > { %5203 = vrcp.f32 %v6492_v60  ;;  %v6506_v57 = vadd.f32 %v1325_v2, %v1307_v29  ;;  %v6528_v10 = vmul.f32 %v6473_v11, %v1614_v20  ;;  %vm6535_vm15 = vcmp.eq.f32.partialorder %v1471_v40, 8.507059e+37 }
 0x1d4   : > { %4847 = vrot.lane.b32.xlu1 %v6452_v4, %s5426_s12  ;;  %v1474_v49 = vor.u32 1.1754944e-38, %v1473_v9  ;;  %vm1482_vm8 = vweird.f32 %v6492_v60  ;;  %v4906_v2 = vpack.i.bf16 %v6513_v50, %v6394_v0  ;;  %vm6545_vm11 = vcmp.eq.f32.partialorder %v1486_v53, 8.507059e+37 }
 0x1d5   : > { %v5196_v63 = vpop.eup %5195  ;;  %4882 = vrot.lane.b32.xlu2 %v6456_v8, %s5429_s29  ;;  %v4124_v34 = vmul.f32 -1.442695, %v6506_v57  ;;  %v1489_v9 = vor.u32 1.1754944e-38, %v1488_v41 }
 0x1d6   : > { %v6502_v38 = vpop.eup %5197  ;;  %v6504_v62 = vadd.f32 1.0, %v5196_v63  ;;  %4907 = vrot.lane.b32.xlu0 %v4906_v2, %s5431_s19 }
 0x1d7   : > { %v5200_v32 = vpop.eup %5199  ;;  %v6522_v5 = vmul.f32 %v6502_v38, %v6458_v16  ;;  %vm1633_vm6 = vweird.f32 %v6502_v38 }
 0x1d8   : > { %v5202_v13 = vpop.eup %5201  ;;  %v1463_v56 = vmul.f32 %v5200_v32, %v6475_v42  ;;  %5205 = vrcp.f32 %v6504_v62  ;;  %vm1468_vm14 = vweird.f32 %v5200_v32  ;;  %v1308_v36 = vpop.f32.mrf.mxu1 }
 0x1d9   : > { %v5204_v47 = vpop.eup %5203  ;;  %v6524_v26 = vadd.f32 1.0, %v5202_v13  ;;  %v1629_v63 = vsub.f32 1.0, %v6522_v5  ;;  %vm1469_vm9 = vmor %vm1467_vm13, %vm1468_vm14  ;;  %v1531_v5 = vand.u32 2147483647, %v6504_v62  ;;  %vm1527_vm13 = vweird.f32 %v6504_v62 }
 0x1da   : > { %v1464_v55 = vsub.f32 1.0, %v1463_v56  ;;  %v1478_v14 = vmul.f32 %v5204_v47, %v6492_v60  ;;  %vm1483_vm10 = vweird.f32 %v5204_v47 }
 0x1db   : > { %5207 = vrcp.f32 %v6524_v26  ;;  %vm1484_vm12 = vmor %vm1482_vm8, %vm1483_vm10 }
 0x1dc   : > { %v1465_v3 = vmul.f32 %v5200_v32, %v1464_v55  ;;  %v1479_v29 = vsub.f32 1.0, %v1478_v14  ;;  %5209 = vpow2.f32 %v4124_v34  ;;  %v1533_v55 = vand.u32 2147483648, %v6504_v62  ;;  %4852 = vrot.lane.b32.xlu1 %v6452_v4, %s5429_s29 }
 0x1dd   : > { %v1309_v14 = vadd.f32 %v1308_v36, %v6355_v45  ;;  %4887 = vrot.lane.b32.xlu2 %v6456_v8, %s8587_s20 }
 0x1de   : > { %v5206_v6 = vpop.eup %5205  ;;  %v1466_v43 = vadd.f32 %v5200_v32, %v1465_v3  ;;  %v1480_v20 = vmul.f32 %v5204_v47, %v1479_v29  ;;  %v1534_v60 = vor.u32 1.1754944e-38, %v1533_v55 }
 0x1df   : > { %v1523_v56 = vmul.f32 %v5206_v6, %v6504_v62  ;;  %vm1528_vm14 = vweird.f32 %v5206_v6  ;;  %v1630_v62 = vmul.f32 %v6502_v38, %v1629_v63 }
 0x1e0   : > { %v1470_v40 = vsel %vm1469_vm9, %v5200_v32, %v1466_v43  ;;  %v1481_v42 = vadd.f32 %v5204_v47, %v1480_v20  ;;  %v1327_v43 = vpop.f32.mrf.mxu3  ;;  %vm6564_vm9 = vcmp.eq.f32.partialorder %v1531_v5, 8.507059e+37  ;;  %vm1529_vm8 = vmor %vm1527_vm13, %vm1528_vm14  ;;  %vm1542_vm13 = vweird.f32 %v6524_v26 }
 0x1e1   : > { %v1475_v0 = vsel %vm6535_vm15, %v1474_v49, %v1470_v40  ;;  %v1524_v34 = vsub.f32 1.0, %v1523_v56  ;;  %v5208_v53 = vpop.eup %5207  ;;  %vm1572_vm15 = vweird.f32 %v6427_v59  ;;  %v1546_v56 = vand.u32 2147483647, %v6524_v26 }
 0x1e2   : > { %v1674_v32 = vmul.f32 %v1475_v0, %v6430_v7  ;;  %v1485_v3 = vsel %vm1484_vm12, %v5204_v47, %v1481_v42  ;;  %v1538_v29 = vmul.f32 %v5208_v53, %v6524_v26  ;;  %v5210_v22 = vpop.eup %5209  ;;  %v6570_v7 = vadd.f32 %v1327_v43, %v1309_v14  ;;  %v1344_v0 = vpop.f32.mrf.mxu0 }
 0x1e3   : > { %v1525_v41 = vmul.f32 %v5206_v6, %v1524_v34  ;;  %v1490_v49 = vsel %vm6545_vm11, %v1489_v9, %v1485_v3  ;;  %v6577_v13 = vadd.f32 1.0, %v5210_v22  ;;  %vm1543_vm10 = vweird.f32 %v5208_v53 }
 0x1e4   : > { %v6575_v47 = vmul.f32 %v1490_v49, %v6432_v21  ;;  %v1539_v20 = vsub.f32 1.0, %v1538_v29  ;;  %v1548_v40 = vand.u32 2147483648, %v6524_v26  ;;  %v4128_v9 = vmul.f32 -1.442695, %v6570_v7  ;;  %vm1544_vm14 = vmor %vm1542_vm13, %vm1543_vm10  ;;  %v1363_v29 = vpop.f32.mrf.mxu2  ;;  %4857 = vrot.lane.b32.xlu1 %v6452_v4, %s8587_s20 }
 0x1e5   : > { %v1526_v36 = vadd.f32 %v5206_v6, %v1525_v41  ;;  %5211 = vrcp.f32 %v6577_v13  ;;  %vm1573_vm11 = vweird.f32 %v6462_v27  ;;  %vm1617_vm12 = vweird.f32 %v6436_v52  ;;  %4892 = vrot.lane.b32.xlu2 %v6456_v8, %s8588_s17 }
 0x1e6   : > { %v2197_v5 = vpack.c.bf16 %v6575_v47, %v1674_v32  ;;  %v1540_v21 = vmul.f32 %v5208_v53, %v1539_v20  ;;  %5213 = vpow2.f32 %v4128_v9  ;;  %v1549_v3 = vor.u32 1.1754944e-38, %v1548_v40  ;;  %vm6614_vm10 = vmor %vm1572_vm15, %vm1573_vm11 }
 0x1e7   : > { %v1530_v55 = vsel %vm1529_vm8, %v5206_v6, %v1526_v36  ;;  %v1571_v6 = vadd.f32 %v6462_v27, %v6516_v18  ;;  %v1616_v41 = vadd.f32 %v6473_v11, %v6528_v10  ;;  %vm1618_vm8 = vweird.f32 %v6473_v11 }
 0x1e8   : > { %v1535_v42 = vsel %vm6564_vm9, %v1534_v60, %v1530_v55  ;;  %2205 = vst [vmem:[#allocation2 + $0x108] sm:$0xff] %v2197_v5  ;;  %v1541_v14 = vadd.f32 %v5208_v53, %v1540_v21  ;;  %vm1547_vm9 = vcmp.eq.f32.partialorder %v1546_v56, 8.507059e+37  ;;  %v1623_v22 = vand.u32 2147483648, %v6436_v52  ;;  %vm6626_vm13 = vmor %vm1617_vm12, %vm1618_vm8 }
 0x1e9   : > { %v1678_v34 = vmul.f32 %v1535_v42, %v6454_v23  ;;  %v1631_v23 = vadd.f32 %v6502_v38, %v1630_v62  ;;  %v1638_v49 = vand.u32 2147483648, %v6458_v16  ;;  %vm1632_vm15 = vweird.f32 %v6458_v16 }
 0x1ea   : > { %v1545_v63 = vsel %vm1544_vm14, %v5208_v53, %v1541_v14  ;;  %v1621_v53 = vand.u32 2147483647, %v6436_v52  ;;  %v1636_v60 = vand.u32 2147483647, %v6458_v16  ;;  %vm6641_vm11 = vcmp.eq.f32.partialorder %v1576_v44, 8.507059e+37  ;;  %vm6647_vm12 = vmor %vm1632_vm15, %vm1633_vm6  ;;  %v1346_v42 = vpop.f32.mrf.mxu0 }
 0x1eb   : > { %v1550_v26 = vsel %vm1547_vm9, %v1549_v3, %v1545_v63  ;;  %v6606_v18 = vpack.i.bf16 %v1678_v34, %v1674_v32  ;;  %v6608_v43 = vpop.eup %5211  ;;  %v1345_v40 = vadd.f32 %v1344_v0, %v6342_v33  ;;  %v1620_v9 = vsel %vm6626_vm13, %v6473_v11, %v1616_v41 }
 0x1ec   : > { %v1679_v2 = vmul.f32 %v1550_v26, %v6460_v48  ;;  %v1583_v36 = vmul.f32 %v6608_v43, %v6577_v13  ;;  %v5214_v20 = vpop.eup %5213  ;;  %v1575_v48 = vsel %vm6614_vm10, %v6462_v27, %v1571_v6  ;;  %v1635_v27 = vsel %vm6647_vm12, %v6502_v38, %v1631_v23  ;;  %4862 = vrot.lane.b32.xlu1 %v6452_v4, %s8588_s17  ;;  %v1365_v59 = vpop.f32.mrf.mxu2 }
 0x1ed   : > { %4912 = vrot.lane.b32.xlu0 %v6606_v18, %s5426_s12  ;;  %v1430_v5 = vadd.f32 1.0, %v5214_v20  ;;  %v1579_v55 = vor.u32 1.1754944e-38, %v1578_v1  ;;  %vm1622_vm6 = vcmp.eq.f32.partialorder %v1621_v53, 8.507059e+37  ;;  %v1624_v21 = vor.u32 1.1754944e-38, %v1623_v22  ;;  %4897 = vrot.lane.b32.xlu2 %v6456_v8, %s8597_s21 }
 0x1ee   : > { %v2199_v56 = vpack.c.bf16 %v1679_v2, %v1678_v34  ;;  %v1584_v44 = vsub.f32 1.0, %v1583_v36  ;;  %v1639_v62 = vor.u32 1.1754944e-38, %v1638_v49  ;;  %vm1637_vm14 = vcmp.eq.f32.partialorder %v1636_v60, 8.507059e+37 }
 0x1ef   : > { %5215 = vrcp.f32 %v1430_v5  ;;  %v1580_v33 = vsel %vm6641_vm11, %v1579_v55, %v1575_v48  ;;  %v1625_v11 = vsel %vm1622_vm6, %v1624_v21, %v1620_v9  ;;  %v6662_v34 = vadd.f32 %v1363_v29, %v1345_v40 }
 0x1f0   : > { %2207 = vst [vmem:[#allocation2 + $0x118] sm:$0xff] %v2199_v56  ;;  %v1640_v0 = vsel %vm1637_vm14, %v1639_v62, %v1635_v27  ;;  %v1585_v38 = vmul.f32 %v6608_v43, %v1584_v44  ;;  %v1347_v14 = vadd.f32 %v1346_v42, %v6355_v45  ;;  %v6673_v1 = vmul.f32 %v1580_v33, %v6358_v25 }
 0x1f1   : > { %v6676_v6 = vmul.f32 %v1625_v11, %v6374_v46  ;;  %v6679_v3 = vmul.f32 %v1640_v0, %v6399_v30  ;;  %v4125_v45 = vmul.f32 -1.442695, %v6662_v34  ;;  %vm1587_vm8 = vweird.f32 %v6577_v13 }
 0x1f2   : > { %v1586_v63 = vadd.f32 %v6608_v43, %v1585_v38  ;;  %vm1588_vm9 = vweird.f32 %v6608_v43  ;;  %v6685_v29 = vadd.f32 %v1365_v59, %v1347_v14  ;;  %v1591_v25 = vand.u32 2147483647, %v6577_v13 }
 0x1f3   : > { %v1593_v23 = vand.u32 2147483648, %v6577_v13  ;;  %v6690_v26 = vpack.i.bf16 %v1679_v2, %v6575_v47  ;;  %v1651_v30 = vand.u32 2147483647, %v1430_v5  ;;  %vm6692_vm10 = vmor %vm1587_vm8, %vm1588_vm9  ;;  %v1653_v22 = vand.u32 2147483648, %v1430_v5 }
 0x1f4   : > { %v6698_v49 = vpack.i.bf16 %v6679_v3, %v6673_v1  ;;  %v1590_v32 = vsel %vm6692_vm10, %v6608_v43, %v1586_v63  ;;  %4867 = vrot.lane.b32.xlu1 %v6452_v4, %s8597_s21  ;;  %v6709_v13 = vpack.i.bf16 %v6676_v6, %v6513_v50  ;;  %5217 = vpow2.f32 %v4125_v45 }
 0x1f5   : > { %4917 = vrot.lane.b32.xlu0 %v6606_v18, %s8587_s20  ;;  %v5216_v41 = vpop.eup %5215  ;;  %4902 = vrot.lane.b32.xlu2 %v6606_v18, %s5433_s11  ;;  %v1594_v2 = vor.u32 1.1754944e-38, %v1593_v23  ;;  %vm1592_vm15 = vcmp.eq.f32.partialorder %v1591_v25, 8.507059e+37  ;;  %vm1647_vm11 = vweird.f32 %v1430_v5  ;;  %v4129_v36 = vmul.f32 -1.442695, %v6685_v29 }
 0x1f6   : > { %v1643_v46 = vmul.f32 %v5216_v41, %v1430_v5  ;;  %vm1648_vm13 = vweird.f32 %v5216_v41  ;;  %vm1652_vm6 = vcmp.eq.f32.partialorder %v1651_v30, 8.507059e+37  ;;  %v1654_v20 = vor.u32 1.1754944e-38, %v1653_v22 }
 0x1f7   : > { %v1595_v43 = vsel %vm1592_vm15, %v1594_v2, %v1590_v32  ;;  %vm1649_vm12 = vmor %vm1647_vm11, %vm1648_vm13  ;;  %v2200_v9 = vpack.c.bf16 %v6673_v1, %v6513_v50  ;;  %5219 = vpow2.f32 %v4129_v36  ;;  %v2202_v44 = vpack.c.bf16 %v6679_v3, %v6676_v6 }
 0x1f8   : > { %v1644_v53 = vsub.f32 1.0, %v1643_v46  ;;  %v6713_v16 = vmul.f32 %v1595_v43, %v6506_v57  ;;  %v4951_v46 = vpack.i.bf16 %v6673_v1, %v6676_v6 }
 0x1f9   : > { %2208 = vst [vmem:[#allocation2 + $0x120] sm:$0xff] %v2200_v9 }
 0x1fa   : > { %v1645_v47 = vmul.f32 %v5216_v41, %v1644_v53  ;;  %v5218_v40 = vpop.eup %5217  ;;  %2210 = vst [vmem:[#allocation2 + $0x130] sm:$0xff] %v2202_v44  ;;  %v6819_v44 = vld [vmem:[#allocation1 + $0x9] sm:$0xff] }
 0x1fc   : > { %v1646_v60 = vadd.f32 %v5216_v41, %v1645_v47  ;;  %4927 = vrot.lane.b32.xlu1 %v6709_v13, %s5426_s12 }
 0x1fd   : > { %4922 = vrot.lane.b32.xlu2 %v6709_v13, %s5433_s11  ;;  %v5220_v57 = vpop.eup %5219 }
 0x1fe   : > { %v1650_v48 = vsel %vm1649_vm12, %v5216_v41, %v1646_v60  ;;  %v1431_v50 = vadd.f32 1.0, %v5220_v57 }
 0x1ff   : > { %v1655_v52 = vsel %vm1652_vm6, %v1654_v20, %v1650_v48 }
 0x200   : > { %v6716_v56 = vmul.f32 %v1655_v52, %v6570_v7  ;;  %v1427_v7 = vadd.f32 1.0, %v5218_v40  ;;  %v1668_v63 = vand.u32 2147483648, %v1431_v50  ;;  %vm1662_vm13 = vweird.f32 %v1431_v50 }
 0x201   : > { %v1666_v23 = vand.u32 2147483647, %v1431_v50 }
 0x202   : > { %v6726_v27 = vpack.i.bf16 %v6716_v56, %v6713_v16  ;;  %5221 = vrcp.f32 %v1427_v7  ;;  %v1608_v14 = vand.u32 2147483648, %v1427_v7  ;;  %vm1602_vm8 = vweird.f32 %v1427_v7 }
 0x203   : > { %5223 = vrcp.f32 %v1431_v50  ;;  %v1606_v59 = vand.u32 2147483647, %v1427_v7  ;;  %v1669_v22 = vor.u32 1.1754944e-38, %v1668_v63  ;;  %vm1667_vm12 = vcmp.eq.f32.partialorder %v1666_v23, 8.507059e+37 }
 0x204   : > { %4987 = vrot.lane.b32.xlu0 %v6726_v27, %s5433_s11  ;;  %4932 = vrot.lane.b32.xlu1 %v6709_v13, %s5429_s29  ;;  %v1609_v25 = vor.u32 1.1754944e-38, %v1608_v14 }
 0x205   : > { %4962 = vrot.lane.b32.xlu2 %v6698_v49, %s5426_s12  ;;  %vm1607_vm15 = vcmp.eq.f32.partialorder %v1606_v59, 8.507059e+37 }
 0x208   : > { %v5222_v5 = vpop.eup %5221 }
 0x209   : > { %v5224_v55 = vpop.eup %5223  ;;  %v1598_v21 = vmul.f32 %v5222_v5, %v1427_v7  ;;  %vm1603_vm14 = vweird.f32 %v5222_v5  ;;  %v6817_v7 = vld [vmem:[#allocation1] sm:$0xff] }
 0x20a   : > { %v1658_v62 = vmul.f32 %v5224_v55, %v1431_v50  ;;  %vm1604_vm9 = vmor %vm1602_vm8, %vm1603_vm14  ;;  %vm1663_vm10 = vweird.f32 %v5224_v55  ;;  %v6821_v50 = vld [vmem:[#allocation1 + $0x12] sm:$0xff] }
 0x20b   : > { %v1599_v42 = vsub.f32 1.0, %v1598_v21  ;;  %vm1664_vm11 = vmor %vm1662_vm13, %vm1663_vm10 }
 0x20c   : > { %4992 = vrot.lane.b32.xlu0 %v6726_v27, %s5426_s12  ;;  %4937 = vrot.lane.b32.xlu1 %v6709_v13, %s8587_s20  ;;  %v1659_v33 = vsub.f32 1.0, %v1658_v62  ;;  %v4134_v62 = vld [vmem:[%s8377_s1 + $0x18] sm:$0xf] }
 0x20d   : > { %4967 = vrot.lane.b32.xlu2 %v6698_v49, %s5429_s29  ;;  %v1600_v11 = vmul.f32 %v5222_v5, %v1599_v42 }
 0x20e   : > { %v1660_v0 = vmul.f32 %v5224_v55, %v1659_v33 }
 0x20f   : > { %v1601_v38 = vadd.f32 %v5222_v5, %v1600_v11 }
 0x210   : > { %v1661_v45 = vadd.f32 %v5224_v55, %v1660_v0 }
 0x211   : > { %v1605_v41 = vsel %vm1604_vm9, %v5222_v5, %v1601_v38  ;;  %v6823_v5 = vld [vmem:[#allocation1 + $0x1b] sm:$0xff] }
 0x212   : > { %v1610_v10 = vsel %vm1607_vm15, %v1609_v25, %v1605_v41  ;;  %v1665_v53 = vsel %vm1664_vm11, %v5224_v55, %v1661_v45  ;;  %v4133_v55 = vld [vmem:[%s8377_s1 + $0x14] sm:$0xf] }
 0x213   : > { %v6764_v32 = vmul.f32 %v1610_v10, %v6662_v34  ;;  %v1670_v47 = vsel %vm1667_vm12, %v1669_v22, %v1665_v53  ;;  %2270 = vst [vmem:[#allocation1] ss:$9 sm:$0xff] %v4133_v55  ;;  %v4135_v53 = vld [vmem:[%s8377_s1 + $0x1c] sm:$0xf] }
 0x214   : > { %4997 = vrot.lane.b32.xlu0 %v6726_v27, %s8587_s20  ;;  %4942 = vrot.lane.b32.xlu1 %v6709_v13, %s8588_s17  ;;  %v6769_v1 = vmul.f32 %v1670_v47, %v6685_v29 }
 0x215   : > { %4972 = vrot.lane.b32.xlu2 %v6698_v49, %s8587_s20  ;;  %v5021_v6 = vpack.i.bf16 %v6764_v32, %v6679_v3 }
 0x216   : > { %v6780_v34 = vpack.i.bf16 %v6769_v1, %v6764_v32  ;;  %v5041_v9 = vpack.i.bf16 %v6441_v31, %v6769_v1 }
 0x21a   : > { %v6841_v42 = vld [vmem:[#allocation1] sm:$0xff]  ;;  %v6843_v33 = vld [vmem:[#allocation1 + $0x9] sm:$0xff]  ;;  %v6845_v11 = vld [vmem:[#allocation1 + $0x12] sm:$0xff] }
 0x21b   : > { %8605 = vst [vmem:[#allocation21_spill] sm:$0xff] %v6845_v11 }
 0x21c   : > { %5002 = vrot.lane.b32.xlu0 %v6726_v27, %s8597_s21  ;;  %4947 = vrot.lane.b32.xlu1 %v6709_v13, %s8597_s21 }
 0x21d   : > { %4977 = vrot.lane.b32.xlu2 %v6698_v49, %s8588_s17 }
 0x224   : > { %5012 = vrot.lane.b32.xlu0 %v6690_v26, %s5429_s29  ;;  %4952 = vrot.lane.b32.xlu1 %v4951_v46, %s5431_s19 }
 0x225   : > { %4982 = vrot.lane.b32.xlu2 %v6698_v49, %s8597_s21 }
 0x227   : > { %v6758_v30 = vpop.permute.xlu2 %4877 }
 0x22c   : > { %5017 = vrot.lane.b32.xlu0 %v6690_v26, %s8588_s17  ;;  %4957 = vrot.lane.b32.xlu1 %v6698_v49, %s5433_s11 }
 0x22d   : > { %5022 = vrot.lane.b32.xlu2 %v5021_v6, %s5431_s19 }
 0x22f   : > { %v6776_v2 = vpop.permute.xlu2 %4882 }
 0x230   : > { %8600 = vst [vmem:[#allocation17_spill] sm:$0xff] %v6776_v2  ;;  %v8413_v0 = vunpack.i.h.bf16 %v6776_v2  ;;  %v8412_v38 = vunpack.i.l.bf16 %v6776_v2 }
 0x234   : > { %5032 = vrot.lane.b32.xlu0 %v6780_v34, %s5429_s29  ;;  %5007 = vrot.lane.b32.xlu1 %v6690_v26, %s5433_s11 }
 0x235   : > { %5027 = vrot.lane.b32.xlu2 %v6780_v34, %s5433_s11 }
 0x237   : > { %v6788_v3 = vpop.permute.xlu2 %4887 }
 0x23c   : > { %5037 = vrot.lane.b32.xlu0 %v6780_v34, %s8588_s17  ;;  %5052 = vrot.lane.b32.xlu1 %v6456_v8, %s5431_s19 }
 0x23d   : > { %5057 = vrot.lane.b32.xlu2 %v6690_v26, %s5431_s19 }
 0x23e   : > { %v6792_v29 = vpop.permute.xlu1 %4842 }
 0x23f   : > { %v4873_v60 = vpop.permute.xlu0 %4872  ;;  %v8418_v36 = vunpack.i.h.bf16 %v6792_v29  ;;  %v8414_v43 = vunpack.i.l.bf16 %v6792_v29  ;;  %v6814_v57 = vpop.permute.xlu2 %4892 }
 0x240   : > { %v4875_v20 = vunpack.i.h.bf16 %v4873_v60  ;;  %v4874_v48 = vunpack.i.l.bf16 %v4873_v60  ;;  %8601 = vst [vmem:[#allocation18_spill] sm:$0xff] %v6814_v57 }
 0x242   : > { %v6800_v52 = vsel %vm340_vm7, %v8418_v36, %v4875_v20  ;;  %v6806_v40 = vsel %vm340_vm7, %v8414_v43, %v4874_v48 }
 0x244   : > { %5042 = vrot.lane.b32.xlu0 %v5041_v9, %s5431_s19  ;;  %5067 = vrot.lane.b32.xlu1 %v6698_v49, %s8602_s8  ;;  %v6847_v49 = vld [vmem:[#allocation1 + $0x1b] sm:$0xff] }
 0x245   : > { %5072 = vrot.lane.b32.xlu2 %v6726_v27, %s8602_s8  ;;  %8606 = vst [vmem:[#allocation22_spill] sm:$0xff] %v6847_v49 }
 0x246   : > { %v6830_v31 = vpop.permute.xlu1 %4847  ;;  %2397 = vst [vmem:[#allocation1] ss:$9 sm:$0xff] %v4134_v62  ;;  %v4880_v62 = vunpack.i.h.bf16 %v6758_v30 }
 0x247   : > { %8603 = vst [vmem:[#allocation19_spill] sm:$0xff] %v6830_v31  ;;  %v6834_v21 = vpop.permute.xlu2 %4897  ;;  %v8420_v9 = vunpack.i.h.bf16 %v6830_v31  ;;  %v8417_v55 = vunpack.i.l.bf16 %v6830_v31 }
 0x248   : > { %8604 = vst [vmem:[#allocation20_spill] sm:$0xff] %v6834_v21  ;;  %v6865_v25 = vpop.permute.xlu0 %4907 }
 0x24c   : > { %5047 = vrot.lane.b32.xlu0 %v6606_v18, %s8597_s21  ;;  %5082 = vrot.lane.b32.xlu1 %v6456_v8, %s8602_s8 }
 0x24d   : > { %5087 = vrot.lane.b32.xlu2 %v6606_v18, %s8602_s8  ;;  %v2398_v22 = vld [vmem:[#allocation1] sm:$0xff]  ;;  %v2399_v47 = vld [vmem:[#allocation1 + $0x9] sm:$0xff]  ;;  %v6898_v6 = vld [vmem:[#allocation1 + $0x12] sm:$0xff] }
 0x24e   : > { %v6855_v14 = vpop.permute.xlu1 %4852  ;;  %8607 = vst [vmem:[#allocation23_spill] sm:$0xff] %v6898_v6  ;;  %v6904_v60 = vld [vmem:[#allocation1 + $0x1b] sm:$0xff] }
 0x24f   : > { %v6857_v59 = vpop.permute.xlu2 %4902  ;;  %v8421_v45 = vunpack.i.h.bf16 %v6855_v14  ;;  %v8419_v41 = vunpack.i.l.bf16 %v6855_v14  ;;  %8608 = vst [vmem:[#allocation24_spill] sm:$0xff] %v6904_v60 }
 0x250   : > { %v8415_v8 = vunpack.i.h.bf16 %v6857_v59  ;;  %v8416_v63 = vunpack.i.l.bf16 %v6857_v59  ;;  %2524 = vst [vmem:[#allocation1] ss:$9 sm:$0xff] %v4135_v53 }
 0x251   : > { %v6873_v23 = vsel %vm570_vm3, %v8419_v41, %v8412_v38 }
 0x252   : > { %v6887_v46 = vsel %vm340_vm7, %v4874_v48, %v8416_v63  ;;  %v6893_v10 = vsel %vm340_vm7, %v4875_v20, %v8415_v8  ;;  %v2402_v8 = vpack.i.b16 %v2398_v22, %v2398_v22 }
 0x254   : > { %5062 = vrot.lane.b32.xlu0 %v6709_v13, %s8602_s8  ;;  %v6881_v13 = vsel %vm570_vm3, %v8421_v45, %v8413_v0  ;;  %5107 = vrot.lane.b32.xlu1 %v6780_v34, %s5426_s12  ;;  %v4879_v0 = vunpack.i.l.bf16 %v6758_v30  ;;  %v2405_v45 = vpack.i.b16 %v2399_v47, %v2399_v47  ;;  %v2404_v15 = vperm.slane %v2402_v8, 0 }
 0x255   : > { %5097 = vrot.lane.b32.xlu2 %v6606_v18, %s5429_s29  ;;  %v4889_v8 = vunpack.i.l.bf16 %v6788_v3 }
 0x256   : > { %v6906_v48 = vpop.permute.xlu1 %4857  ;;  %v2506_v63 = vsel %vm809_vm1, %v8417_v55, %v4879_v0 }
 0x257   : > { %8609 = vst [vmem:[#allocation25_spill] sm:$0xff] %v6906_v48  ;;  %v6908_v20 = vpop.permute.xlu2 %4922  ;;  %v2525_v55 = vld [vmem:[#allocation1] sm:$0xff]  ;;  %v2526_v36 = vld [vmem:[#allocation1 + $0x9] sm:$0xff] }
 0x258   : > { %v2529_v31 = vpack.i.b16 %v2525_v55, %v2525_v55  ;;  %v2532_v19 = vpack.i.b16 %v2526_v36, %v2526_v36  ;;  %v4890_v36 = vunpack.i.h.bf16 %v6788_v3  ;;  %v2407_v55 = vperm.slane %v2405_v45, 0 }
 0x25a   : > { %v2531_v11 = vperm.slane %v2529_v31, 0  ;;  %v8612_v31 = vunpack.i.h.bf16 %v6906_v48 }
 0x25c   : > { %5077 = vrot.lane.b32.xlu0 %v6452_v4, %s8602_s8  ;;  %v2507_v4 = vsel %vm809_vm1, %v8420_v9, %v4880_v62  ;;  %5112 = vrot.lane.b32.xlu1 %v6726_v27, %s8588_s17 }
 0x25d   : > { %5127 = vrot.lane.b32.xlu2 %v6780_v34, %s8587_s20 }
 0x25f   : > { %v6915_v38 = vpop.permute.xlu0 %4912  ;;  %v6944_v49 = vpop.permute.xlu2 %4962 }
 0x260   : > { %8610 = vst [vmem:[#allocation26_spill] sm:$0xff] %v6915_v38  ;;  %v8424_v43 = vunpack.i.h.bf16 %v6915_v38  ;;  %v8427_v53 = vunpack.i.l.bf16 %v6915_v38  ;;  %v6942_v38 = vpop.permute.xlu1 %4862 }
 0x262   : > { %v2503_v30 = vsel %vm809_vm1, %v4880_v62, %v8424_v43  ;;  %v2502_v22 = vsel %vm809_vm1, %v4879_v0, %v8427_v53  ;;  %v8428_v43 = vunpack.i.l.bf16 %v6906_v48 }
 0x263   : > { %v2516_v41 = vpack.c.bf16 %v2503_v30, %v2507_v4  ;;  %v2514_v9 = vpack.c.bf16 %v2502_v22, %v2506_v63  ;;  %v2534_v4 = vperm.slane %v2532_v19, 0  ;;  %v6952_v22 = vunpack.c.l.bf16 %v2531_v11 }
 0x264   : > { %5092 = vrot.lane.b32.xlu0 %v6726_v27, %s5429_s29  ;;  %v2379_v19 = vsel %vm732_vm0, %v8428_v43, %v4889_v8  ;;  %5122 = vrot.lane.b32.xlu1 %v6690_v26, %s8587_s20  ;;  %v6976_v43 = vunpack.c.l.bf16 %v2407_v55  ;;  %v8435_v55 = vunpack.i.l.bf16 %v6834_v21 }
 0x265   : > { %v2545_v0 = vunpack.c.l.bf16 %v2516_v41  ;;  %v2546_v53 = vunpack.c.h.bf16 %v2516_v41  ;;  %v2541_v63 = vunpack.c.l.bf16 %v2514_v9  ;;  %v2542_v47 = vunpack.c.h.bf16 %v2514_v9  ;;  %5132 = vrot.lane.b32.xlu2 %v6726_v27, %s5431_s19 }
 0x266   : > { %v6954_v62 = vunpack.c.l.bf16 %v2534_v4  ;;  %v6956_v41 = vunpack.c.l.bf16 %v2404_v15  ;;  %v2380_v9 = vsel %vm732_vm0, %v8612_v31, %v4890_v36  ;;  %v8436_v27 = vunpack.i.h.bf16 %v6834_v21 }
 0x267   : > { %v6950_v30 = vpop.permute.xlu0 %4917  ;;  %v2565_v11 = vmul.f32 %v6952_v22, %v2545_v0  ;;  %v2561_v15 = vmul.f32 %v6952_v22, %v2541_v63  ;;  %v2201_v0 = vpack.c.bf16 %v6764_v32, %v6713_v16  ;;  %v6992_v6 = vpop.permute.xlu2 %4967 }
 0x268   : > { %8611 = vst [vmem:[#allocation27_spill] sm:$0xff] %v6950_v30  ;;  %v8431_v3 = vunpack.i.h.bf16 %v6950_v30  ;;  %v8432_v45 = vunpack.i.l.bf16 %v6950_v30  ;;  %v2566_v4 = vmul.f32 %v6954_v62, %v2546_v53  ;;  %v2562_v28 = vmul.f32 %v6954_v62, %v2542_v47  ;;  %v6990_v60 = vpop.permute.xlu1 %4867 }
 0x269   : > { %8613 = vst [vmem:[#allocation28_spill] sm:$0xff] %v6990_v60 }
 0x26a   : > { %v2376_v31 = vsel %vm732_vm0, %v4890_v36, %v8431_v3  ;;  %v2375_v53 = vsel %vm732_vm0, %v4889_v8, %v8432_v45  ;;  %v2579_v63 = vpack.c.bf16 %v2566_v4, %v2565_v11  ;;  %v2577_v47 = vpack.c.bf16 %v2562_v28, %v2561_v15  ;;  %8614 = vst [vmem:[#allocation29_spill] sm:$0xff] %v6992_v6  ;;  %v7059_v45 = vld [vmem:[#allocation2 + $0x104] sm:$0xf] }
 0x26b   : > { %v2389_v48 = vpack.c.bf16 %v2376_v31, %v2380_v9  ;;  %v2387_v35 = vpack.c.bf16 %v2375_v53, %v2379_v19  ;;  %2209 = vst [vmem:[#allocation2 + $0x128] sm:$0xff] %v2201_v0  ;;  %v8434_v36 = vunpack.i.h.bf16 %v6990_v60  ;;  %v8433_v8 = vunpack.i.l.bf16 %v6990_v60 }
 0x26c   : > { %2587 = vst [vmem:[#allocation2 + $0x1d0] sm:$0xff] %v2579_v63  ;;  %5102 = vrot.lane.b32.xlu0 %v6690_v26, %s5426_s12  ;;  %v2203_v53 = vpack.c.bf16 %v6769_v1, %v6716_v56  ;;  %5142 = vrot.lane.b32.xlu1 %v6606_v18, %s5431_s19  ;;  %v7032_v56 = vld [vmem:[#allocation2 + $0x10c] sm:$0xf0]  ;;  %v2275_v3 = vpack.i.b16 %v6841_v42, %v6841_v42  ;;  %s3786_s19 = scalar_lea.sflag [#allocation5], %s5562_s16 }
 0x26d   : > { %v2418_v28 = vunpack.c.l.bf16 %v2389_v48  ;;  %v2419_v16 = vunpack.c.h.bf16 %v2389_v48  ;;  %2585 = vst [vmem:[#allocation2 + $0x1c0] sm:$0xff] %v2577_v47  ;;  %v2414_v32 = vunpack.c.l.bf16 %v2387_v35  ;;  %v2415_v19 = vunpack.c.h.bf16 %v2387_v35  ;;  %5147 = vrot.lane.b32.xlu2 %v6690_v26, %s8597_s21 }
 0x26e   : > { %v7004_v9 = vsel %vm655_vm2, %v8433_v8, %v8435_v55  ;;  %v7012_v11 = vsel %vm655_vm2, %v8434_v36, %v8436_v27  ;;  %2211 = vst [vmem:[#allocation2 + $0x138] sm:$0xff] %v2203_v53  ;;  %v8437_v53 = vunpack.i.l.bf16 %v6814_v57  ;;  %v2278_v8 = vpack.i.b16 %v6843_v33, %v6843_v33  ;;  %v7065_v36 = vld [vmem:[#allocation2 + $0x124] sm:$0xf] }
 0x26f   : > { %8615 = vst [vmem:[#allocation30_spill] sm:$0xff] %v7004_v9  ;;  %v2438_v48 = vmul.f32 %v6956_v41, %v2418_v28  ;;  %v2439_v35 = vmul.f32 %v6976_v43, %v2419_v16  ;;  %v2434_v4 = vmul.f32 %v6956_v41, %v2414_v32  ;;  %v2435_v15 = vmul.f32 %v6976_v43, %v2415_v19  ;;  %v7026_v47 = vpop.permute.xlu2 %4972  ;;  %v7030_v28 = vld [vmem:[#allocation2 + $0x12c] sm:$0xf0]  ;;  %v2800_v16 = vld [vmem:[%s8381_s5] sm:$0xff]  ;;  %v7039_v32 = vld [vmem:[#allocation2 + $0x120] sm:$0xf] }
 0x270   : > { %8616 = vst [vmem:[#allocation31_spill] sm:$0xff] %v7012_v11  ;;  %v7024_v63 = vpop.permute.xlu1 %4927  ;;  %v7041_v19 = vld [vmem:[#allocation2 + $0x100] sm:$0xf]  ;;  %v4965_v55 = vunpack.i.h.bf16 %v6944_v49  ;;  %v8657_v9 = vunpack.i.l.bf16 %v6855_v14 }
 0x271   : > { %v2452_v31 = vpack.c.bf16 %v2439_v35, %v2438_v48  ;;  %v2450_v0 = vpack.c.bf16 %v2435_v15, %v2434_v4  ;;  %8617 = vst [vmem:[#allocation32_spill] sm:$0xff] %v7024_v63  ;;  %v7043_v48 = vld [vmem:[#allocation2 + $0x110] sm:$0xf0]  ;;  %v8438_v35 = vunpack.i.l.bf16 %v6942_v38  ;;  %v2277_v4 = vperm.slane %v2275_v3, 0 }
 0x272   : > { %8618 = vst [vmem:[#allocation33_spill] sm:$0xff] %v7030_v28  ;;  %v7050_v15 = vld [vmem:[#allocation2 + $0x130] sm:$0xf0]  ;;  %v2280_v3 = vperm.slane %v2278_v8, 0  ;;  %v2132_v8 = vpack.i.b16 %v6817_v7, %v6817_v7 }
 0x273   : > { %2460 = vst [vmem:[#allocation2 + $0x190] sm:$0xff] %v2452_v31  ;;  %v8442_v31 = vunpack.i.h.bf16 %v6814_v57  ;;  %v7084_v33 = vsel %vm493_vm4, %v8438_v35, %v8437_v53 }
 0x274   : > { %2458 = vst [vmem:[#allocation2 + $0x180] sm:$0xff] %v2450_v0  ;;  %5117 = vrot.lane.b32.xlu0 %v6606_v18, %s8588_s17  ;;  %5157 = vrot.lane.b32.xlu1 %v6690_v26, %s8602_s8  ;;  %v4964_v26 = vunpack.i.l.bf16 %v6944_v49  ;;  %v8627_v18 = vunpack.i.h.bf16 %v6942_v38  ;;  %v8628_v49 = vunpack.i.l.bf16 %v7024_v63 }
 0x275   : > { %8619 = vst [vmem:[#allocation34_spill] sm:$0xff] %v7032_v56  ;;  %2806 = vperm.xlu2 %4838, %v2800_v16  }
 0x276   : > { %v7034_v1 = vpop.permute.xlu0 %4987  ;;  %8620 = vst [vmem:[#allocation35_spill] sm:$0xff] %v7039_v32  ;;  %v7097_v42 = vsel %vm493_vm4, %v8627_v18, %v8442_v31  ;;  %v2508_v16 = vsel %vm809_vm1, %v8628_v49, %v4964_v26  ;;  %v2802_v18 = vld [vmem:[%s8381_s5 + $0x10] sm:$0xff]  ;;  %v2803_v31 = vld [vmem:[%s8381_s5 + $0x18] sm:$0xff]  ;;  %v7140_v32 = vunpack.c.l.bf16 %v2280_v3 }
 0x277   : > { %8621 = vst [vmem:[#allocation36_spill] sm:$0xff] %v7041_v19  ;;  %v7074_v0 = vpop.permute.xlu2 %4977  ;;  %v2135_v19 = vpack.i.b16 %v6819_v44, %v6819_v44 }
 0x278   : > { %8622 = vst [vmem:[#allocation37_spill] sm:$0xff] %v7043_v48  ;;  %v7072_v27 = vpop.permute.xlu1 %4932  ;;  %v4975_v48 = vunpack.i.h.bf16 %v7026_v47 }
 0x279   : > { %8623 = vst [vmem:[#allocation38_spill] sm:$0xff] %v7050_v15 }
 0x27a   : > { %8624 = vst [vmem:[#allocation39_spill] sm:$0xff] %v7059_v45  ;;  %v4974_v45 = vunpack.i.l.bf16 %v7026_v47  ;;  %v8630_v47 = vunpack.i.h.bf16 %v7024_v63 }
 0x27b   : > { %8625 = vst [vmem:[#allocation40_spill] sm:$0xff] %v7065_v36 }
 0x27c   : > { %8626 = vst [vmem:[#allocation41_spill] sm:$0xff] %v7074_v0  ;;  %5137 = vrot.lane.b32.xlu0 %v6780_v34, %s8597_s21  ;;  %v2509_v57 = vsel %vm809_vm1, %v8630_v47, %v4965_v55  ;;  %2816 = vperm.xlu1 %4840, %v2802_v18   ;;  %v7135_v47 = vunpack.c.l.bf16 %v2277_v4  ;;  %v8635_v4 = vunpack.i.h.bf16 %v6992_v6 }
 0x27d   : > { %2821 = vperm.xlu2 %4838, %v2803_v31   ;;  %8632 = vst [vmem:[#allocation44_spill] sm:$0xff] %v7140_v32  ;;  %v8636_v31 = vunpack.i.h.bf16 %v7072_v27 }
 0x27e   : > { %v7107_v15 = vpop.permute.xlu0 %4992  ;;  %8631 = vst [vmem:[#allocation43_spill] sm:$0xff] %v7135_v47 }
 0x27f   : > { %8629 = vst [vmem:[#allocation42_spill] sm:$0xff] %v7107_v15  ;;  %v8451_v49 = vunpack.i.h.bf16 %v7107_v15  ;;  %v8452_v36 = vunpack.i.l.bf16 %v7107_v15  ;;  %v7250_v15 = vld [vmem:[#allocation2 + $0x180] sm:$0xf] }
 0x281   : > { %v2505_v53 = vsel %vm809_vm1, %v4965_v55, %v8451_v49  ;;  %v2504_v35 = vsel %vm809_vm1, %v4964_v26, %v8452_v36  ;;  %v8633_v55 = vunpack.i.l.bf16 %v6992_v6  ;;  %v8634_v49 = vunpack.i.l.bf16 %v7072_v27 }
 0x282   : > { %v2520_v56 = vpack.c.bf16 %v2505_v53, %v2509_v57  ;;  %v2518_v30 = vpack.c.bf16 %v2504_v35, %v2508_v16  ;;  %v7156_v57 = vsel %vm570_vm3, %v8636_v31, %v8635_v4  ;;  %v7159_v35 = vpop.permute.xlu1 %4937  ;;  %v7161_v53 = vpop.permute.xlu2 %4982  ;;  %v2134_v16 = vperm.slane %v2132_v8, 0 }
 0x283   : > { %v7148_v26 = vsel %vm570_vm3, %v8634_v49, %v8633_v55  ;;  %8637 = vst [vmem:[#allocation45_spill] sm:$0xff] %v7159_v35  ;;  %v8459_v55 = vunpack.i.h.bf16 %v7159_v35  ;;  %v8456_v7 = vunpack.i.l.bf16 %v7159_v35  ;;  %v2137_v31 = vperm.slane %v2135_v19, 0 }
 0x284   : > { %v2553_v18 = vunpack.c.l.bf16 %v2520_v56  ;;  %v2554_v3 = vunpack.c.h.bf16 %v2520_v56  ;;  %v2549_v36 = vunpack.c.l.bf16 %v2518_v30  ;;  %v2550_v49 = vunpack.c.h.bf16 %v2518_v30  ;;  %5152 = vrot.lane.b32.xlu0 %v6780_v34, %s8602_s8  ;;  %s8155_s8 = scalar_lea.vmem [#allocation6], %s5565_s10  ;;  %s8499_s10 = sshll.u32 %s5499_s28, 5 }
 0x285   : > { %v2381_v34 = vsel %vm732_vm0, %v8456_v7, %v4974_v45  ;;  %s3802_s15 = scalar_lea.hbm %s8382_s6, %s8499_s10  ;;  %s3803_s12 = sshll.u32 %s8155_s8, 4  ;;  %s8309_s12 = int_to_ptr.vmem [resolvable:$true] %s3803_s12 }
 0x286   : > { %v2573_v44 = vmul.f32 %v6952_v22, %v2553_v18  ;;  %v2574_v28 = vmul.f32 %v6954_v62, %v2554_v3  ;;  %v2569_v8 = vmul.f32 %v6952_v22, %v2549_v36  ;;  %v2570_v56 = vmul.f32 %v6954_v62, %v2550_v49  ;;  %v7172_v6 = vpop.permute.xlu0 %4997  ;;  %v7181_v18 = vld [vmem:[#allocation2 + $0x1c0] sm:$0xf]  ;;  %v7183_v3 = vld [vmem:[#allocation2 + $0x1cc] sm:$0xf0]  ;;  %s3805_s29 = sshll.u32 %s3802_s15, 4  ;;  %s3806_s29 = int_to_ptr.hbm [resolvable:$true] %s3805_s29 }
 0x287   : > { %8638 = vst [vmem:[#allocation46_spill] sm:$0xff] %v7172_v6  ;;  %v8457_v30 = vunpack.i.h.bf16 %v7172_v6  ;;  %v8458_v4 = vunpack.i.l.bf16 %v7172_v6  ;;  %v2382_v62 = vsel %vm732_vm0, %v8459_v55, %v4975_v48  ;;  %v7189_v49 = vunpack.c.l.bf16 %v2134_v16  ;;  %s5337_s20 = sshra.s32 %s3806_s29, 4  ;;  %s5338_s20 = int_to_ptr.hbm [resolvable:$true] %s5337_s20 }
 0x288   : > { %v2583_v22 = vpack.c.bf16 %v2574_v28, %v2573_v44  ;;  %v2581_v36 = vpack.c.bf16 %v2570_v56, %v2569_v8  ;;  %v2801_v28 = vld [vmem:[%s8381_s5 + $0x8] sm:$0xff]  ;;  %v7202_v44 = vunpack.c.l.bf16 %v2137_v31  ;;  %v1878_v16 = vpack.i.b16 %v6206_v12, %v6206_v12  ;;  %s5339_s17 = scalar_lea.hbm %s5338_s20, 64  ;;  %p5344_p3 = scmp.lt.s32.totalorder %s5338_s20, %s8382_s6 }
 0x289   : > { %v2378_v7 = vsel %vm732_vm0, %v4975_v48, %v8457_v30  ;;  %v2377_v19 = vsel %vm732_vm0, %v4974_v45, %v8458_v4  ;;  %v1881_v30 = vpack.i.b16 %v6208_v61, %v6208_v61  ;;  %v2005_v31 = vpack.i.b16 %v6262_v37, %v6262_v37  ;;  %p5340_p6 = scmp.ne.s32.totalorder %s5338_s20, %s5339_s17  ;;  %p5345_p4 = scmp.lt.s32.totalorder %s5343_s23, %s5339_s17 }
 0x28a   : > { %2591 = vst [vmem:[#allocation2 + $0x1f0] sm:$0xff] %v2583_v22  ;;  %v2393_v8 = vpack.c.bf16 %v2378_v7, %v2382_v62  ;;  %v2391_v56 = vpack.c.bf16 %v2377_v19, %v2381_v34  ;;  %v7210_v45 = vpop.permute.xlu1 %4942  ;;  %v7212_v4 = vpop.permute.xlu2 %5022  ;;  %v1880_v55 = vperm.slane %v1878_v16, 0  ;;  %v2008_v12 = vpack.i.b16 %v6264_v24, %v6264_v24 }
 0x28b   : > { %2589 = vst [vmem:[#allocation2 + $0x1e0] sm:$0xff] %v2581_v36  ;;  %v1751_v7 = vpack.i.b16 %v6165_v17, %v6165_v17  ;;  %v8465_v61 = vunpack.i.h.bf16 %v7210_v45  ;;  %v8464_v36 = vunpack.i.l.bf16 %v7210_v45  ;;  %v1754_v37 = vpack.i.b16 %v6167_v58, %v6167_v58  ;;  %p5341_p13 = pnand %p5340_p6, %p5528_p11  ;;  %p5346_p5 = por %p5345_p4, %p5344_p3 }
 0x28c   : > { %v2426_v34 = vunpack.c.l.bf16 %v2393_v8  ;;  %v2427_v19 = vunpack.c.h.bf16 %v2393_v8  ;;  %v2422_v22 = vunpack.c.l.bf16 %v2391_v56  ;;  %v2423_v62 = vunpack.c.h.bf16 %v2391_v56  ;;  %2811 = vperm.xlu0 %4839, %v2801_v28  }
 0x28d   : > { %v8640_v28 = vunpack.i.l.bf16 %v7074_v0  ;;  %v1753_v63 = vperm.slane %v1751_v7, 0  ;;  %p5342_p0 = pneg %p5341_p13 }
 0x28e   : > { %v2446_v48 = vmul.f32 %v6956_v41, %v2426_v34  ;;  %v2447_v24 = vmul.f32 %v6976_v43, %v2427_v19  ;;  %v2442_v17 = vmul.f32 %v6956_v41, %v2422_v22  ;;  %v2443_v8 = vmul.f32 %v6976_v43, %v2423_v62  ;;  %v7229_v60 = vpop.permute.xlu0 %5002 }
 0x28f   : > { %8639 = vst [vmem:[#allocation47_spill] sm:$0xff] %v7229_v60  ;;  %v7237_v56 = vsel %vm493_vm4, %v8464_v36, %v8640_v28  ;;  %v8468_v58 = vunpack.i.h.bf16 %v7229_v60  ;;  %v8473_v34 = vunpack.i.l.bf16 %v7229_v60  ;;  %v8641_v43 = vunpack.i.h.bf16 %v7074_v0  ;;  %v7252_v28 = vld [vmem:[#allocation2 + $0x18c] sm:$0xf0]  ;;  %p5347_p7 = pnand %p5346_p5, %p5342_p0 }
 0x290   : > { %v2456_v16 = vpack.c.bf16 %v2447_v24, %v2446_v48  ;;  %v2454_v41 = vpack.c.bf16 %v2443_v8, %v2442_v17  ;;  %v1883_v62 = vperm.slane %v1881_v30, 0  ;;  %v8642_v36 = vunpack.i.h.bf16 %v7161_v53 }
 0x291   : > { %v7248_v22 = vsel %vm493_vm4, %v8465_v61, %v8641_v43  ;;  %v8643_v24 = vunpack.i.l.bf16 %v7161_v53  ;;  %v8644_v30 = vunpack.i.h.bf16 %v6865_v25  ;;  %v8645_v8 = vunpack.i.h.bf16 %v7212_v4  ;;  %v4584_v61 = vld [vmem:[#allocation2 + $0x1ec] sm:$0xf0] }
 0x292   : > { %v2251_v48 = vsel %vm655_vm2, %v8642_v36, %v8468_v58  ;;  %v2007_v19 = vperm.slane %v2005_v31, 0  ;;  %2464 = vst [vmem:[#allocation2 + $0x1b0] sm:$0xff] %v2456_v16  ;;  %v4403_v0 = vld [vmem:[#allocation2 + $0x1e0] sm:$0xf]  ;;  %v7274_v36 = vunpack.c.l.bf16 %v1880_v55  ;;  %v7276_v58 = vunpack.c.l.bf16 %v1883_v62  ;;  %v5028_v6 = vpop.permute.xlu2 %5027 }
 0x293   : > { %v2250_v17 = vsel %vm655_vm2, %v8643_v24, %v8473_v34  ;;  %v7272_v43 = vsel %vm416_vm5, %v8645_v8, %v8644_v30  ;;  %v2010_v60 = vperm.slane %v2008_v12, 0  ;;  %2462 = vst [vmem:[#allocation2 + $0x1a0] sm:$0xff] %v2454_v41  ;;  %v7278_v24 = vpop.permute.xlu1 %4947  ;;  %v4404_v34 = vor.u32 %v4584_v61, %v4403_v0 }
 0x294   : > { %8646 = vst [vmem:[#allocation48_spill] sm:$0xff] %v7278_v24  ;;  %v7280_v35 = vunpack.c.l.bf16 %v2007_v19  ;;  %v1757_v31 = vpack.i.b16 %v6169_v54, %v6169_v54  ;;  %v8479_v55 = vunpack.i.h.bf16 %v7278_v24  ;;  %v8478_v16 = vunpack.i.l.bf16 %v7278_v24 }
 0x295   : > { %v5030_v62 = vunpack.i.h.bf16 %v5028_v6  ;;  %v5029_v12 = vunpack.i.l.bf16 %v5028_v6  ;;  %3240 = vmatpush.bf16.msra.mxu3 %v4404_v34  ;;  %v7288_v7 = vunpack.c.l.bf16 %v2010_v60  ;;  %v1756_v41 = vperm.slane %v1754_v37, 0 }
 0x296   : > { %v1759_v0 = vperm.slane %v1757_v31, 0  ;;  %v1760_v61 = vpack.i.b16 %v6179_v39, %v6179_v39  ;;  %v8647_v19 = vunpack.i.l.bf16 %v7161_v53  ;;  %v8648_v8 = vunpack.i.h.bf16 %v7161_v53  ;;  %v7304_v60 = vpop.permute.xlu0 %5012 }
 0x297   : > { %8649 = vst [vmem:[#allocation49_spill] sm:$0xff] %v7304_v60  ;;  %v8650_v37 = vunpack.i.l.bf16 %v7034_v1  ;;  %v7312_v34 = vunpack.c.l.bf16 %v1753_v63  ;;  %v8653_v63 = vunpack.i.h.bf16 %v6908_v20  ;;  %v8655_v24 = vunpack.i.h.bf16 %v6855_v14 }
 0x298   : > { %v2254_v54 = vsel %vm655_vm2, %v8478_v16, %v8647_v19  ;;  %v2255_v6 = vsel %vm655_vm2, %v8479_v55, %v8648_v8  ;;  %v8651_v16 = vunpack.i.h.bf16 %v7034_v1  ;;  %v8652_v55 = vunpack.i.l.bf16 %v6908_v20 }
 0x299   : > { %v7310_v39 = vsel %vm340_vm7, %v8650_v37, %v5029_v12  ;;  %v2264_v31 = vpack.c.bf16 %v2250_v17, %v2254_v54  ;;  %v2266_v30 = vpack.c.bf16 %v2251_v48, %v2255_v6  ;;  %v7332_v48 = vsel %vm340_vm7, %v5030_v62, %v8653_v63 }
 0x29a   : > { %v7320_v8 = vsel %vm340_vm7, %v8651_v16, %v5030_v62  ;;  %v7326_v37 = vsel %vm340_vm7, %v5029_v12, %v8652_v55  ;;  %v1762_v17 = vperm.slane %v1760_v61, 0  ;;  %v8654_v16 = vor.u32 %v7183_v3, %v7181_v18 }
 0x29b   : > { %v2295_v54 = vunpack.c.l.bf16 %v2264_v31  ;;  %v2296_v6 = vunpack.c.h.bf16 %v2264_v31  ;;  %v2299_v53 = vunpack.c.l.bf16 %v2266_v30  ;;  %v2300_v19 = vunpack.c.h.bf16 %v2266_v30  ;;  %v4371_v31 = vld [vmem:[#allocation2 + $0x1a0] sm:$0xf]  ;;  %v4576_v30 = vld [vmem:[#allocation2 + $0x1ac] sm:$0xf0]  ;;  %v7357_v14 = vpop.permute.xlu1 %4952 }
 0x29c   : > { %3241 = vmatpush.bf16.msra.mxu3 %v8654_v16  ;;  %v8656_v55 = vunpack.i.h.bf16 %v7304_v60  ;;  %v8658_v62 = vunpack.i.l.bf16 %v7304_v60  ;;  %v7349_v63 = vunpack.c.l.bf16 %v1756_v41  ;;  %v7351_v18 = vunpack.c.l.bf16 %v1759_v0  ;;  %v7362_v41 = vpop.permute.xlu2 %5057 }
 0x29d   : > { %v2315_v3 = vmul.f32 %v7135_v47, %v2295_v54  ;;  %v2316_v16 = vmul.f32 %v7140_v32, %v2296_v6  ;;  %v2319_v11 = vmul.f32 %v7135_v47, %v2299_v53  ;;  %v7364_v0 = vunpack.c.l.bf16 %v1762_v17 }
 0x29e   : > { %v2114_v12 = vsel %vm570_vm3, %v8656_v55, %v8655_v24  ;;  %v2113_v61 = vsel %vm570_vm3, %v8658_v62, %v8657_v9  ;;  %v2320_v24 = vmul.f32 %v7140_v32, %v2300_v19  ;;  %v4955_v62 = vunpack.i.h.bf16 %v7357_v14  ;;  %v7367_v60 = vpop.permute.xlu0 %5017 }
 0x29f   : > { %v2119_v55 = vpack.c.bf16 %v6881_v13, %v2114_v12  ;;  %v2117_v9 = vpack.c.bf16 %v6873_v23, %v2113_v61  ;;  %v2327_v21 = vpack.c.bf16 %v2316_v16, %v2315_v3  ;;  %v4954_v6 = vunpack.i.l.bf16 %v7357_v14 }
 0x2a0   : > { %v2329_v54 = vpack.c.bf16 %v2320_v24, %v2319_v11  ;;  %v4372_v2 = vor.u32 %v4576_v30, %v4371_v31  ;;  %v8659_v23 = vunpack.i.h.bf16 %v6865_v25  ;;  %v8495_v11 = vunpack.i.h.bf16 %v7367_v60 }
 0x2a1   : > { %v2148_v53 = vunpack.c.l.bf16 %v2119_v55  ;;  %v2149_v47 = vunpack.c.h.bf16 %v2119_v55  ;;  %v2144_v19 = vunpack.c.l.bf16 %v2117_v9  ;;  %v2145_v32 = vunpack.c.h.bf16 %v2117_v9  ;;  %2335 = vst [vmem:[#allocation2 + $0x160] sm:$0xff] %v2327_v21 }
 0x2a2   : > { %v1857_v13 = vsel %vm416_vm5, %v8659_v23, %v4955_v62  ;;  %3242 = vmatpush.bf16.msra.mxu3 %v4372_v2  ;;  %v8494_v17 = vunpack.i.l.bf16 %v7367_v60  ;;  %v5060_v12 = vunpack.i.h.bf16 %v7362_v41  ;;  %2337 = vst [vmem:[#allocation2 + $0x170] sm:$0xff] %v2329_v54  ;;  %v8660_v16 = vunpack.i.h.bf16 %v6942_v38 }
 0x2a3   : > { %v2168_v61 = vmul.f32 %v7189_v49, %v2148_v53  ;;  %v2169_v31 = vmul.f32 %v7202_v44, %v2149_v47  ;;  %v2164_v21 = vmul.f32 %v7189_v49, %v2144_v19  ;;  %v2165_v30 = vmul.f32 %v7202_v44, %v2145_v32 }
 0x2a4   : > { %v1867_v3 = vpack.c.bf16 %v1857_v13, %v7272_v43  ;;  %v1987_v2 = vsel %vm493_vm4, %v8495_v11, %v8660_v16  ;;  %v8661_v24 = vunpack.i.l.bf16 %v6942_v38  ;;  %v8497_v55 = vunpack.i.l.bf16 %v7362_v41 }
 0x2a5   : > { %v2182_v9 = vpack.c.bf16 %v2169_v31, %v2168_v61  ;;  %v2180_v32 = vpack.c.bf16 %v2165_v30, %v2164_v21  ;;  %v1992_v43 = vpack.c.bf16 %v7097_v42, %v1987_v2  ;;  %v8662_v53 = vunpack.i.l.bf16 %v7212_v4 }
 0x2a6   : > { %v1986_v47 = vsel %vm493_vm4, %v8494_v17, %v8661_v24  ;;  %v1898_v19 = vunpack.c.l.bf16 %v1867_v3  ;;  %v1899_v23 = vunpack.c.h.bf16 %v1867_v3  ;;  %v8663_v13 = vunpack.i.l.bf16 %v6865_v25 }
 0x2a7   : > { %v1990_v54 = vpack.c.bf16 %v7084_v33, %v1986_v47  ;;  %v7404_v38 = vsel %vm416_vm5, %v4954_v6, %v8662_v53  ;;  %v8664_v42 = vor.u32 %v7252_v28, %v7250_v15  ;;  %v4958_v33 = vpop.permute.xlu1 %4957  ;;  %2190 = vst [vmem:[#allocation2 + $0xd0] sm:$0xff] %v2182_v9  ;;  %v2021_v31 = vunpack.c.l.bf16 %v1992_v43  ;;  %v7423_v9 = vpop.permute.xlu0 %5032 }
 0x2a8   : > { %v7412_v61 = vsel %vm416_vm5, %v8497_v55, %v8663_v13  ;;  %v2022_v21 = vunpack.c.h.bf16 %v1992_v43  ;;  %2188 = vst [vmem:[#allocation2 + $0xc0] sm:$0xff] %v2180_v32  ;;  %v1918_v3 = vmul.f32 %v7274_v36, %v1898_v19  ;;  %v1919_v2 = vmul.f32 %v7276_v58, %v1899_v23 }
 0x2a9   : > { %3243 = vmatpush.bf16.msra.mxu3 %v8664_v42  ;;  %v2017_v30 = vunpack.c.l.bf16 %v1990_v54  ;;  %v2018_v16 = vunpack.c.h.bf16 %v1990_v54  ;;  %v4960_v24 = vunpack.i.h.bf16 %v4958_v33  ;;  %v4959_v47 = vunpack.i.l.bf16 %v4958_v33 }
 0x2aa   : > { %v2041_v53 = vmul.f32 %v7280_v35, %v2021_v31  ;;  %v2042_v13 = vmul.f32 %v7288_v7, %v2022_v21  ;;  %v1930_v43 = vpack.c.bf16 %v1919_v2, %v1918_v3  ;;  %v8665_v54 = vunpack.i.l.bf16 %v7034_v1  ;;  %v7437_v31 = vpop.permute.xlu2 %5072 }
 0x2ab   : > { %v2037_v15 = vmul.f32 %v7280_v35, %v2017_v30  ;;  %v2038_v28 = vmul.f32 %v7288_v7, %v2018_v16  ;;  %v8666_v19 = vunpack.i.h.bf16 %v7034_v1  ;;  %v8667_v42 = vunpack.i.l.bf16 %v6908_v20 }
 0x2ac   : > { %v1726_v32 = vsel %vm340_vm7, %v4959_v47, %v8665_v54  ;;  %v2055_v21 = vpack.c.bf16 %v2042_v13, %v2041_v53  ;;  %v8668_v16 = vunpack.i.h.bf16 %v6908_v20  ;;  %1938 = vst [vmem:[#allocation2 + $0x60] sm:$0xff] %v1930_v43  ;;  %v5034_v13 = vunpack.i.l.bf16 %v7423_v9 }
 0x2ad   : > { %v1727_v23 = vsel %vm340_vm7, %v4960_v24, %v8666_v19  ;;  %v1730_v33 = vsel %vm340_vm7, %v8667_v42, %v4959_v47  ;;  %v2053_v30 = vpack.c.bf16 %v2038_v28, %v2037_v15  ;;  %v1741_v1 = vpack.c.bf16 %v7310_v39, %v1726_v32 }
 0x2ae   : > { %v1731_v3 = vsel %vm340_vm7, %v8668_v16, %v4960_v24  ;;  %v1740_v2 = vpack.c.bf16 %v1730_v33, %v7326_v37  ;;  %v1743_v19 = vpack.c.bf16 %v7320_v8, %v1727_v23  ;;  %v5035_v47 = vunpack.i.h.bf16 %v7423_v9  ;;  %2063 = vst [vmem:[#allocation2 + $0x90] sm:$0xff] %v2055_v21  ;;  %v4339_v16 = vld [vmem:[#allocation2 + $0x160] sm:$0xf] }
 0x2af   : > { %v1742_v54 = vpack.c.bf16 %v1731_v3, %v7332_v48  ;;  %v8493_v20 = vunpack.i.h.bf16 %v7437_v31  ;;  %2061 = vst [vmem:[#allocation2 + $0x80] sm:$0xff] %v2053_v30  ;;  %v1773_v24 = vunpack.c.l.bf16 %v1741_v1  ;;  %v1774_v15 = vunpack.c.h.bf16 %v1741_v1  ;;  %v4568_v30 = vld [vmem:[#allocation2 + $0x16c] sm:$0xf0] }
 0x2b0   : > { %v1771_v42 = vunpack.c.l.bf16 %v1740_v2  ;;  %v1772_v53 = vunpack.c.h.bf16 %v1740_v2  ;;  %v1777_v43 = vunpack.c.l.bf16 %v1743_v19  ;;  %v1778_v39 = vunpack.c.h.bf16 %v1743_v19 }
 0x2b1   : > { %v1775_v37 = vunpack.c.l.bf16 %v1742_v54  ;;  %v1776_v28 = vunpack.c.h.bf16 %v1742_v54  ;;  %v1793_v32 = vmul.f32 %v7351_v18, %v1773_v24  ;;  %v1794_v23 = vmul.f32 %v7364_v0, %v1774_v15 }
 0x2b2   : > { %v1791_v48 = vmul.f32 %v7312_v34, %v1771_v42  ;;  %v1792_v8 = vmul.f32 %v7349_v63, %v1772_v53  ;;  %v1797_v3 = vmul.f32 %v7351_v18, %v1777_v43  ;;  %v1798_v2 = vmul.f32 %v7364_v0, %v1778_v39  ;;  %v5008_v42 = vpop.permute.xlu1 %5007  ;;  %v7471_v43 = vpop.permute.xlu0 %5037 }
 0x2b3   : > { %v1795_v33 = vmul.f32 %v7312_v34, %v1775_v37  ;;  %v1796_v21 = vmul.f32 %v7349_v63, %v1776_v28  ;;  %v8669_v54 = vunpack.i.h.bf16 %v7072_v27  ;;  %v1804_v53 = vpack.c.bf16 %v1794_v23, %v1793_v32 }
 0x2b4   : > { %v1803_v1 = vpack.c.bf16 %v1792_v8, %v1791_v48  ;;  %v8670_v37 = vunpack.i.l.bf16 %v7072_v27  ;;  %v1806_v39 = vpack.c.bf16 %v1798_v2, %v1797_v3  ;;  %v8492_v8 = vunpack.i.l.bf16 %v7437_v31 }
 0x2b5   : > { %v2116_v19 = vsel %vm570_vm3, %v5035_v47, %v8669_v54  ;;  %v1805_v24 = vpack.c.bf16 %v1796_v21, %v1795_v33  ;;  %v4340_v54 = vor.u32 %v4568_v30, %v4339_v16  ;;  %1812 = vst [vmem:[#allocation2 + $0x28] sm:$0xff] %v1804_v53  ;;  %v5009_v33 = vunpack.i.l.bf16 %v5008_v42 }
 0x2b6   : > { %v2123_v15 = vpack.c.bf16 %v7156_v57, %v2116_v19  ;;  %v2115_v28 = vsel %vm570_vm3, %v5034_v13, %v8670_v37  ;;  %1811 = vst [vmem:[#allocation2 + $0x20] sm:$0xff] %v1803_v1  ;;  %v5010_v57 = vunpack.i.h.bf16 %v5008_v42  ;;  %v5040_v19 = vunpack.i.h.bf16 %v7471_v43 }
 0x2b7   : > { %v2121_v48 = vpack.c.bf16 %v7148_v26, %v2115_v28  ;;  %1813 = vst [vmem:[#allocation2 + $0x30] sm:$0xff] %v1805_v24  ;;  %3244 = vmatpush.bf16.msra.mxu3 %v4340_v54  ;;  %v5039_v37 = vunpack.i.l.bf16 %v7471_v43  ;;  %v8671_v16 = vunpack.i.h.bf16 %v6792_v29  ;;  %v8672_v2 = vunpack.i.l.bf16 %v6857_v59 }
 0x2b8   : > { %v2156_v32 = vunpack.c.l.bf16 %v2123_v15  ;;  %v2157_v23 = vunpack.c.h.bf16 %v2123_v15  ;;  %1814 = vst [vmem:[#allocation2 + $0x38] sm:$0xff] %v1806_v39  ;;  %v8673_v24 = vunpack.i.h.bf16 %v6857_v59  ;;  %v8674_v28 = vunpack.i.l.bf16 %v6792_v29 }
 0x2b9   : > { %v2152_v27 = vunpack.c.l.bf16 %v2121_v48  ;;  %v2153_v21 = vunpack.c.h.bf16 %v2121_v48  ;;  %v1733_v30 = vsel %vm340_vm7, %v5010_v57, %v8671_v16  ;;  %v1720_v1 = vsel %vm340_vm7, %v8672_v2, %v5009_v33 }
 0x2ba   : > { %v2176_v3 = vmul.f32 %v7189_v49, %v2156_v32  ;;  %v2177_v26 = vmul.f32 %v7202_v44, %v2157_v23  ;;  %v1721_v15 = vsel %vm340_vm7, %v8673_v24, %v5010_v57  ;;  %v1732_v39 = vsel %vm340_vm7, %v5009_v33, %v8674_v28 }
 0x2bb   : > { %v2172_v42 = vmul.f32 %v7189_v49, %v2152_v27  ;;  %v2173_v53 = vmul.f32 %v7202_v44, %v2153_v21  ;;  %v1736_v54 = vpack.c.bf16 %v6806_v40, %v1732_v39  ;;  %v1737_v32 = vpack.c.bf16 %v1720_v1, %v6887_v46  ;;  %v7500_v49 = vpop.permute.xlu2 %5087 }
 0x2bc   : > { %v2186_v48 = vpack.c.bf16 %v2177_v26, %v2176_v3  ;;  %v1738_v23 = vpack.c.bf16 %v6800_v52, %v1733_v30  ;;  %v1739_v59 = vpack.c.bf16 %v1721_v15, %v6893_v10  ;;  %v8675_v27 = vunpack.i.h.bf16 %v7210_v45 }
 0x2bd   : > { %v2184_v44 = vpack.c.bf16 %v2173_v53, %v2172_v42  ;;  %v8676_v57 = vunpack.i.l.bf16 %v7210_v45  ;;  %v1763_v52 = vunpack.c.l.bf16 %v1736_v54  ;;  %v1764_v46 = vunpack.c.h.bf16 %v1736_v54 }
 0x2be   : > { %v1989_v29 = vsel %vm493_vm4, %v5040_v19, %v8675_v27  ;;  %2194 = vst [vmem:[#allocation2 + $0xf0] sm:$0xff] %v2186_v48  ;;  %v1765_v33 = vunpack.c.l.bf16 %v1737_v32  ;;  %v1766_v21 = vunpack.c.h.bf16 %v1737_v32  ;;  %v1767_v10 = vunpack.c.l.bf16 %v1738_v23  ;;  %v7525_v32 = vpop.permute.xlu1 %5052 }
 0x2bf   : > { %v1988_v40 = vsel %vm493_vm4, %v5039_v37, %v8676_v57  ;;  %2192 = vst [vmem:[#allocation2 + $0xe0] sm:$0xff] %v2184_v44  ;;  %v1768_v3 = vunpack.c.h.bf16 %v1738_v23  ;;  %v1769_v26 = vunpack.c.l.bf16 %v1739_v59  ;;  %v1770_v16 = vunpack.c.h.bf16 %v1739_v59  ;;  %v7527_v23 = vpop.permute.xlu0 %5042 }
 0x2c0   : > { %v1783_v30 = vmul.f32 %v7312_v34, %v1763_v52  ;;  %v1784_v2 = vmul.f32 %v7349_v63, %v1764_v46  ;;  %v1785_v45 = vmul.f32 %v7351_v18, %v1765_v33  ;;  %v1786_v1 = vmul.f32 %v7364_v0, %v1766_v21  ;;  %v7535_v52 = vld [vmem:[#allocation1 + $0x12] sm:$0xff]  ;;  %v7537_v46 = vld [vmem:[#allocation1 + $0x1b] sm:$0xff] }
 0x2c1   : > { %v1787_v42 = vmul.f32 %v7312_v34, %v1767_v10  ;;  %v1788_v53 = vmul.f32 %v7349_v63, %v1768_v3  ;;  %v1789_v24 = vmul.f32 %v7351_v18, %v1769_v26  ;;  %v1790_v15 = vmul.f32 %v7364_v0, %v1770_v16  ;;  %v4136_v33 = vld [vmem:[%s8377_s1 + $0x20] sm:$0xf] }
 0x2c2   : > { %v1799_v28 = vpack.c.bf16 %v1784_v2, %v1783_v30  ;;  %v1800_v39 = vpack.c.bf16 %v1786_v1, %v1785_v45  ;;  %v1996_v48 = vpack.c.bf16 %v7248_v22, %v1989_v29  ;;  %v1994_v54 = vpack.c.bf16 %v7237_v56, %v1988_v40  ;;  %2651 = vst [vmem:[#allocation1] ss:$9 sm:$0xff] %v4136_v33 }
 0x2c3   : > { %v1801_v44 = vpack.c.bf16 %v1788_v53, %v1787_v42  ;;  %v1802_v59 = vpack.c.bf16 %v1790_v15, %v1789_v24  ;;  %v5090_v34 = vunpack.i.h.bf16 %v7500_v49  ;;  %v5089_v63 = vunpack.i.l.bf16 %v7500_v49  ;;  %v5098_v16 = vpop.permute.xlu2 %5097 }
 0x2c4   : > { %1807 = vst [vmem:[#allocation2] sm:$0xff] %v1799_v28  ;;  %v2029_v18 = vunpack.c.l.bf16 %v1996_v48  ;;  %v2030_v27 = vunpack.c.h.bf16 %v1996_v48  ;;  %v2025_v0 = vunpack.c.l.bf16 %v1994_v54  ;;  %v2026_v57 = vunpack.c.h.bf16 %v1994_v54 }
 0x2c5   : > { %1808 = vst [vmem:[#allocation2 + $0x8] sm:$0xff] %v1800_v39  ;;  %v8498_v22 = vunpack.i.h.bf16 %v7525_v32  ;;  %v8496_v56 = vunpack.i.l.bf16 %v7525_v32  ;;  %v5045_v29 = vunpack.i.h.bf16 %v7527_v23  ;;  %v5044_v40 = vunpack.i.l.bf16 %v7527_v23 }
 0x2c6   : > { %1809 = vst [vmem:[#allocation2 + $0x10] sm:$0xff] %v1801_v44  ;;  %v2049_v21 = vmul.f32 %v7280_v35, %v2029_v18  ;;  %v2050_v10 = vmul.f32 %v7288_v7, %v2030_v27  ;;  %v2045_v3 = vmul.f32 %v7280_v35, %v2025_v0  ;;  %v2046_v26 = vmul.f32 %v7288_v7, %v2026_v57 }
 0x2c7   : > { %1810 = vst [vmem:[#allocation2 + $0x18] sm:$0xff] %v1802_v59  ;;  %v8677_v30 = vunpack.i.l.bf16 %v6865_v25  ;;  %v1856_v45 = vsel %vm416_vm5, %v5045_v29, %v8498_v22  ;;  %v1860_v35 = vsel %vm416_vm5, %v5060_v12, %v5045_v29  ;;  %v1862_v25 = vsel %vm416_vm5, %v5044_v40, %v4954_v6 }
 0x2c8   : > { %v2059_v7 = vpack.c.bf16 %v2050_v10, %v2049_v21  ;;  %v2057_v1 = vpack.c.bf16 %v2046_v26, %v2045_v3  ;;  %v1865_v53 = vpack.c.bf16 %v1856_v45, %v1860_v35  ;;  %v1869_v24 = vpack.c.bf16 %v7404_v38, %v1862_v25  ;;  %v4275_v3 = vld [vmem:[#allocation2 + $0xe0] sm:$0xf]  ;;  %v4552_v26 = vld [vmem:[#allocation2 + $0xec] sm:$0xf0] }
 0x2c9   : > { %v1855_v2 = vsel %vm416_vm5, %v8677_v30, %v8496_v56  ;;  %v2138_v15 = vpack.i.b16 %v6821_v50, %v6821_v50  ;;  %v2141_v28 = vpack.i.b16 %v6823_v5, %v6823_v5  ;;  %v5100_v39 = vunpack.i.h.bf16 %v5098_v16  ;;  %v7576_v5 = vpop.permute.xlu1 %5067  ;;  %v8678_v35 = vld [vmem:[#allocation49_spill] sm:$0xff] }
 0x2ca   : > { %v1863_v42 = vpack.c.bf16 %v1855_v2, %v7412_v61  ;;  %2067 = vst [vmem:[#allocation2 + $0xb0] sm:$0xff] %v2059_v7  ;;  %v1894_v44 = vunpack.c.l.bf16 %v1865_v53  ;;  %v1895_v6 = vunpack.c.h.bf16 %v1865_v53  ;;  %v1902_v59 = vunpack.c.l.bf16 %v1869_v24 }
 0x2cb   : > { %2065 = vst [vmem:[#allocation2 + $0xa0] sm:$0xff] %v2057_v1  ;;  %v1903_v18 = vunpack.c.h.bf16 %v1869_v24  ;;  %v2140_v61 = vperm.slane %v2138_v15, 0  ;;  %v2143_v27 = vperm.slane %v2141_v28, 0  ;;  %v5099_v45 = vunpack.i.l.bf16 %v5098_v16  ;;  %v4550_v1 = vld [vmem:[#allocation2 + $0xe4] sm:$0xf] }
 0x2cc   : > { %v1890_v48 = vunpack.c.l.bf16 %v1863_v42  ;;  %v1891_v54 = vunpack.c.h.bf16 %v1863_v42  ;;  %v1914_v50 = vmul.f32 %v7274_v36, %v1894_v44  ;;  %v1915_v57 = vmul.f32 %v7276_v58, %v1895_v6  ;;  %v4277_v42 = vld [vmem:[#allocation2 + $0xf0] sm:$0xf0] }
 0x2cd   : > { %v1922_v29 = vmul.f32 %v7274_v36, %v1902_v59  ;;  %v1923_v33 = vmul.f32 %v7276_v58, %v1903_v18  ;;  %v7580_v21 = vunpack.c.l.bf16 %v2140_v61  ;;  %v7582_v10 = vunpack.c.l.bf16 %v2143_v27  ;;  %v4165_v43 = vld [vmem:[#allocation2 + $0x10] sm:$0xf0] }
 0x2ce   : > { %v1910_v0 = vmul.f32 %v7274_v36, %v1890_v48  ;;  %v1911_v38 = vmul.f32 %v7276_v58, %v1891_v54  ;;  %v1928_v2 = vpack.c.bf16 %v1915_v57, %v1914_v50  ;;  %v8679_v25 = vunpack.i.h.bf16 %v8678_v35  ;;  %v8680_v36 = vld [vmem:[#allocation17_spill] sm:$0xff]  ;;  %v7594_v48 = vpop.permute.xlu0 %5047 }
 0x2cf   : > { %v1932_v53 = vpack.c.bf16 %v1923_v33, %v1922_v29  ;;  %v8681_v24 = vunpack.i.h.bf16 %v8680_v36  ;;  %v5070_v15 = vunpack.i.h.bf16 %v7576_v5  ;;  %v5069_v28 = vunpack.i.l.bf16 %v7576_v5 }
 0x2d0   : > { %v1926_v30 = vpack.c.bf16 %v1911_v38, %v1910_v0  ;;  %v2102_v7 = vsel %vm570_vm3, %v5100_v39, %v8679_v25  ;;  %v8682_v16 = vunpack.i.l.bf16 %v8678_v35  ;;  %v8683_v44 = vunpack.i.l.bf16 %v8680_v36  ;;  %1936 = vst [vmem:[#allocation2 + $0x50] sm:$0xff] %v1928_v2  ;;  %v8687_v2 = vld [vmem:[#allocation24_spill] sm:$0xff]  ;;  %v5128_v35 = vpop.permute.xlu2 %5127 }
 0x2d1   : > { %v2106_v58 = vsel %vm570_vm3, %v8681_v24, %v5100_v39  ;;  %v4276_v18 = vor.u32 %v4552_v26, %v4275_v3  ;;  %vm8684_vm7 = vcmp.lt.s32.totalorder %v5700_v51, 111  ;;  %v4280_v0 = vor.u32 %v4550_v1, %v4277_v42  ;;  %1940 = vst [vmem:[#allocation2 + $0x70] sm:$0xff] %v1932_v53  ;;  %v8686_v26 = vld [vmem:[#allocation23_spill] sm:$0xff]  ;;  %v8688_v1 = vld [vmem:[#allocation20_spill] sm:$0xff] }
 0x2d2   : > { %1934 = vst [vmem:[#allocation2 + $0x40] sm:$0xff] %v1926_v30  ;;  %v2101_v54 = vsel %vm570_vm3, %v5099_v45, %v8682_v16  ;;  %v2105_v6 = vsel %vm570_vm3, %v8683_v44, %v5099_v45  ;;  %v2120_v59 = vpack.c.bf16 %v2102_v7, %v2106_v58  ;;  %v7610_v61 = vsel %vm8684_vm7, %v5069_v28, %v8492_v8  ;;  %vm8685_vm6 = vmmov %vm8684_vm7  ;;  %v4548_v8 = vld [vmem:[#allocation2 + $0xcc] sm:$0xf0]  ;;  %v4542_v56 = vld [vmem:[#allocation2 + $0xa4] sm:$0xf] }
 0x2d3   : > { %v2118_v39 = vpack.c.bf16 %v2101_v54, %v2105_v6  ;;  %v7618_v27 = vsel %vm8685_vm6, %v5070_v15, %v8493_v20  ;;  %3221 = vmatpush.bf16.msra.mxu1 %v4276_v18  ;;  %v5050_v57 = vunpack.i.h.bf16 %v7594_v48  ;;  %v5049_v29 = vunpack.i.l.bf16 %v7594_v48  ;;  %3278 = vmatpush.bf16.msra.mxu2 %v4280_v0  ;;  %v8691_v54 = vld [vmem:[#allocation31_spill] sm:$0xff]  ;;  %v8692_v6 = vld [vmem:[#allocation30_spill] sm:$0xff]  ;;  %v4546_v20 = vld [vmem:[#allocation2 + $0xc4] sm:$0xf] }
 0x2d4   : > { %v2150_v38 = vunpack.c.l.bf16 %v2120_v59  ;;  %v2151_v50 = vunpack.c.h.bf16 %v2120_v59  ;;  %v2408_v30 = vpack.i.b16 %v8686_v26, %v8686_v26  ;;  %v2411_v45 = vpack.i.b16 %v8687_v2, %v8687_v2  ;;  %vm8701_vm14 = vmmov %vm8685_vm6 }
 0x2d5   : > { %v2146_v33 = vunpack.c.l.bf16 %v2118_v39  ;;  %v2147_v3 = vunpack.c.h.bf16 %v2118_v39  ;;  %v8689_v42 = vunpack.i.h.bf16 %v8688_v1  ;;  %v8690_v36 = vunpack.i.l.bf16 %v8688_v1  ;;  %vm8702_vm8 = vmmov %vm8685_vm6 }
 0x2d6   : > { %v2170_v25 = vmul.f32 %v7580_v21, %v2150_v38  ;;  %v2171_v7 = vmul.f32 %v7582_v10, %v2151_v50  ;;  %v2410_v39 = vperm.slane %v2408_v30, 0  ;;  %v2413_v0 = vperm.slane %v2411_v45, 0  ;;  %v4259_v50 = vld [vmem:[#allocation2 + $0xc0] sm:$0xf]  ;;  %v8695_v45 = vld [vmem:[#allocation43_spill] sm:$0xff]  ;;  %vm8704_vm9 = vmmov %vm8685_vm6 }
 0x2d7   : > { %v2249_v53 = vsel %vm655_vm2, %v8689_v42, %v5050_v57  ;;  %v2248_v24 = vsel %vm655_vm2, %v8690_v36, %v5049_v29  ;;  %v2166_v58 = vmul.f32 %v7580_v21, %v2146_v33  ;;  %v2167_v16 = vmul.f32 %v7582_v10, %v2147_v3  ;;  %v4261_v36 = vld [vmem:[#allocation2 + $0xd0] sm:$0xf0]  ;;  %vm8705_vm10 = vmmov %vm8685_vm6 }
 0x2d8   : > { %v2262_v44 = vpack.c.bf16 %v2249_v53, %v8691_v54  ;;  %v2260_v59 = vpack.c.bf16 %v2248_v24, %v8692_v6  ;;  %v2183_v18 = vpack.c.bf16 %v2171_v7, %v2170_v25  ;;  %v5130_v38 = vunpack.i.h.bf16 %v5128_v35  ;;  %v8693_v53 = vld [vmem:[#allocation45_spill] sm:$0xff]  ;;  %v8696_v7 = vld [vmem:[#allocation44_spill] sm:$0xff]  ;;  %v4544_v6 = vld [vmem:[#allocation2 + $0xac] sm:$0xf0] }
 0x2d9   : > { %v2181_v26 = vpack.c.bf16 %v2167_v16, %v2166_v58  ;;  %v7644_v17 = vunpack.c.l.bf16 %v2410_v39  ;;  %v7646_v3 = vunpack.c.l.bf16 %v2413_v0  ;;  %v8694_v24 = vunpack.i.h.bf16 %v8693_v53  ;;  %vm8715_vm13 = vmmov %vm8685_vm6 }
 0x2da   : > { %v2291_v2 = vunpack.c.l.bf16 %v2262_v44  ;;  %v2292_v42 = vunpack.c.h.bf16 %v2262_v44  ;;  %v2287_v1 = vunpack.c.l.bf16 %v2260_v59  ;;  %2191 = vst [vmem:[#allocation2 + $0xd8] sm:$0xff] %v2183_v18  ;;  %v2288_v33 = vunpack.c.h.bf16 %v2260_v59  ;;  %v7655_v44 = vpop.permute.xlu1 %5082  ;;  %v8697_v18 = vld [vmem:[#allocation46_spill] sm:$0xff]  ;;  %vm8716_vm15 = vmmov %vm8685_vm6 }
 0x2db   : > { %v2386_v30 = vsel %vm732_vm0, %v5130_v38, %v8694_v24  ;;  %2189 = vst [vmem:[#allocation2 + $0xc8] sm:$0xff] %v2181_v26  ;;  %v5129_v54 = vunpack.i.l.bf16 %v5128_v35  ;;  %v8698_v39 = vunpack.i.h.bf16 %v8697_v18  ;;  %v4260_v11 = vor.u32 %v4548_v8, %v4259_v50  ;;  %v4243_v26 = vld [vmem:[#allocation2 + $0xa0] sm:$0xf] }
 0x2dc   : > { %v2311_v25 = vmul.f32 %v8695_v45, %v2291_v2  ;;  %v2312_v58 = vmul.f32 %v8696_v7, %v2292_v42  ;;  %v2307_v16 = vmul.f32 %v8695_v45, %v2287_v1  ;;  %v2308_v59 = vmul.f32 %v8696_v7, %v2288_v33  ;;  %v4245_v2 = vld [vmem:[#allocation2 + $0xb0] sm:$0xf0]  ;;  %v2653_v50 = vld [vmem:[#allocation1 + $0x9] sm:$0xff] }
 0x2dd   : > { %v2374_v0 = vsel %vm732_vm0, %v8698_v39, %v5130_v38  ;;  %v4264_v24 = vor.u32 %v4546_v20, %v4261_v36  ;;  %v8699_v42 = vunpack.i.l.bf16 %v8697_v18  ;;  %v8700_v1 = vunpack.i.l.bf16 %v8693_v53  ;;  %3222 = vmatpush.bf16.msra.mxu1 %v4260_v11  ;;  %v2652_v38 = vld [vmem:[#allocation1] sm:$0xff]  ;;  %v7672_v53 = vpop.permute.xlu0 %5062 }
 0x2de   : > { %v2325_v55 = vpack.c.bf16 %v2312_v58, %v2311_v25  ;;  %v2394_v45 = vpack.c.bf16 %v2386_v30, %v2374_v0  ;;  %v2323_v7 = vpack.c.bf16 %v2308_v59, %v2307_v16  ;;  %v5085_v20 = vunpack.i.h.bf16 %v7655_v44 }
 0x2df   : > { %v2373_v35 = vsel %vm732_vm0, %v8699_v42, %v5129_v54  ;;  %v2385_v33 = vsel %vm732_vm0, %v5129_v54, %v8700_v1  ;;  %3279 = vmatpush.bf16.msra.mxu2 %v4264_v24  ;;  %v5084_v8 = vunpack.i.l.bf16 %v7655_v44  ;;  %v4244_v58 = vor.u32 %v4544_v6, %v4243_v26 }
 0x2e0   : > { %v2392_v22 = vpack.c.bf16 %v2385_v33, %v2373_v35  ;;  %2333 = vst [vmem:[#allocation2 + $0x150] sm:$0xff] %v2325_v55  ;;  %v2428_v36 = vunpack.c.l.bf16 %v2394_v45  ;;  %v2429_v25 = vunpack.c.h.bf16 %v2394_v45  ;;  %v4248_v18 = vor.u32 %v4542_v56, %v4245_v2  ;;  %v8703_v35 = vld [vmem:[#allocation13_spill] sm:$0xff]  ;;  %v5133_v33 = vpop.permute.xlu2 %5132 }
 0x2e1   : > { %2331 = vst [vmem:[#allocation2 + $0x140] sm:$0xff] %v2323_v7  ;;  %v7680_v11 = vsel %vm8701_vm14, %v5084_v8, %v5089_v63  ;;  %v7688_v55 = vsel %vm8702_vm8, %v5085_v20, %v5090_v34  ;;  %v2656_v16 = vpack.i.b16 %v2652_v38, %v2652_v38  ;;  %v2659_v6 = vpack.i.b16 %v2653_v50, %v2653_v50  ;;  %v8706_v50 = vld [vmem:[#allocation14_spill] sm:$0xff] }
 0x2e2   : > { %v2424_v54 = vunpack.c.l.bf16 %v2392_v22  ;;  %v2425_v30 = vunpack.c.h.bf16 %v2392_v22  ;;  %v2448_v56 = vmul.f32 %v7644_v17, %v2428_v36  ;;  %v2449_v22 = vmul.f32 %v7646_v3, %v2429_v25  ;;  %3223 = vmatpush.bf16.msra.mxu1 %v4244_v58 }
 0x2e3   : > { %3280 = vmatpush.bf16.msra.mxu2 %v4248_v18  ;;  %v5065_v0 = vunpack.i.h.bf16 %v7672_v53  ;;  %v5064_v24 = vunpack.i.l.bf16 %v7672_v53  ;;  %v2658_v2 = vperm.slane %v2656_v16, 0  ;;  %v2661_v42 = vperm.slane %v2659_v6, 0 }
 0x2e4   : > { %v2444_v59 = vmul.f32 %v7644_v17, %v2424_v54  ;;  %v2445_v39 = vmul.f32 %v7646_v3, %v2425_v30  ;;  %v2457_v26 = vpack.c.bf16 %v2449_v22, %v2448_v56  ;;  %v1884_v1 = vpack.i.b16 %v8703_v35, %v8703_v35  ;;  %v4227_v22 = vld [vmem:[#allocation2 + $0x80] sm:$0xf] }
 0x2e5   : > { %v2636_v7 = vsel %vm8704_vm9, %v5065_v0, %v5070_v15  ;;  %v2635_v38 = vsel %vm8705_vm10, %v5064_v24, %v5069_v28  ;;  %v1887_v36 = vpack.i.b16 %v8706_v50, %v8706_v50  ;;  %v7712_v25 = vunpack.c.l.bf16 %v2658_v2  ;;  %v4229_v2 = vld [vmem:[#allocation2 + $0x90] sm:$0xf0]  ;;  %v5108_v50 = vpop.permute.xlu1 %5107 }
 0x2e6   : > { %v2455_v45 = vpack.c.bf16 %v2445_v39, %v2444_v59  ;;  %2465 = vst [vmem:[#allocation2 + $0x1b8] sm:$0xff] %v2457_v26  ;;  %v7714_v58 = vunpack.c.l.bf16 %v2661_v42  ;;  %v2647_v18 = vpack.c.bf16 %v7618_v27, %v2636_v7  ;;  %v2645_v54 = vpack.c.bf16 %v7610_v61, %v2635_v38  ;;  %v4540_v39 = vld [vmem:[#allocation2 + $0x8c] sm:$0xf0]  ;;  %v4538_v26 = vld [vmem:[#allocation2 + $0x84] sm:$0xf] }
 0x2e7   : > { %v1886_v15 = vperm.slane %v1884_v1, 0  ;;  %v1889_v5 = vperm.slane %v1887_v36, 0  ;;  %v5135_v30 = vunpack.i.h.bf16 %v5133_v33  ;;  %v5134_v56 = vunpack.i.l.bf16 %v5133_v33 }
 0x2e8   : > { %2463 = vst [vmem:[#allocation2 + $0x1a8] sm:$0xff] %v2455_v45  ;;  %v2680_v16 = vunpack.c.l.bf16 %v2647_v18  ;;  %v2681_v28 = vunpack.c.h.bf16 %v2647_v18  ;;  %v2676_v6 = vunpack.c.l.bf16 %v2645_v54  ;;  %v2677_v59 = vunpack.c.h.bf16 %v2645_v54 }
 0x2e9   : > { %v7718_v35 = vunpack.c.l.bf16 %v1886_v15  ;;  %v7720_v42 = vunpack.c.l.bf16 %v1889_v5  ;;  %v8707_v27 = vunpack.i.h.bf16 %v7212_v4  ;;  %v1850_v1 = vsel %vm416_vm5, %v5135_v30, %v5044_v40 }
 0x2ea   : > { %v2700_v33 = vmul.f32 %v7712_v25, %v2680_v16  ;;  %v2701_v45 = vmul.f32 %v7714_v58, %v2681_v28  ;;  %v2696_v7 = vmul.f32 %v7712_v25, %v2676_v6  ;;  %v2697_v38 = vmul.f32 %v7714_v58, %v2677_v59 }
 0x2eb   : > { %v1849_v61 = vsel %vm416_vm5, %v5134_v56, %v8707_v27  ;;  %v1853_v36 = vsel %vm416_vm5, %v4955_v62, %v5134_v56  ;;  %v8708_v18 = vunpack.i.l.bf16 %v7212_v4  ;;  %v4228_v40 = vor.u32 %v4540_v39, %v4227_v22 }
 0x2ec   : > { %v4232_v54 = vor.u32 %v4538_v26, %v4229_v2  ;;  %v2710_v15 = vpack.c.bf16 %v2701_v45, %v2700_v33  ;;  %v2708_v5 = vpack.c.bf16 %v2697_v38, %v2696_v7  ;;  %v1868_v16 = vpack.c.bf16 %v1849_v61, %v1853_v36  ;;  %v8709_v2 = vld [vmem:[#allocation32_spill] sm:$0xff]  ;;  %v4213_v36 = vld [vmem:[#allocation2 + $0x70] sm:$0xf0] }
 0x2ed   : > { %v1854_v23 = vsel %vm416_vm5, %v8708_v18, %v5135_v30  ;;  %3224 = vmatpush.bf16.msra.mxu1 %v4228_v40  ;;  %v2535_v6 = vpack.i.b16 %v7535_v52, %v7535_v52  ;;  %v2538_v14 = vpack.i.b16 %v7537_v46, %v7537_v46  ;;  %v5110_v62 = vunpack.i.h.bf16 %v5108_v50  ;;  %v7758_v18 = vpop.permute.xlu0 %5077 }
 0x2ee   : > { %v1870_v28 = vpack.c.bf16 %v1850_v1, %v1854_v23  ;;  %3281 = vmatpush.bf16.msra.mxu2 %v4232_v54  ;;  %v5109_v56 = vunpack.i.l.bf16 %v5108_v50  ;;  %2718 = vst [vmem:[#allocation2 + $0x230] sm:$0xff] %v2710_v15  ;;  %v1900_v4 = vunpack.c.l.bf16 %v1868_v16  ;;  %v1901_v59 = vunpack.c.h.bf16 %v1868_v16  ;;  %v8711_v1 = vld [vmem:[#allocation42_spill] sm:$0xff]  ;;  %v4536_v50 = vld [vmem:[#allocation2 + $0x6c] sm:$0xf0] }
 0x2ef   : > { %2716 = vst [vmem:[#allocation2 + $0x220] sm:$0xff] %v2708_v5  ;;  %v2537_v39 = vperm.slane %v2535_v6, 0  ;;  %v2540_v26 = vperm.slane %v2538_v14, 0  ;;  %v8710_v27 = vunpack.i.h.bf16 %v8709_v2  ;;  %v8712_v52 = vunpack.i.l.bf16 %v8711_v1 }
 0x2f0   : > { %v1904_v30 = vunpack.c.l.bf16 %v1870_v28  ;;  %v1905_v22 = vunpack.c.h.bf16 %v1870_v28  ;;  %v1920_v33 = vmul.f32 %v7718_v35, %v1900_v4  ;;  %v1921_v45 = vmul.f32 %v7720_v42, %v1901_v59  ;;  %v4211_v59 = vld [vmem:[#allocation2 + $0x60] sm:$0xf] }
 0x2f1   : > { %v2513_v61 = vsel %vm809_vm1, %v5110_v62, %v8710_v27  ;;  %v2500_v46 = vsel %vm809_vm1, %v8712_v52, %v5109_v56  ;;  %v7760_v23 = vunpack.c.l.bf16 %v2537_v39  ;;  %v7762_v40 = vunpack.c.l.bf16 %v2540_v26 }
 0x2f2   : > { %v1924_v7 = vmul.f32 %v7718_v35, %v1904_v30  ;;  %v1925_v38 = vmul.f32 %v7720_v42, %v1905_v22  ;;  %v8713_v54 = vunpack.i.h.bf16 %v8711_v1  ;;  %v8714_v5 = vunpack.i.l.bf16 %v8709_v2  ;;  %v4534_v30 = vld [vmem:[#allocation2 + $0x64] sm:$0xf] }
 0x2f3   : > { %v1931_v28 = vpack.c.bf16 %v1921_v45, %v1920_v33  ;;  %v4212_v22 = vor.u32 %v4536_v50, %v4211_v59  ;;  %v4216_v39 = vor.u32 %v4534_v30, %v4213_v36  ;;  %v5080_v26 = vunpack.i.h.bf16 %v7758_v18  ;;  %v5148_v45 = vpop.permute.xlu2 %5147 }
 0x2f4   : > { %v2501_v15 = vsel %vm809_vm1, %v8713_v54, %v5110_v62  ;;  %v2512_v16 = vsel %vm809_vm1, %v5109_v56, %v8714_v5  ;;  %v1933_v6 = vpack.c.bf16 %v1925_v38, %v1924_v7  ;;  %v5079_v27 = vunpack.i.l.bf16 %v7758_v18  ;;  %v4597_v18 = vld [vmem:[%s8380_s4 + $0x1c] sm:$0xf] }
 0x2f5   : > { %v2519_v14 = vpack.c.bf16 %v2512_v16, %v2500_v46  ;;  %v2521_v4 = vpack.c.bf16 %v2513_v61, %v2501_v15  ;;  %1939 = vst [vmem:[#allocation2 + $0x68] sm:$0xff] %v1931_v28  ;;  %3225 = vmatpush.bf16.msra.mxu1 %v4212_v22  ;;  %3282 = vmatpush.bf16.msra.mxu2 %v4216_v39  ;;  %v8717_v46 = vld [vmem:[#allocation21_spill] sm:$0xff]  ;;  %v8718_v15 = vld [vmem:[#allocation22_spill] sm:$0xff]  ;;  %v5150_v28 = vunpack.i.h.bf16 %v5148_v45  ;;  %v4532_v22 = vld [vmem:[#allocation2 + $0x4c] sm:$0xf0] }
 0x2f6   : > { %1941 = vst [vmem:[#allocation2 + $0x78] sm:$0xff] %v1933_v6  ;;  %v2634_v56 = vsel %vm8715_vm13, %v5080_v26, %v5085_v20  ;;  %v2633_v61 = vsel %vm8716_vm15, %v5079_v27, %v5084_v8  ;;  %v2281_v33 = vpack.i.b16 %v8717_v46, %v8717_v46  ;;  %v2284_v8 = vpack.i.b16 %v8718_v15, %v8718_v15 }
 0x2f7   : > { %v2551_v1 = vunpack.c.l.bf16 %v2519_v14  ;;  %v2552_v62 = vunpack.c.h.bf16 %v2519_v14  ;;  %v2555_v52 = vunpack.c.l.bf16 %v2521_v4  ;;  %v2556_v2 = vunpack.c.h.bf16 %v2521_v4 }
 0x2f8   : > { %v2643_v20 = vpack.c.bf16 %v7688_v55, %v2634_v56  ;;  %v2641_v44 = vpack.c.bf16 %v7680_v11, %v2633_v61  ;;  %v2283_v54 = vperm.slane %v2281_v33, 0  ;;  %v5149_v6 = vunpack.i.l.bf16 %v5148_v45  ;;  %v8719_v55 = vld [vmem:[#allocation28_spill] sm:$0xff]  ;;  %v4195_v45 = vld [vmem:[#allocation2 + $0x40] sm:$0xf] }
 0x2f9   : > { %v2571_v7 = vmul.f32 %v7760_v23, %v2551_v1  ;;  %v2572_v38 = vmul.f32 %v7762_v40, %v2552_v62  ;;  %v2575_v50 = vmul.f32 %v7760_v23, %v2555_v52  ;;  %v2576_v36 = vmul.f32 %v7762_v40, %v2556_v2  ;;  %v5113_v2 = vpop.permute.xlu1 %5112 }
 0x2fa   : > { %v2672_v14 = vunpack.c.l.bf16 %v2643_v20  ;;  %v2673_v4 = vunpack.c.h.bf16 %v2643_v20  ;;  %v2668_v59 = vunpack.c.l.bf16 %v2641_v44  ;;  %v2669_v30 = vunpack.c.h.bf16 %v2641_v44 }
 0x2fb   : > { %v2582_v5 = vpack.c.bf16 %v2572_v38, %v2571_v7  ;;  %v2584_v16 = vpack.c.bf16 %v2576_v36, %v2575_v50  ;;  %v2286_v39 = vperm.slane %v2284_v8, 0  ;;  %v7796_v1 = vunpack.c.l.bf16 %v2283_v54  ;;  %v4197_v7 = vld [vmem:[#allocation2 + $0x50] sm:$0xf0]  ;;  %v7820_v8 = vpop.permute.xlu0 %5092 }
 0x2fc   : > { %v8720_v62 = vunpack.i.h.bf16 %v8719_v55  ;;  %v2244_v52 = vsel %vm655_vm2, %v5049_v29, %v5149_v6  ;;  %v2692_v56 = vmul.f32 %v7712_v25, %v2672_v14  ;;  %v2693_v61 = vmul.f32 %v7714_v58, %v2673_v4  ;;  %v8723_v14 = vld [vmem:[#allocation16_spill] sm:$0xff] }
 0x2fd   : > { %2590 = vst [vmem:[#allocation2 + $0x1e8] sm:$0xff] %v2582_v5  ;;  %v2688_v46 = vmul.f32 %v7712_v25, %v2668_v59  ;;  %v2689_v33 = vmul.f32 %v7714_v58, %v2669_v30  ;;  %v7810_v38 = vunpack.c.l.bf16 %v2286_v39  ;;  %v2245_v50 = vsel %vm655_vm2, %v5050_v57, %v5150_v28  ;;  %v4530_v58 = vld [vmem:[#allocation2 + $0x44] sm:$0xf]  ;;  %v4528_v39 = vld [vmem:[#allocation2 + $0x2c] sm:$0xf0] }
 0x2fe   : > { %v2257_v11 = vsel %vm655_vm2, %v5150_v28, %v8720_v62  ;;  %2592 = vst [vmem:[#allocation2 + $0x1f8] sm:$0xff] %v2584_v16  ;;  %v8721_v29 = vunpack.i.l.bf16 %v8719_v55  ;;  %v4196_v20 = vor.u32 %v4532_v22, %v4195_v45  ;;  %v2706_v44 = vpack.c.bf16 %v2693_v61, %v2692_v56  ;;  %v8722_v16 = vld [vmem:[#allocation15_spill] sm:$0xff]  ;;  %v4179_v22 = vld [vmem:[#allocation2 + $0x20] sm:$0xf]  ;;  %v4526_v56 = vld [vmem:[#allocation2 + $0x24] sm:$0xf] }
 0x2ff   : > { %v2704_v54 = vpack.c.bf16 %v2689_v33, %v2688_v46  ;;  %v2263_v15 = vpack.c.bf16 %v2257_v11, %v2245_v50  ;;  %v4200_v5 = vor.u32 %v4530_v58, %v4197_v7  ;;  %v2011_v48 = vpack.i.b16 %v8722_v16, %v8722_v16  ;;  %v4323_v7 = vld [vmem:[#allocation2 + $0x140] sm:$0xf]  ;;  %v4564_v50 = vld [vmem:[#allocation2 + $0x14c] sm:$0xf0] }
 0x300   : > { %v2256_v36 = vsel %vm655_vm2, %v5149_v6, %v8721_v29  ;;  %3226 = vmatpush.bf16.msra.mxu1 %v4196_v20  ;;  %v2014_v57 = vpack.i.b16 %v8723_v14, %v8723_v14  ;;  %v5115_v28 = vunpack.i.h.bf16 %v5113_v2  ;;  %2714 = vst [vmem:[#allocation2 + $0x210] sm:$0xff] %v2706_v44  ;;  %v5114_v11 = vunpack.i.l.bf16 %v5113_v2  ;;  %v4181_v29 = vld [vmem:[#allocation2 + $0x30] sm:$0xf0]  ;;  %v8724_v20 = vld [vmem:[#allocation41_spill] sm:$0xff]  ;;  %v4524_v14 = vld [vmem:[#allocation2 + $0xc] sm:$0xf0] }
 0x301   : > { %v2261_v25 = vpack.c.bf16 %v2256_v36, %v2244_v52  ;;  %v2293_v59 = vunpack.c.l.bf16 %v2263_v15  ;;  %v2294_v30 = vunpack.c.h.bf16 %v2263_v15  ;;  %2712 = vst [vmem:[#allocation2 + $0x200] sm:$0xff] %v2704_v54  ;;  %3283 = vmatpush.bf16.msra.mxu2 %v4200_v5  ;;  %v2013_v55 = vperm.slane %v2011_v48, 0 }
 0x302   : > { %v2016_v62 = vperm.slane %v2014_v57, 0  ;;  %v1977_v52 = vsel %vm493_vm4, %v5115_v28, %v5040_v19  ;;  %v1976_v19 = vsel %vm493_vm4, %v5114_v11, %v5039_v37  ;;  %v8725_v44 = vunpack.i.l.bf16 %v8724_v20  ;;  %v4522_v57 = vld [vmem:[#allocation2 + $0x4] sm:$0xf] }
 0x303   : > { %v2289_v4 = vunpack.c.l.bf16 %v2261_v25  ;;  %v2290_v6 = vunpack.c.h.bf16 %v2261_v25  ;;  %v2313_v33 = vmul.f32 %v7796_v1, %v2293_v59  ;;  %v2314_v45 = vmul.f32 %v7810_v38, %v2294_v30  ;;  %v4163_v25 = vld [vmem:[#allocation2] sm:$0xf]  ;;  %v5123_v30 = vpop.permute.xlu1 %5122 }
 0x304   : > { %v7834_v36 = vunpack.c.l.bf16 %v2013_v55  ;;  %v7836_v2 = vunpack.c.l.bf16 %v2016_v62  ;;  %v1980_v54 = vsel %vm493_vm4, %v8725_v44, %v5114_v11  ;;  %v8726_v5 = vunpack.i.h.bf16 %v8724_v20  ;;  %v4595_v20 = vld [vmem:[%s8380_s4 + $0x8] sm:$0xf0]  ;;  %v7868_v44 = vpop.permute.xlu0 %5102 }
 0x305   : > { %v2309_v61 = vmul.f32 %v7796_v1, %v2289_v4  ;;  %v2310_v46 = vmul.f32 %v7810_v38, %v2290_v6  ;;  %v2326_v58 = vpack.c.bf16 %v2314_v45, %v2313_v33  ;;  %v1995_v48 = vpack.c.bf16 %v1976_v19, %v1980_v54  ;;  %v4582_v19 = vld [vmem:[#allocation2 + $0x1e4] sm:$0xf] }
 0x306   : > { %v1981_v16 = vsel %vm493_vm4, %v8726_v5, %v5115_v28  ;;  %v4180_v6 = vor.u32 %v4528_v39, %v4179_v22  ;;  %v4324_v37 = vor.u32 %v4564_v50, %v4323_v7  ;;  %v4184_v59 = vor.u32 %v4526_v56, %v4181_v29  ;;  %v8727_v56 = vld [vmem:[#allocation29_spill] sm:$0xff]  ;;  %v4139_v29 = vld [vmem:[%s8380_s4] sm:$0xf] }
 0x307   : > { %v2324_v15 = vpack.c.bf16 %v2310_v46, %v2309_v61  ;;  %v1997_v4 = vpack.c.bf16 %v1977_v52, %v1981_v16  ;;  %v2027_v55 = vunpack.c.l.bf16 %v1995_v48  ;;  %v2028_v62 = vunpack.c.h.bf16 %v1995_v48  ;;  %2334 = vst [vmem:[#allocation2 + $0x158] sm:$0xff] %v2326_v58  ;;  %v4405_v52 = vld [vmem:[#allocation2 + $0x1f0] sm:$0xf0] }
 0x308   : > { %v5095_v11 = vunpack.i.h.bf16 %v7820_v8  ;;  %v5094_v61 = vunpack.i.l.bf16 %v7820_v8  ;;  %3227 = vmatpush.bf16.msra.mxu1 %v4180_v6  ;;  %3245 = vmatpush.bf16.msra.mxu3 %v4324_v37  ;;  %v4164_v28 = vor.u32 %v4524_v14, %v4163_v25  ;;  %v4168_v45 = vor.u32 %v4522_v57, %v4165_v43  ;;  %v8730_v43 = vld [vmem:[#allocation33_spill] sm:$0xff] }
 0x309   : > { %2332 = vst [vmem:[#allocation2 + $0x148] sm:$0xff] %v2324_v15  ;;  %v2031_v46 = vunpack.c.l.bf16 %v1997_v4  ;;  %v2032_v33 = vunpack.c.h.bf16 %v1997_v4  ;;  %v2047_v22 = vmul.f32 %v7834_v36, %v2027_v55  ;;  %v2048_v39 = vmul.f32 %v7836_v2, %v2028_v62  ;;  %3284 = vmatpush.bf16.msra.mxu2 %v4184_v59  ;;  %v8731_v4 = vld [vmem:[#allocation35_spill] sm:$0xff] }
 0x30a   : > { %v8728_v7 = vunpack.i.h.bf16 %v8727_v56  ;;  %v2103_v8 = vsel %vm570_vm3, %v5094_v61, %v5034_v13  ;;  %v2104_v15 = vsel %vm570_vm3, %v5095_v11, %v5035_v47  ;;  %v8729_v13 = vunpack.i.l.bf16 %v8727_v56  ;;  %v4578_v47 = vld [vmem:[#allocation2 + $0x1c4] sm:$0xf]  ;;  %v4389_v55 = vld [vmem:[#allocation2 + $0x1d0] sm:$0xf0] }
 0x30b   : > { %v2051_v54 = vmul.f32 %v7834_v36, %v2031_v46  ;;  %v2052_v25 = vmul.f32 %v7836_v2, %v2032_v33  ;;  %v2058_v5 = vpack.c.bf16 %v2048_v39, %v2047_v22  ;;  %v4408_v14 = vor.u32 %v4582_v19, %v4405_v52  ;;  %v4435_v33 = vld [vmem:[#allocation2 + $0x220] sm:$0xf]  ;;  %v4592_v19 = vld [vmem:[#allocation2 + $0x22c] sm:$0xf0] }
 0x30c   : > { %v2108_v50 = vsel %vm570_vm3, %v8728_v7, %v5095_v11  ;;  %v2107_v58 = vsel %vm570_vm3, %v8729_v13, %v5094_v61  ;;  %3228 = vmatpush.bf16.msra.mxu1 %v4164_v28  ;;  %v8732_v6 = vor.u32 %v8730_v43, %v8731_v4  ;;  %v5125_v37 = vunpack.i.h.bf16 %v5123_v30  ;;  %v8733_v28 = vld [vmem:[#allocation25_spill] sm:$0xff]  ;;  %v7911_v4 = vpop.permute.xlu1 %5142 }
 0x30d   : > { %v2122_v16 = vpack.c.bf16 %v2103_v8, %v2107_v58  ;;  %v2124_v48 = vpack.c.bf16 %v2104_v15, %v2108_v50  ;;  %v2060_v57 = vpack.c.bf16 %v2052_v25, %v2051_v54  ;;  %v5124_v9 = vunpack.i.l.bf16 %v5123_v30  ;;  %2066 = vst [vmem:[#allocation2 + $0xa8] sm:$0xff] %v2058_v5  ;;  %3285 = vmatpush.bf16.msra.mxu2 %v4168_v45  ;;  %v8735_v30 = vld [vmem:[#allocation27_spill] sm:$0xff] }
 0x30e   : > { %3246 = vmatpush.bf16.msra.mxu3 %v8732_v6  ;;  %v7883_v59 = vor.u32 %v4595_v20, %v4139_v29  ;;  %v8734_v52 = vunpack.i.h.bf16 %v8733_v28  ;;  %v8736_v39 = vunpack.i.l.bf16 %v8735_v30  ;;  %v8737_v7 = vunpack.i.h.bf16 %v8735_v30  ;;  %v4590_v29 = vld [vmem:[#allocation2 + $0x224] sm:$0xf]  ;;  %v4437_v20 = vld [vmem:[#allocation2 + $0x230] sm:$0xf0] }
 0x30f   : > { %v2154_v62 = vunpack.c.l.bf16 %v2122_v16  ;;  %v2155_v11 = vunpack.c.h.bf16 %v2122_v16  ;;  %v2158_v61 = vunpack.c.l.bf16 %v2124_v48  ;;  %v2159_v46 = vunpack.c.h.bf16 %v2124_v48  ;;  %2068 = vst [vmem:[#allocation2 + $0xb8] sm:$0xff] %v2060_v57  ;;  %v8739_v16 = vld [vmem:[#allocation34_spill] sm:$0xff]  ;;  %v8740_v48 = vld [vmem:[#allocation36_spill] sm:$0xff] }
 0x310   : > { %3297 = vmatpush.bf16.msrb.mxu1 %v4408_v14  ;;  %v2384_v22 = vsel %vm732_vm0, %v5125_v37, %v8734_v52  ;;  %v2371_v56 = vsel %vm732_vm0, %v8736_v39, %v5124_v9  ;;  %v2372_v50 = vsel %vm732_vm0, %v8737_v7, %v5125_v37  ;;  %v8738_v45 = vunpack.i.l.bf16 %v8733_v28  ;;  %3286 = vmatmul.bf16.vlgmr.msra.gmra.mxu2 %v7883_v59  ;;  %v8744_v52 = vld [vmem:[#allocation26_spill] sm:$0xff] }
 0x311   : > { %v2174_v54 = vmul.f32 %v7580_v21, %v2154_v62  ;;  %v2175_v25 = vmul.f32 %v7582_v10, %v2155_v11  ;;  %v2178_v15 = vmul.f32 %v7580_v21, %v2158_v61  ;;  %v2179_v13 = vmul.f32 %v7582_v10, %v2159_v46  ;;  %3229 = vmatmul.bf16.vlgmr.msra.gmra.mxu1 %v7883_v59  ;;  %v4594_v46 = vld [vmem:[%s8380_s4 + $0x4] sm:$0xf]  ;;  %v4411_v39 = vld [vmem:[#allocation2 + $0x1e8] sm:$0xf] }
 0x312   : > { %v2383_v8 = vsel %vm732_vm0, %v5124_v9, %v8738_v45  ;;  %v2390_v5 = vpack.c.bf16 %v2384_v22, %v2372_v50  ;;  %v8741_v14 = vor.u32 %v8739_v16, %v8740_v48  ;;  %v4436_v57 = vor.u32 %v4592_v19, %v4435_v33  ;;  %v4141_v33 = vld [vmem:[%s8380_s4 + $0xc] sm:$0xf0]  ;;  %v8742_v19 = vld [vmem:[#allocation19_spill] sm:$0xff]  ;;  %v7929_v50 = vpop.permute.xlu0 %5117 }
 0x313   : > { %v2388_v58 = vpack.c.bf16 %v2383_v8, %v2371_v56  ;;  %v5105_v43 = vunpack.i.h.bf16 %v7868_v44  ;;  %v2185_v6 = vpack.c.bf16 %v2175_v25, %v2174_v54  ;;  %v2187_v37 = vpack.c.bf16 %v2179_v13, %v2178_v15  ;;  %v4585_v56 = vld [vmem:[#allocation2 + $0x1f4] sm:$0xf0]  ;;  %v4373_v54 = vld [vmem:[#allocation2 + $0x1b0] sm:$0xf0] }
 0x314   : > { %3247 = vmatpush.bf16.msra.mxu3 %v8741_v14  ;;  %v4392_v21 = vor.u32 %v4578_v47, %v4389_v55  ;;  %v4440_v9 = vor.u32 %v4590_v29, %v4437_v20  ;;  %v2420_v11 = vunpack.c.l.bf16 %v2390_v5  ;;  %v2421_v61 = vunpack.c.h.bf16 %v2390_v5  ;;  %3265 = vmatpush.bf16.msra.mxu0 %v4436_v57  ;;  %v4574_v20 = vld [vmem:[#allocation2 + $0x1a4] sm:$0xf] }
 0x315   : > { %v2416_v10 = vunpack.c.l.bf16 %v2388_v58  ;;  %v2417_v62 = vunpack.c.h.bf16 %v2388_v58  ;;  %2193 = vst [vmem:[#allocation2 + $0xe8] sm:$0xff] %v2185_v6  ;;  %v8743_v28 = vunpack.i.h.bf16 %v8742_v19  ;;  %v5104_v55 = vunpack.i.l.bf16 %v7868_v44 }
 0x316   : > { %3298 = vmatpush.bf16.msrb.mxu1 %v4392_v21  ;;  %v8745_v22 = vunpack.i.h.bf16 %v8744_v52  ;;  %v5145_v7 = vunpack.i.h.bf16 %v7911_v4  ;;  %2195 = vst [vmem:[#allocation2 + $0xf8] sm:$0xff] %v2187_v37  ;;  %v2440_v29 = vmul.f32 %v7644_v17, %v2420_v11  ;;  %v2441_v44 = vmul.f32 %v7646_v3, %v2421_v61  ;;  %v4588_v21 = vld [vmem:[#allocation2 + $0x20c] sm:$0xf0] }
 0x317   : > { %v2511_v47 = vsel %vm809_vm1, %v5105_v43, %v8743_v28  ;;  %v2436_v45 = vmul.f32 %v7644_v17, %v2416_v10  ;;  %v2437_v8 = vmul.f32 %v7646_v3, %v2417_v62  ;;  %v8746_v25 = vunpack.i.l.bf16 %v8744_v52  ;;  %v4570_v52 = vld [vmem:[#allocation2 + $0x184] sm:$0xf] }
 0x318   : > { %3322 = vmatpush.bf16.msrb.mxu3 %v4440_v9  ;;  %v2499_v30 = vsel %vm809_vm1, %v8745_v22, %v5105_v43  ;;  %v8747_v13 = vunpack.i.l.bf16 %v8742_v19  ;;  %v7943_v16 = vor.u32 %v4594_v46, %v4141_v33  ;;  %v2453_v14 = vpack.c.bf16 %v2441_v44, %v2440_v29  ;;  %v4421_v9 = vld [vmem:[#allocation2 + $0x210] sm:$0xf0]  ;;  %v4419_v33 = vld [vmem:[#allocation2 + $0x200] sm:$0xf]  ;;  %v4586_v19 = vld [vmem:[#allocation2 + $0x204] sm:$0xf] }
 0x319   : > { %v2498_v15 = vsel %vm809_vm1, %v8746_v25, %v5104_v55  ;;  %v2517_v5 = vpack.c.bf16 %v2511_v47, %v2499_v30  ;;  %v2451_v48 = vpack.c.bf16 %v2437_v8, %v2436_v45  ;;  %v4412_v57 = vor.u32 %v4585_v56, %v4411_v39 }
 0x31a   : > { %v2510_v58 = vsel %vm809_vm1, %v5104_v55, %v8747_v13  ;;  %3248 = vmatmul.bf16.vlgmr.msra.gmra.mxu3 %v7943_v16  ;;  %v4376_v6 = vor.u32 %v4574_v20, %v4373_v54  ;;  %v5144_v37 = vunpack.i.l.bf16 %v7911_v4  ;;  %v1848_v11 = vsel %vm416_vm5, %v5145_v7, %v5060_v12  ;;  %2461 = vst [vmem:[#allocation2 + $0x198] sm:$0xff] %v2453_v14  ;;  %v4357_v12 = vld [vmem:[#allocation2 + $0x190] sm:$0xf0]  ;;  %v4596_v14 = vld [vmem:[%s8380_s4 + $0x10] sm:$0xf0]  ;;  %vm8756_vm1 = vmmov %vm8685_vm6 }
 0x31b   : > { %v2515_v17 = vpack.c.bf16 %v2510_v58, %v2498_v15  ;;  %v2547_v3 = vunpack.c.l.bf16 %v2517_v5  ;;  %v2548_v43 = vunpack.c.h.bf16 %v2517_v5  ;;  %2459 = vst [vmem:[#allocation2 + $0x188] sm:$0xff] %v2451_v48  ;;  %3354 = vmatpush.bf16.msrb.mxu2 %v4412_v57  ;;  %v8748_v61 = vunpack.i.h.bf16 %v7525_v32  ;;  %v7979_v57 = vpop.permute.xlu0 %5137  ;;  %vm8757_vm3 = vmmov %vm8756_vm1 }
 0x31c   : > { %3299 = vmatpush.bf16.msrb.mxu1 %v4376_v6  ;;  %v8749_v47 = vunpack.i.l.bf16 %v7362_v41  ;;  %v5120_v22 = vunpack.i.h.bf16 %v7929_v50  ;;  %v8750_v56 = vunpack.i.l.bf16 %v7525_v32  ;;  %v4420_v41 = vor.u32 %v4588_v21, %v4419_v33  ;;  %v8751_v32 = vld [vmem:[#allocation18_spill] sm:$0xff]  ;;  %vm8771_vm11 = vmmov %vm8756_vm1 }
 0x31d   : > { %v2543_v10 = vunpack.c.l.bf16 %v2515_v17  ;;  %v2544_v62 = vunpack.c.h.bf16 %v2515_v17  ;;  %v1852_v46 = vsel %vm416_vm5, %v8748_v61, %v5145_v7  ;;  %v2567_v4 = vmul.f32 %v7760_v23, %v2547_v3  ;;  %v4566_v17 = vld [vmem:[#allocation2 + $0x164] sm:$0xf]  ;;  %v2654_v21 = vld [vmem:[#allocation1 + $0x12] sm:$0xff]  ;;  %vm8773_vm12 = vmmov %vm8756_vm1 }
 0x31e   : > { %v2568_v28 = vmul.f32 %v7762_v40, %v2548_v43  ;;  %v1847_v55 = vsel %vm416_vm5, %v5144_v37, %v8749_v47  ;;  %v1851_v7 = vsel %vm416_vm5, %v8750_v56, %v5144_v37  ;;  %v1866_v45 = vpack.c.bf16 %v1848_v11, %v1852_v46  ;;  %3266 = vmatpush.bf16.msra.mxu0 %v4420_v41  ;;  %v4151_v56 = vld [vmem:[%s8380_s4 + $0x18] sm:$0xf]  ;;  %v4598_v41 = vld [vmem:[%s8380_s4 + $0x20] sm:$0xf0]  ;;  %vm8759_vm5 = vmmov %vm8756_vm1 }
 0x31f   : > { %v2563_v30 = vmul.f32 %v7760_v23, %v2543_v10  ;;  %v2564_v39 = vmul.f32 %v7762_v40, %v2544_v62  ;;  %v1864_v29 = vpack.c.bf16 %v1847_v55, %v1851_v7  ;;  %v4424_v44 = vor.u32 %v4586_v19, %v4421_v9  ;;  %v4147_v23 = vld [vmem:[%s8380_s4 + $0x8] sm:$0xf]  ;;  %v2655_v9 = vld [vmem:[#allocation1 + $0x1b] sm:$0xff]  ;;  %v5158_v55 = vpop.permute.xlu1 %5157  ;;  %vm8774_vm7 = vmmov %vm8756_vm1 }
 0x320   : > { %v2580_v8 = vpack.c.bf16 %v2568_v28, %v2567_v4  ;;  %v1896_v54 = vunpack.c.l.bf16 %v1866_v45  ;;  %v1897_v25 = vunpack.c.h.bf16 %v1866_v45  ;;  %v4360_v15 = vor.u32 %v4570_v52, %v4357_v12 }
 0x321   : > { %v2578_v20 = vpack.c.bf16 %v2564_v39, %v2563_v30  ;;  %v1892_v40 = vunpack.c.l.bf16 %v1864_v29  ;;  %v1893_v13 = vunpack.c.h.bf16 %v1864_v29  ;;  %3323 = vmatpush.bf16.msrb.mxu3 %v4424_v44  ;;  %v8752_v58 = vunpack.i.h.bf16 %v8751_v32 }
 0x322   : > { %2588 = vst [vmem:[#allocation2 + $0x1d8] sm:$0xff] %v2580_v8  ;;  %v5119_v48 = vunpack.i.l.bf16 %v7929_v50  ;;  %v1916_v3 = vmul.f32 %v7718_v35, %v1896_v54  ;;  %v1917_v43 = vmul.f32 %v7720_v42, %v1897_v25  ;;  %3300 = vmatpush.bf16.msrb.mxu1 %v4360_v15  ;;  %v8753_v6 = vunpack.i.h.bf16 %v7367_v60  ;;  %v4341_v50 = vld [vmem:[#allocation2 + $0x170] sm:$0xf0]  ;;  %v4283_v15 = vld [vmem:[#allocation2 + $0xe8] sm:$0xf] }
 0x323   : > { %v1979_v5 = vsel %vm493_vm4, %v8752_v58, %v5120_v22  ;;  %2586 = vst [vmem:[#allocation2 + $0x1c8] sm:$0xff] %v2578_v20  ;;  %vm3214_vm0 = vcmask 261120   ;;  %v1912_v10 = vmul.f32 %v7718_v35, %v1892_v40  ;;  %v1913_v62 = vmul.f32 %v7720_v42, %v1893_v13  ;;  %v4562_v40 = vld [vmem:[#allocation2 + $0x144] sm:$0xf] }
 0x324   : > { %v1975_v37 = vsel %vm493_vm4, %v5120_v22, %v8753_v6  ;;  %v8754_v11 = vunpack.i.l.bf16 %v7367_v60  ;;  %v8755_v46 = vunpack.i.l.bf16 %v8751_v32  ;;  %v1929_v19 = vpack.c.bf16 %v1917_v43, %v1916_v3 }
 0x325   : > { %v1993_v28 = vpack.c.bf16 %v1975_v37, %v1979_v5  ;;  %v7997_v47 = vor.u32 %v4596_v14, %v4147_v23  ;;  %v1927_v52 = vpack.c.bf16 %v1913_v62, %v1912_v10  ;;  %v4344_v35 = vor.u32 %v4566_v17, %v4341_v50  ;;  %v4553_v23 = vld [vmem:[#allocation2 + $0xf4] sm:$0xf0]  ;;  %v8033_v37 = vpop.permute.xlu0 %5152 }
 0x326   : > { %v1974_v61 = vsel %vm493_vm4, %v5119_v48, %v8754_v11  ;;  %v1978_v33 = vsel %vm493_vm4, %v8755_v46, %v5119_v48  ;;  %v2662_v12 = vpack.i.b16 %v2654_v21, %v2654_v21  ;;  %v2665_v42 = vpack.i.b16 %v2655_v9, %v2655_v9  ;;  %1937 = vst [vmem:[#allocation2 + $0x58] sm:$0xff] %v1929_v19  ;;  %v4285_v48 = vld [vmem:[#allocation2 + $0xf8] sm:$0xf0]  ;;  %vm8758_vm4 = vmmov %vm8756_vm1  ;;  %v4267_v46 = vld [vmem:[#allocation2 + $0xc8] sm:$0xf] }
 0x327   : > { %v1991_v4 = vpack.c.bf16 %v1974_v61, %v1978_v33  ;;  %v2023_v30 = vunpack.c.l.bf16 %v1993_v28  ;;  %v2024_v39 = vunpack.c.h.bf16 %v1993_v28  ;;  %4449 = vmatmul.msk.bf16.vlgmr.msra.gmra.mxu0 %vm3214_vm0, %v7997_v47  ;;  %1935 = vst [vmem:[#allocation2 + $0x48] sm:$0xff] %v1927_v52  ;;  %3301 = vmatpush.bf16.msrb.mxu1 %v4344_v35  ;;  %v5160_v8 = vunpack.i.h.bf16 %v5158_v55  ;;  %v4549_v33 = vld [vmem:[#allocation2 + $0xd4] sm:$0xf0]  ;;  %v8762_v28 = vld [vmem:[#allocation47_spill] sm:$0xff] }
 0x328   : > { %v2664_v7 = vperm.slane %v2662_v12, 0  ;;  %v2667_v45 = vperm.slane %v2665_v42, 0  ;;  %v5159_v29 = vunpack.i.l.bf16 %v5158_v55  ;;  %v8031_v6 = vor.u32 %v4598_v41, %v4151_v56  ;;  %v4547_v42 = vld [vmem:[#allocation2 + $0xcc] sm:$0xf] }
 0x329   : > { %v2019_v60 = vunpack.c.l.bf16 %v1991_v4  ;;  %v2020_v22 = vunpack.c.h.bf16 %v1991_v4  ;;  %v2043_v54 = vmul.f32 %v7834_v36, %v2023_v30  ;;  %v2044_v25 = vmul.f32 %v7836_v2, %v2024_v39  ;;  %v4581_v41 = vld [vmem:[#allocation2 + $0x1d4] sm:$0xf0] }
 0x32a   : > { %v8011_v13 = vunpack.c.l.bf16 %v2664_v7  ;;  %v8013_v32 = vunpack.c.l.bf16 %v2667_v45  ;;  %v2625_v58 = vsel %vm8756_vm1, %v5089_v63, %v5159_v29  ;;  %v2626_v5 = vsel %vm8757_vm3, %v5090_v34, %v5160_v8  ;;  %3234 = vmatmul.bf16.gmra.mxu1 %v8031_v6  ;;  %3291 = vmatmul.bf16.gmra.mxu2 %v8031_v6 }
 0x32b   : > { %v2039_v44 = vmul.f32 %v7834_v36, %v2019_v60  ;;  %v2040_v20 = vmul.f32 %v7836_v2, %v2020_v22  ;;  %v4551_v36 = vld [vmem:[#allocation2 + $0xec] sm:$0xf]  ;;  %v4325_v2 = vld [vmem:[#allocation2 + $0x150] sm:$0xf0]  ;;  %v2056_v17 = vpack.c.bf16 %v2044_v25, %v2043_v54  ;;  %v2637_v3 = vsel %vm8758_vm4, %v5159_v29, %v5079_v27  ;;  %v4269_v60 = vld [vmem:[#allocation2 + $0xd8] sm:$0xf0] }
 0x32c   : > { %v2638_v63 = vsel %vm8759_vm5, %v5160_v8, %v5080_v26  ;;  %v2642_v43 = vpack.c.bf16 %v2637_v3, %v2625_v58  ;;  %v4284_v34 = vor.u32 %v4553_v23, %v4283_v15  ;;  %v4288_v50 = vor.u32 %v4551_v36, %v4285_v48  ;;  %v4153_v26 = vld [vmem:[%s8380_s4 + $0x24] sm:$0xf0]  ;;  %v4251_v22 = vld [vmem:[#allocation2 + $0xa8] sm:$0xf]  ;;  %v4545_v8 = vld [vmem:[#allocation2 + $0xb4] sm:$0xf0] }
 0x32d   : > { %v2054_v14 = vpack.c.bf16 %v2040_v20, %v2039_v44  ;;  %v2644_v49 = vpack.c.bf16 %v2638_v63, %v2626_v5  ;;  %v4328_v21 = vor.u32 %v4562_v40, %v4325_v2  ;;  %v5140_v9 = vunpack.i.h.bf16 %v7979_v57  ;;  %2064 = vst [vmem:[#allocation2 + $0x98] sm:$0xff] %v2056_v17  ;;  %v4395_v29 = vld [vmem:[#allocation2 + $0x1c8] sm:$0xf]  ;;  %v4543_v23 = vld [vmem:[#allocation2 + $0xac] sm:$0xf] }
 0x32e   : > { %v5139_v10 = vunpack.i.l.bf16 %v7979_v57  ;;  %v2670_v27 = vunpack.c.l.bf16 %v2642_v43  ;;  %v2671_v62 = vunpack.c.h.bf16 %v2642_v43  ;;  %3335 = vmatpush.bf16.msrb.mxu0 %v4284_v34  ;;  %3392 = vmatpush.bf16.msra.mxu3 %v4288_v50  ;;  %v8760_v57 = vld [vmem:[#allocation48_spill] sm:$0xff]  ;;  %v8763_v55 = vunpack.i.l.bf16 %v8762_v28  ;;  %v4599_v43 = vld [vmem:[%s8380_s4 + $0x28] sm:$0xf0] }
 0x32f   : > { %2062 = vst [vmem:[#allocation2 + $0x88] sm:$0xff] %v2054_v14  ;;  %v2674_v11 = vunpack.c.l.bf16 %v2644_v49  ;;  %v2675_v61 = vunpack.c.h.bf16 %v2644_v49  ;;  %v8761_v19 = vunpack.i.h.bf16 %v8760_v57  ;;  %v8764_v35 = vunpack.i.h.bf16 %v8762_v28  ;;  %3302 = vmatpush.bf16.msrb.mxu1 %v4328_v21  ;;  %v4253_v40 = vld [vmem:[#allocation2 + $0xb8] sm:$0xf0]  ;;  %v4159_v63 = vld [vmem:[%s8380_s4 + $0x20] sm:$0xf]  ;;  %v8767_v21 = vld [vmem:[#allocation38_spill] sm:$0xff] }
 0x330   : > { %v2246_v52 = vsel %vm655_vm2, %v8763_v55, %v5139_v10  ;;  %v5155_v30 = vunpack.i.h.bf16 %v8033_v37  ;;  %v2690_v39 = vmul.f32 %v8011_v13, %v2670_v27  ;;  %v2691_v56 = vmul.f32 %v8013_v32, %v2671_v62  ;;  %v8766_v50 = vld [vmem:[#allocation40_spill] sm:$0xff]  ;;  %v4379_v27 = vld [vmem:[#allocation2 + $0x1a8] sm:$0xf] }
 0x331   : > { %v2259_v4 = vsel %vm655_vm2, %v5140_v9, %v8761_v19  ;;  %v2247_v12 = vsel %vm655_vm2, %v8764_v35, %v5140_v9  ;;  %v2694_v7 = vmul.f32 %v8011_v13, %v2674_v11  ;;  %v2695_v45 = vmul.f32 %v8013_v32, %v2675_v61  ;;  %v4577_v62 = vld [vmem:[#allocation2 + $0x1b4] sm:$0xf0] }
 0x332   : > { %v8765_v44 = vunpack.i.l.bf16 %v8760_v57  ;;  %v2267_v54 = vpack.c.bf16 %v2259_v4, %v2247_v12  ;;  %v8066_v25 = vor.u32 %v4597_v18, %v4153_v26  ;;  %v4268_v15 = vor.u32 %v4549_v33, %v4267_v46 }
 0x333   : > { %v2705_v58 = vpack.c.bf16 %v2691_v56, %v2690_v39  ;;  %v2707_v5 = vpack.c.bf16 %v2695_v45, %v2694_v7  ;;  %v4272_v48 = vor.u32 %v4547_v42, %v4269_v60  ;;  %v4252_v17 = vor.u32 %v4545_v8, %v4251_v22  ;;  %v8775_v22 = vld [vmem:[#allocation39_spill] sm:$0xff]  ;;  %v4363_v8 = vld [vmem:[#allocation2 + $0x188] sm:$0xf] }
 0x334   : > { %v2258_v20 = vsel %vm655_vm2, %v5139_v10, %v8765_v44  ;;  %v2301_v2 = vunpack.c.l.bf16 %v2267_v54  ;;  %v2302_v14 = vunpack.c.h.bf16 %v2267_v54  ;;  %3253 = vmatmul.bf16.gmra.mxu3 %v8066_v25  ;;  %3336 = vmatpush.bf16.msrb.mxu0 %v4268_v15  ;;  %v4396_v3 = vor.u32 %v4581_v41, %v4395_v29  ;;  %vm8770_vm2 = vmmov %vm8756_vm1  ;;  %v4237_v12 = vld [vmem:[#allocation2 + $0x98] sm:$0xf0]  ;;  %v4537_v54 = vld [vmem:[#allocation2 + $0x74] sm:$0xf0] }
 0x335   : > { %v2265_v36 = vpack.c.bf16 %v2258_v20, %v2246_v52  ;;  %2713 = vst [vmem:[#allocation2 + $0x208] sm:$0xff] %v2705_v58  ;;  %3393 = vmatpush.bf16.msra.mxu3 %v4272_v48  ;;  %v8768_v9 = vor.u32 %v8766_v50, %v8767_v21  ;;  %v4256_v10 = vor.u32 %v4543_v23, %v4253_v40  ;;  %v8769_v18 = vunpack.i.h.bf16 %v7437_v31  ;;  %v4541_v52 = vld [vmem:[#allocation2 + $0x94] sm:$0xf0]  ;;  %v4219_v20 = vld [vmem:[#allocation2 + $0x68] sm:$0xf] }
 0x336   : > { %2715 = vst [vmem:[#allocation2 + $0x218] sm:$0xff] %v2707_v5  ;;  %v2321_v11 = vmul.f32 %v7796_v1, %v2301_v2  ;;  %v2322_v61 = vmul.f32 %v7810_v38, %v2302_v14  ;;  %3355 = vmatpush.bf16.msrb.mxu2 %v4396_v3  ;;  %v5154_v46 = vunpack.i.l.bf16 %v8033_v37  ;;  %v2640_v33 = vsel %vm8771_vm11, %v5155_v30, %v5065_v0  ;;  %v4235_v57 = vld [vmem:[#allocation2 + $0x88] sm:$0xf]  ;;  %v4539_v35 = vld [vmem:[#allocation2 + $0x8c] sm:$0xf] }
 0x337   : > { %v2297_v49 = vunpack.c.l.bf16 %v2265_v36  ;;  %v2298_v34 = vunpack.c.h.bf16 %v2265_v36  ;;  %3303 = vmatpush.bf16.msrb.mxu1 %v8768_v9  ;;  %v2628_v26 = vsel %vm8770_vm2, %v8769_v18, %v5155_v30  ;;  %v8091_v55 = vor.u32 %v4599_v43, %v4159_v63  ;;  %v8776_v30 = vld [vmem:[#allocation37_spill] sm:$0xff]  ;;  %v4535_v23 = vld [vmem:[#allocation2 + $0x6c] sm:$0xf]  ;;  %v4221_v40 = vld [vmem:[#allocation2 + $0x78] sm:$0xf0] }
 0x338   : > { %v2648_v28 = vpack.c.bf16 %v2640_v33, %v2628_v26  ;;  %v2330_v42 = vpack.c.bf16 %v2322_v61, %v2321_v11  ;;  %3337 = vmatpush.bf16.msrb.mxu0 %v4252_v17  ;;  %v8772_v37 = vunpack.i.l.bf16 %v7437_v31  ;;  %v2639_v0 = vsel %vm8774_vm7, %v5154_v46, %v5064_v24  ;;  %v4573_v31 = vld [vmem:[#allocation2 + $0x194] sm:$0xf0]  ;;  %v4203_v17 = vld [vmem:[#allocation2 + $0x48] sm:$0xf]  ;;  %v4531_v63 = vld [vmem:[#allocation2 + $0x4c] sm:$0xf] }
 0x339   : > { %v2317_v19 = vmul.f32 %v7796_v1, %v2297_v49  ;;  %v2318_v4 = vmul.f32 %v7810_v38, %v2298_v34  ;;  %v4380_v1 = vor.u32 %v4577_v62, %v4379_v27  ;;  %3394 = vmatpush.bf16.msra.mxu3 %v4256_v10  ;;  %v8777_v39 = vor.u32 %v8775_v22, %v8776_v30  ;;  %v4533_v3 = vld [vmem:[#allocation2 + $0x54] sm:$0xf0]  ;;  %v4205_v43 = vld [vmem:[#allocation2 + $0x58] sm:$0xf0]  ;;  %v4187_v21 = vld [vmem:[#allocation2 + $0x28] sm:$0xf] }
 0x33a   : > { %v2627_v60 = vsel %vm8773_vm12, %v8772_v37, %v5154_v46  ;;  %v2682_v7 = vunpack.c.l.bf16 %v2648_v28  ;;  %v2683_v45 = vunpack.c.h.bf16 %v2648_v28  ;;  %2338 = vst [vmem:[#allocation2 + $0x178] sm:$0xff] %v2330_v42  ;;  %4450 = vmatmul.msk.bf16.gmra.mxu0 %vm3214_vm0, %v8091_v55  ;;  %v4236_v53 = vor.u32 %v4541_v52, %v4235_v57  ;;  %v4529_v9 = vld [vmem:[#allocation2 + $0x34] sm:$0xf0]  ;;  %v4331_v10 = vld [vmem:[#allocation2 + $0x148] sm:$0xf] }
 0x33b   : > { %v2328_v38 = vpack.c.bf16 %v2318_v4, %v2317_v19  ;;  %3304 = vmatpush.bf16.msrb.mxu1 %v8777_v39  ;;  %v2646_v56 = vpack.c.bf16 %v2639_v0, %v2627_v60  ;;  %3356 = vmatpush.bf16.msrb.mxu2 %v4380_v1  ;;  %v4240_v51 = vor.u32 %v4539_v35, %v4237_v12  ;;  %v4565_v18 = vld [vmem:[#allocation2 + $0x154] sm:$0xf0]  ;;  %v4527_v26 = vld [vmem:[#allocation2 + $0x2c] sm:$0xf]  ;;  %v4189_v27 = vld [vmem:[#allocation2 + $0x38] sm:$0xf0] }
 0x33c   : > { %v2702_v41 = vmul.f32 %v8011_v13, %v2682_v7  ;;  %v2703_v44 = vmul.f32 %v8013_v32, %v2683_v45  ;;  %3338 = vmatpush.bf16.msrb.mxu0 %v4236_v53  ;;  %v4364_v15 = vor.u32 %v4573_v31, %v4363_v8  ;;  %v4220_v48 = vor.u32 %v4537_v54, %v4219_v20  ;;  %v4171_v11 = vld [vmem:[#allocation2 + $0x8] sm:$0xf]  ;;  %v4561_v61 = vld [vmem:[#allocation2 + $0x134] sm:$0xf0]  ;;  %v4523_v4 = vld [vmem:[#allocation2 + $0xc] sm:$0xf] }
 0x33d   : > { %2336 = vst [vmem:[#allocation2 + $0x168] sm:$0xff] %v2328_v38  ;;  %v2678_v24 = vunpack.c.l.bf16 %v2646_v56  ;;  %v2679_v29 = vunpack.c.h.bf16 %v2646_v56  ;;  %3395 = vmatpush.bf16.msra.mxu3 %v4240_v51  ;;  %v4224_v14 = vor.u32 %v4535_v23, %v4221_v40  ;;  %v4208_v50 = vor.u32 %v4531_v63, %v4205_v43  ;;  %v4525_v19 = vld [vmem:[#allocation2 + $0x14] sm:$0xf0]  ;;  %v4173_v35 = vld [vmem:[#allocation2 + $0x18] sm:$0xf0] }
 0x33e   : > { %v2711_v36 = vpack.c.bf16 %v2703_v44, %v2702_v41  ;;  %3305 = vmatmul.bf16.vlgmr.msrb.gmra.mxu1 %v7943_v16  ;;  %v4188_v62 = vor.u32 %v4529_v9, %v4187_v21  ;;  %v4332_v33 = vor.u32 %v4565_v18, %v4331_v10  ;;  %v4192_v57 = vor.u32 %v4527_v26, %v4189_v27  ;;  %v4583_v37 = vld [vmem:[#allocation2 + $0x1ec] sm:$0xf]  ;;  %v4413_v60 = vld [vmem:[#allocation2 + $0x1f8] sm:$0xf0]  ;;  %v4315_v1 = vld [vmem:[#allocation2 + $0x128] sm:$0xf]  ;;  %v8135_v27 = vpop.permute.xlu0 %2811 }
 0x33f   : > { %v2698_v58 = vmul.f32 %v8011_v13, %v2678_v24  ;;  %v2699_v5 = vmul.f32 %v8013_v32, %v2679_v29  ;;  %3357 = vmatpush.bf16.msrb.mxu2 %v4364_v15  ;;  %v4204_v13 = vor.u32 %v4533_v3, %v4203_v17  ;;  %v4172_v0 = vor.u32 %v4525_v19, %v4171_v11  ;;  %v4427_v39 = vld [vmem:[#allocation2 + $0x208] sm:$0xf]  ;;  %v4589_v56 = vld [vmem:[#allocation2 + $0x214] sm:$0xf0]  ;;  %v4579_v8 = vld [vmem:[#allocation2 + $0x1cc] sm:$0xf] }
 0x340   : > { %2719 = vst [vmem:[#allocation2 + $0x238] sm:$0xff] %v2711_v36  ;;  %3339 = vmatpush.bf16.msrb.mxu0 %v4220_v48  ;;  %v4316_v22 = vor.u32 %v4561_v61, %v4315_v1  ;;  %v4176_v30 = vor.u32 %v4523_v4, %v4173_v35  ;;  %v4416_v7 = vor.u32 %v4583_v37, %v4413_v60  ;;  %v4557_v45 = vld [vmem:[#allocation2 + $0x114] sm:$0xf0]  ;;  %v4397_v31 = vld [vmem:[#allocation2 + $0x1d8] sm:$0xf0] }
 0x341   : > { %v2709_v2 = vpack.c.bf16 %v2699_v5, %v2698_v58  ;;  %3396 = vmatpush.bf16.msra.mxu3 %v4224_v14  ;;  %v4569_v49 = vld [vmem:[#allocation2 + $0x174] sm:$0xf0]  ;;  %v4299_v53 = vld [vmem:[#allocation2 + $0x108] sm:$0xf]  ;;  %v4428_v51 = vor.u32 %v4589_v56, %v4427_v39  ;;  %v4587_v24 = vld [vmem:[#allocation2 + $0x20c] sm:$0xf]  ;;  %v4400_v44 = vor.u32 %v4579_v8, %v4397_v31 }
 0x342   : > { %v4429_v29 = vld [vmem:[#allocation2 + $0x218] sm:$0xf0]  ;;  %v4300_v41 = vor.u32 %v4557_v45, %v4299_v53  ;;  %v4575_v54 = vld [vmem:[#allocation2 + $0x1ac] sm:$0xf] }
 0x343   : > { %2717 = vst [vmem:[#allocation2 + $0x228] sm:$0xff] %v2709_v2  ;;  %v4432_v20 = vor.u32 %v4587_v24, %v4429_v29  ;;  %v4381_v15 = vld [vmem:[#allocation2 + $0x1b8] sm:$0xf0]  ;;  %v4571_v40 = vld [vmem:[#allocation2 + $0x18c] sm:$0xf] }
 0x344   : > { %v4347_v34 = vld [vmem:[#allocation2 + $0x168] sm:$0xf]  ;;  %4451 = vmatmul.msk.bf16.vlgmr.msrb.gmra.mxu3 %vm3214_vm0, %v7997_v47  ;;  %3340 = vmatpush.bf16.msrb.mxu0 %v4204_v13  ;;  %v4384_v23 = vor.u32 %v4575_v54, %v4381_v15  ;;  %v4365_v58 = vld [vmem:[#allocation2 + $0x198] sm:$0xf0]  ;;  %v4567_v36 = vld [vmem:[#allocation2 + $0x16c] sm:$0xf] }
 0x345   : > { %v4348_v32 = vor.u32 %v4569_v49, %v4347_v34  ;;  %3397 = vmatpush.bf16.msra.mxu3 %v4208_v50  ;;  %v4368_v5 = vor.u32 %v4571_v40, %v4365_v58  ;;  %v4349_v48 = vld [vmem:[#allocation2 + $0x178] sm:$0xf0]  ;;  %v4563_v14 = vld [vmem:[#allocation2 + $0x14c] sm:$0xf]  ;;  %v8132_v50 = vpop.permute.xlu2 %2806 }
 0x346   : > { %v4352_v2 = vor.u32 %v4567_v36, %v4349_v48  ;;  %v4333_v17 = vld [vmem:[#allocation2 + $0x158] sm:$0xf0]  ;;  %v4559_v43 = vld [vmem:[#allocation2 + $0x12c] sm:$0xf] }
 0x347   : > { %3358 = vmatpush.bf16.msrb.mxu2 %v4348_v32  ;;  %v4593_v46 = vld [vmem:[#allocation2 + $0x234] sm:$0xf0]  ;;  %v4445_v28 = vld [vmem:[#allocation2 + $0x238] sm:$0xf0]  ;;  %v4336_v3 = vor.u32 %v4563_v14, %v4333_v17  ;;  %v4555_v34 = vld [vmem:[#allocation2 + $0x10c] sm:$0xf] }
 0x348   : > { %3341 = vmatpush.bf16.msrb.mxu0 %v4188_v62  ;;  %v4317_v63 = vld [vmem:[#allocation2 + $0x138] sm:$0xf0] }
 0x349   : > { %3398 = vmatpush.bf16.msra.mxu3 %v4192_v57  ;;  %v4320_v49 = vor.u32 %v4559_v43, %v4317_v63  ;;  %v4301_v13 = vld [vmem:[#allocation2 + $0x118] sm:$0xf0] }
 0x34a   : > { %v4443_v52 = vld [vmem:[#allocation2 + $0x228] sm:$0xf]  ;;  %v4591_v12 = vld [vmem:[#allocation2 + $0x22c] sm:$0xf]  ;;  %v4304_v32 = vor.u32 %v4555_v34, %v4301_v13 }
 0x34b   : > { %3359 = vmatpush.bf16.msrb.mxu2 %v4332_v33  ;;  %v4444_v42 = vor.u32 %v4593_v46, %v4443_v52  ;;  %v4448_v38 = vor.u32 %v4591_v12, %v4445_v28  ;;  %v8141_v28 = vpop.permute.xlu1 %2816 }
 0x34c   : > { %3342 = vmatpush.bf16.msrb.mxu0 %v4172_v0 }
 0x34d   : > { %3379 = vmatpush.bf16.msra.mxu1 %v4444_v42  ;;  %3399 = vmatpush.bf16.msra.mxu3 %v4176_v30 }
 0x34e   : > { %3310 = vmatmul.bf16.gmra.mxu1 %v8066_v25 }
 0x34f   : > { %3360 = vmatpush.bf16.msrb.mxu2 %v4316_v22  ;;  %3343 = vmatmul.bf16.vlgmr.msrb.gmra.mxu0 %v7883_v59 }
 0x350   : > { %3411 = vmatpush.bf16.msra.mxu0 %v4416_v7 }
 0x351   : > { %4610 = vmatpush.bf16.msrb.mxu3 %v4448_v38  ;;  %3380 = vmatpush.bf16.msra.mxu1 %v4428_v51 }
 0x353   : > { %3361 = vmatpush.bf16.msrb.mxu2 %v4300_v41 }
 0x354   : > { %3412 = vmatpush.bf16.msra.mxu0 %v4400_v44  ;;  %4452 = vmatmul.msk.bf16.gmra.mxu3 %vm3214_vm0, %v8091_v55 }
 0x355   : > { %4602 = vmatpush.bf16.msrb.mxu1 %v4416_v7  ;;  %4611 = vmatpush.bf16.msrb.mxu3 %v4432_v20  ;;  %v8147_v7 = vpop.permute.xlu2 %2821 }
 0x356   : > { %3362 = vmatmul.bf16.vlgmr.msrb.gmra.mxu2 %v7943_v16 }
 0x357   : > { %3436 = vmatpush.bf16.msra.mxu2 %v4448_v38 }
 0x358   : > { %3413 = vmatpush.bf16.msra.mxu0 %v4384_v23 }
 0x359   : > { %4603 = vmatpush.bf16.msrb.mxu1 %v4400_v44 }
 0x35b   : > { %3437 = vmatpush.bf16.msra.mxu2 %v4432_v20 }
 0x35c   : > { %3414 = vmatpush.bf16.msra.mxu0 %v4368_v5 }
 0x35d   : > { %4604 = vmatpush.bf16.msrb.mxu1 %v4384_v23 }
 0x35e   : > { %4453 = vmatmul.msk.bf16.vlgmr.msra.gmra.mxu1 %vm3214_vm0, %v7997_v47 }
 0x35f   : > { %3348 = vmatmul.bf16.gmra.mxu0 %v8031_v6 }
 0x360   : > { %3415 = vmatpush.bf16.msra.mxu0 %v4352_v2 }
 0x361   : > { %4605 = vmatpush.bf16.msrb.mxu1 %v4368_v5 }
 0x364   : > { %3416 = vmatpush.bf16.msra.mxu0 %v4336_v3  ;;  %3400 = vmatmul.bf16.vlgmr.msra.gmra.mxu3 %v7883_v59 }
 0x365   : > { %4606 = vmatpush.bf16.msrb.mxu1 %v4352_v2 }
 0x366   : > { %3367 = vmatmul.bf16.gmra.mxu2 %v8066_v25 }
 0x368   : > { %3417 = vmatpush.bf16.msra.mxu0 %v4320_v49 }
 0x369   : > { %4607 = vmatpush.bf16.msrb.mxu1 %v4336_v3 }
 0x36c   : > { %3418 = vmatpush.bf16.msra.mxu0 %v4304_v32 }
 0x36d   : > { %4608 = vmatpush.bf16.msrb.mxu1 %v4320_v49 }
 0x36e   : > { %4454 = vmatmul.msk.bf16.gmra.mxu1 %vm3214_vm0, %v8091_v55 }
 0x36f   : > { %3419 = vmatmul.bf16.vlgmr.msra.gmra.mxu0 %v7943_v16 }
 0x371   : > { %4609 = vmatpush.bf16.msrb.mxu1 %v4304_v32 }
 0x374   : > { %3405 = vmatmul.bf16.gmra.mxu3 %v8031_v6 }
 0x376   : > { %4455 = vmatmul.msk.bf16.vlgmr.msra.gmra.mxu2 %vm3214_vm0, %v7997_v47 }
 0x37e   : > { %3424 = vmatmul.bf16.vlgmr.msrb.gmra.mxu1 %v8066_v25 }
 0x384   : > { %4456 = vmatmul.msk.bf16.vlgmr.msrb.gmra.mxu3 %vm3214_vm0, %v8091_v55 }
 0x38e   : > { %v3230_v59 = vpop.f32.mrf.mxu1 }
 0x38f   : > { %v3231_v21 = vadd.f32 %v3230_v59, %v8132_v50 }
 0x393   : > { %v3287_v19 = vpop.f32.mrf.mxu2 }
 0x394   : > { %v3288_v5 = vadd.f32 %v3287_v19, %v8132_v50 }
 0x396   : > { %v3232_v10 = vpop.f32.mrf.mxu1 }
 0x397   : > { %v3233_v6 = vadd.f32 %v3232_v10, %v8135_v27 }
 0x39b   : > { %v3289_v30 = vpop.f32.mrf.mxu2 }
 0x39d   : > { %v3249_v9 = vpop.f32.mrf.mxu3 }
 0x39e   : > { %v3250_v18 = vadd.f32 %v3249_v9, %v3231_v21 }
 0x3a4   : > { %v3268_v26 = vpop.f32.mrf.mxu0 }
 0x3a5   : > { %v3269_v16 = vadd.f32 %v3268_v26, %v3250_v18  ;;  %v3251_v62 = vpop.f32.mrf.mxu3 }
 0x3a6   : > { %v3252_v25 = vadd.f32 %v3251_v62, %v3233_v6 }
 0x3a7   : > { %v4457_v47 = vmul.f32 -1.442695, %v3269_v16  ;;  %v3235_v11 = vpop.f32.mrf.mxu1 }
 0x3a8   : > { %v3236_v52 = vadd.f32 %v3235_v11, %v8141_v28 }
 0x3a9   : > { %5225 = vpow2.f32 %v4457_v47 }
 0x3ac   : > { %v3270_v55 = vpop.f32.mrf.mxu0 }
 0x3ad   : > { %v8138_v61 = vadd.f32 %v3270_v55, %v3252_v25  ;;  %v3292_v49 = vpop.f32.mrf.mxu2 }
 0x3af   : > { %v5226_v46 = vpop.eup %5225  ;;  %v4461_v33 = vmul.f32 -1.442695, %v8138_v61  ;;  %v3237_v4 = vpop.f32.mrf.mxu1 }
 0x3b0   : > { %v3497_v57 = vadd.f32 1.0, %v5226_v46  ;;  %v3238_v53 = vadd.f32 %v3237_v4, %v8147_v7 }
 0x3b1   : > { %5227 = vpow2.f32 %v4461_v33 }
 0x3b2   : > { %5229 = vrcp.f32 %v3497_v57  ;;  %v3522_v45 = vand.u32 2147483647, %v3497_v57  ;;  %v3524_v8 = vand.u32 2147483648, %v3497_v57  ;;  %vm3518_vm14 = vweird.f32 %v3497_v57 }
 0x3b4   : > { %v3525_v20 = vor.u32 1.1754944e-38, %v3524_v8  ;;  %vm3523_vm9 = vcmp.eq.f32.partialorder %v3522_v45, 8.507059e+37 }
 0x3b7   : > { %v3254_v35 = vpop.f32.mrf.mxu3  ;;  %v3273_v12 = vpop.f32.mrf.mxu0 }
 0x3b8   : > { %v5228_v42 = vpop.eup %5227  ;;  %v3255_v37 = vadd.f32 %v3254_v35, %v3236_v52 }
 0x3b9   : > { %v5230_v60 = vpop.eup %5229  ;;  %v3501_v0 = vadd.f32 1.0, %v5228_v42 }
 0x3ba   : > { %v3514_v1 = vmul.f32 %v5230_v60, %v3497_v57  ;;  %v8144_v38 = vadd.f32 %v3273_v12, %v3255_v37  ;;  %vm3519_vm6 = vweird.f32 %v5230_v60  ;;  %v3294_v57 = vpop.f32.mrf.mxu2 }
 0x3bb   : > { %5231 = vrcp.f32 %v3501_v0  ;;  %v3306_v56 = vpop.f32.mrf.mxu1  ;;  %vm3520_vm8 = vmor %vm3518_vm14, %vm3519_vm6  ;;  %v3582_v17 = vand.u32 2147483647, %v3501_v0  ;;  %v3584_v3 = vand.u32 2147483648, %v3501_v0  ;;  %vm3578_vm13 = vweird.f32 %v3501_v0 }
 0x3bc   : > { %v3515_v22 = vsub.f32 1.0, %v3514_v1  ;;  %v4465_v39 = vmul.f32 -1.442695, %v8144_v38  ;;  %v3307_v13 = vadd.f32 %v3306_v56, %v3288_v5 }
 0x3bd   : > { %v3585_v21 = vor.u32 1.1754944e-38, %v3584_v3  ;;  %vm3583_vm0 = vcmp.eq.f32.partialorder %v3582_v17, 8.507059e+37 }
 0x3be   : > { %v3516_v31 = vmul.f32 %v5230_v60, %v3515_v22  ;;  %5233 = vpow2.f32 %v4465_v39 }
 0x3bf   : > { %v3256_v51 = vpop.f32.mrf.mxu3  ;;  %v3275_v24 = vpop.f32.mrf.mxu0 }
 0x3c0   : > { %v3517_v29 = vadd.f32 %v5230_v60, %v3516_v31  ;;  %v3257_v41 = vadd.f32 %v3256_v51, %v3238_v53 }
 0x3c1   : > { %v5232_v44 = vpop.eup %5231 }
 0x3c2   : > { %v3521_v54 = vsel %vm3520_vm8, %v5230_v60, %v3517_v29  ;;  %v3574_v15 = vmul.f32 %v5232_v44, %v3501_v0  ;;  %v8150_v23 = vadd.f32 %v3275_v24, %v3257_v41  ;;  %vm3579_vm10 = vweird.f32 %v5232_v44 }
 0x3c3   : > { %v3526_v40 = vsel %vm3523_vm9, %v3525_v20, %v3521_v54  ;;  %v3308_v14 = vpop.f32.mrf.mxu1  ;;  %vm3580_vm15 = vmor %vm3578_vm13, %vm3579_vm10  ;;  %v3293_v60 = vadd.f32 %v3292_v49, %v8141_v28 }
 0x3c4   : > { %v5234_v58 = vpop.eup %5233  ;;  %v3753_v36 = vmul.f32 %v3526_v40, %v3269_v16  ;;  %v3575_v48 = vsub.f32 1.0, %v3574_v15  ;;  %v4469_v2 = vmul.f32 -1.442695, %v8150_v23  ;;  %v3290_v16 = vadd.f32 %v3289_v30, %v8135_v27 }
 0x3c5   : > { %v3505_v63 = vadd.f32 1.0, %v5234_v58 }
 0x3c6   : > { %3769 = vst [vmem:[%s8155_s8] sm:$0xff] %v3753_v36  ;;  %v3576_v43 = vmul.f32 %v5232_v44, %v3575_v48  ;;  %5235 = vpow2.f32 %v4469_v2  ;;  %v3309_v55 = vadd.f32 %v3308_v14, %v3290_v16  ;;  %v3295_v36 = vadd.f32 %v3294_v57, %v8147_v7 }
 0x3c7   : > { %5237 = vrcp.f32 %v3505_v63  ;;  %v3325_v34 = vpop.f32.mrf.mxu3  ;;  %v3644_v52 = vand.u32 2147483648, %v3505_v63  ;;  %v3642_v42 = vand.u32 2147483647, %v3505_v63  ;;  %vm3638_vm3 = vweird.f32 %v3505_v63 }
 0x3c8   : > { %v3577_v32 = vadd.f32 %v5232_v44, %v3576_v43  ;;  %v8158_v59 = vadd.f32 %v3325_v34, %v3307_v13 }
 0x3c9   : > { %v3645_v30 = vor.u32 1.1754944e-38, %v3644_v52  ;;  %vm3643_vm5 = vcmp.eq.f32.partialorder %v3642_v42, 8.507059e+37 }
 0x3ca   : > { %v3581_v9 = vsel %vm3580_vm15, %v5232_v44, %v3577_v32  ;;  %v4458_v10 = vmul.f32 -1.442695, %v8158_v59 }
 0x3cb   : > { %v3586_v18 = vsel %vm3583_vm0, %v3585_v21, %v3581_v9  ;;  %v3311_v47 = vpop.f32.mrf.mxu1 }
 0x3cc   : > { %v5236_v26 = vpop.eup %5235  ;;  %v3757_v6 = vmul.f32 %v3586_v18, %v8138_v61  ;;  %5239 = vpow2.f32 %v4458_v10  ;;  %v3344_v4 = vpop.f32.mrf.mxu0  ;;  %v3312_v45 = vadd.f32 %v3311_v47, %v3293_v60 }
 0x3cd   : > { %v5238_v62 = vpop.eup %5237  ;;  %v3509_v25 = vadd.f32 1.0, %v5236_v26  ;;  %v3345_v24 = vadd.f32 %v3344_v4, %v8132_v50 }
 0x3ce   : > { %3773 = vst [vmem:[%s8155_s8 + $0x20] sm:$0xff] %v3757_v6  ;;  %v3634_v11 = vmul.f32 %v5238_v62, %v3505_v63  ;;  %vm3639_vm1 = vweird.f32 %v5238_v62 }
 0x3cf   : > { %5241 = vrcp.f32 %v3509_v25  ;;  %v3327_v46 = vpop.f32.mrf.mxu3  ;;  %vm3640_vm4 = vmor %vm3638_vm3, %vm3639_vm1  ;;  %v3702_v20 = vand.u32 2147483647, %v3509_v25  ;;  %v3704_v54 = vand.u32 2147483648, %v3509_v25  ;;  %vm3698_vm11 = vweird.f32 %v3509_v25 }
 0x3d0   : > { %v3635_v33 = vsub.f32 1.0, %v3634_v11  ;;  %v8164_v19 = vadd.f32 %v3327_v46, %v3309_v55 }
 0x3d1   : > { %vm3703_vm7 = vcmp.eq.f32.partialorder %v3702_v20, 8.507059e+37  ;;  %v3705_v3 = vor.u32 1.1754944e-38, %v3704_v54 }
 0x3d2   : > { %v5240_v35 = vpop.eup %5239  ;;  %v3636_v12 = vmul.f32 %v5238_v62, %v3635_v33  ;;  %v4462_v61 = vmul.f32 -1.442695, %v8164_v19 }
 0x3d3   : > { %v8167_v37 = vadd.f32 1.0, %v5240_v35  ;;  %v3313_v1 = vpop.f32.mrf.mxu1 }
 0x3d4   : > { %v3637_v0 = vadd.f32 %v5238_v62, %v3636_v12  ;;  %5243 = vpow2.f32 %v4462_v61  ;;  %v3346_v41 = vpop.f32.mrf.mxu0  ;;  %v3314_v49 = vadd.f32 %v3313_v1, %v3295_v36 }
 0x3d5   : > { %v5242_v22 = vpop.eup %5241  ;;  %5245 = vrcp.f32 %v8167_v37  ;;  %v3537_v32 = vand.u32 2147483647, %v8167_v37  ;;  %v3539_v21 = vand.u32 2147483648, %v8167_v37  ;;  %v3347_v6 = vadd.f32 %v3346_v41, %v8135_v27 }
 0x3d6   : > { %v3641_v39 = vsel %vm3640_vm4, %v5238_v62, %v3637_v0  ;;  %v3694_v56 = vmul.f32 %v5242_v22, %v3509_v25  ;;  %vm3699_vm2 = vweird.f32 %v5242_v22  ;;  %vm3533_vm14 = vweird.f32 %v8167_v37 }
 0x3d7   : > { %v3646_v8 = vsel %vm3643_vm5, %v3645_v30, %v3641_v39  ;;  %v3330_v31 = vpop.f32.mrf.mxu3  ;;  %vm3700_vm12 = vmor %vm3698_vm11, %vm3699_vm2  ;;  %vm3538_vm9 = vcmp.eq.f32.partialorder %v3537_v32, 8.507059e+37 }
 0x3d8   : > { %v3761_v53 = vmul.f32 %v3646_v8, %v8144_v38  ;;  %v3695_v51 = vsub.f32 1.0, %v3694_v56  ;;  %v8173_v29 = vadd.f32 %v3330_v31, %v3312_v45 }
 0x3d9   : > { %v3363_v44 = vpop.f32.mrf.mxu2 }
 0x3da   : > { %v5244_v15 = vpop.eup %5243  ;;  %3777 = vst [vmem:[%s8176_s22] sm:$0xff] %v3761_v53  ;;  %v3696_v40 = vmul.f32 %v5242_v22, %v3695_v51  ;;  %v4466_v58 = vmul.f32 -1.442695, %v8173_v29  ;;  %v3364_v5 = vadd.f32 %v3363_v44, %v3345_v24 }
 0x3db   : > { %v5246_v38 = vpop.eup %5245  ;;  %v8181_v48 = vadd.f32 1.0, %v5244_v15  ;;  %v3382_v17 = vpop.f32.mrf.mxu1 }
 0x3dc   : > { %v3697_v2 = vadd.f32 %v5242_v22, %v3696_v40  ;;  %v3529_v14 = vmul.f32 %v5246_v38, %v8167_v37  ;;  %5247 = vpow2.f32 %v4466_v58  ;;  %v8185_v13 = vadd.f32 %v3382_v17, %v3364_v5  ;;  %v3349_v47 = vpop.f32.mrf.mxu0 }
 0x3dd   : > { %5249 = vrcp.f32 %v8181_v48  ;;  %vm3534_vm6 = vweird.f32 %v5246_v38  ;;  %v3597_v60 = vand.u32 2147483647, %v8181_v48  ;;  %v3599_v0 = vand.u32 2147483648, %v8181_v48 }
 0x3de   : > { %v3701_v63 = vsel %vm3700_vm12, %v5242_v22, %v3697_v2  ;;  %v3530_v43 = vsub.f32 1.0, %v3529_v14  ;;  %v4459_v26 = vmul.f32 -1.442695, %v8185_v13  ;;  %vm3535_vm8 = vmor %vm3533_vm14, %vm3534_vm6  ;;  %v3350_v39 = vadd.f32 %v3349_v47, %v8141_v28 }
 0x3df   : > { %v3706_v34 = vsel %vm3703_vm7, %v3705_v3, %v3701_v63  ;;  %v3332_v9 = vpop.f32.mrf.mxu3  ;;  %vm3593_vm13 = vweird.f32 %v8181_v48  ;;  %v3600_v41 = vor.u32 1.1754944e-38, %v3599_v0  ;;  %vm3598_vm0 = vcmp.eq.f32.partialorder %v3597_v60, 8.507059e+37 }
 0x3e0   : > { %v3765_v10 = vmul.f32 %v3706_v34, %v8150_v23  ;;  %v3531_v18 = vmul.f32 %v5246_v38, %v3530_v43  ;;  %v8191_v16 = vadd.f32 %v3332_v9, %v3314_v49  ;;  %5251 = vpow2.f32 %v4459_v26 }
 0x3e1   : > { %v3365_v62 = vpop.f32.mrf.mxu2  ;;  %v3540_v23 = vor.u32 1.1754944e-38, %v3539_v21 }
 0x3e2   : > { %v5248_v25 = vpop.eup %5247  ;;  %3781 = vst [vmem:[%s8176_s22 + $0x20] sm:$0xff] %v3765_v10  ;;  %v3532_v11 = vadd.f32 %v5246_v38, %v3531_v18  ;;  %v4470_v55 = vmul.f32 -1.442695, %v8191_v16  ;;  %v3366_v57 = vadd.f32 %v3365_v62, %v3347_v6 }
 0x3e3   : > { %v5250_v46 = vpop.eup %5249  ;;  %v8198_v33 = vadd.f32 1.0, %v5248_v25  ;;  %v3384_v35 = vpop.f32.mrf.mxu1 }
 0x3e4   : > { %v3536_v4 = vsel %vm3535_vm8, %v5246_v38, %v3532_v11  ;;  %v3589_v52 = vmul.f32 %v5250_v46, %v8181_v48  ;;  %5253 = vpow2.f32 %v4470_v55  ;;  %v8203_v37 = vadd.f32 %v3384_v35, %v3366_v57 }
 0x3e5   : > { %v3541_v12 = vsel %vm3538_vm9, %v3540_v23, %v3536_v4  ;;  %5255 = vrcp.f32 %v8198_v33  ;;  %vm3594_vm10 = vweird.f32 %v5250_v46  ;;  %v3659_v36 = vand.u32 2147483648, %v8198_v33 }
 0x3e6   : > { %v3754_v42 = vmul.f32 %v3541_v12, %v8158_v59  ;;  %v3590_v61 = vsub.f32 1.0, %v3589_v52  ;;  %v5252_v22 = vpop.eup %5251  ;;  %v4463_v56 = vmul.f32 -1.442695, %v8203_v37  ;;  %v3351_v59 = vpop.f32.mrf.mxu0  ;;  %vm3595_vm15 = vmor %vm3593_vm13, %vm3594_vm10  ;;  %v3657_v3 = vand.u32 2147483647, %v8198_v33 }
 0x3e7   : > { %v8207_v1 = vpop.f32.mrf.mxu3  ;;  %v8212_v45 = vadd.f32 1.0, %v5252_v22  ;;  %vm3653_vm3 = vweird.f32 %v8198_v33  ;;  %v3352_v32 = vadd.f32 %v3351_v59, %v8147_v7  ;;  %v3660_v21 = vor.u32 1.1754944e-38, %v3659_v36 }
 0x3e8   : > { %3770 = vst [vmem:[%s8155_s8 + $0x8] sm:$0xff] %v3754_v42  ;;  %v3591_v30 = vmul.f32 %v5250_v46, %v3590_v61  ;;  %5257 = vpow2.f32 %v4463_v56  ;;  %vm3658_vm5 = vcmp.eq.f32.partialorder %v3657_v3, 8.507059e+37  ;;  %v3402_v35 = vadd.f32 %v8207_v1, %v8132_v50 }
 0x3e9   : > { %v3368_v8 = vpop.f32.mrf.mxu2  ;;  %5259 = vrcp.f32 %v8212_v45  ;;  %v3552_v9 = vand.u32 2147483647, %v8212_v45  ;;  %v3554_v11 = vand.u32 2147483648, %v8212_v45  ;;  %vm3548_vm11 = vweird.f32 %v8212_v45 }
 0x3ea   : > { %v5254_v31 = vpop.eup %5253  ;;  %v3592_v53 = vadd.f32 %v5250_v46, %v3591_v30  ;;  %v3369_v51 = vadd.f32 %v3368_v8, %v3350_v39 }
 0x3eb   : > { %v5256_v24 = vpop.eup %5255  ;;  %v8217_v54 = vadd.f32 1.0, %v5254_v31  ;;  %v3387_v15 = vpop.f32.mrf.mxu1  ;;  %vm8240_vm12 = vcmp.eq.f32.partialorder %v3552_v9, 8.507059e+37  ;;  %v3555_v22 = vor.u32 1.1754944e-38, %v3554_v11 }
 0x3ec   : > { %v3596_v44 = vsel %vm3595_vm15, %v5250_v46, %v3592_v53  ;;  %v3649_v20 = vmul.f32 %v5256_v24, %v8198_v33  ;;  %v8219_v58 = vadd.f32 %v3387_v15, %v3369_v51  ;;  %vm3654_vm1 = vweird.f32 %v5256_v24 }
 0x3ed   : > { %v3601_v40 = vsel %vm3598_vm0, %v3600_v41, %v3596_v44  ;;  %5261 = vrcp.f32 %v8217_v54  ;;  %vm3655_vm4 = vmor %vm3653_vm3, %vm3654_vm1  ;;  %v3719_v42 = vand.u32 2147483648, %v8217_v54  ;;  %v3717_v39 = vand.u32 2147483647, %v8217_v54 }
 0x3ee   : > { %v3758_v5 = vmul.f32 %v3601_v40, %v8164_v19  ;;  %v3650_v38 = vsub.f32 1.0, %v3649_v20  ;;  %v4467_v48 = vmul.f32 -1.442695, %v8219_v58  ;;  %v5258_v14 = vpop.eup %5257  ;;  %v3420_v10 = vpop.f32.mrf.mxu0  ;;  %vm3713_vm14 = vweird.f32 %v8217_v54 }
 0x3ef   : > { %v3403_v2 = vpop.f32.mrf.mxu3  ;;  %v5260_v63 = vpop.eup %5259  ;;  %v8227_v43 = vadd.f32 1.0, %v5258_v14  ;;  %v3421_v31 = vadd.f32 %v3420_v10, %v3402_v35  ;;  %v3720_v51 = vor.u32 1.1754944e-38, %v3719_v42  ;;  %vm3718_vm9 = vcmp.eq.f32.partialorder %v3717_v39, 8.507059e+37 }
 0x3f0   : > { %3774 = vst [vmem:[%s8155_s8 + $0x28] sm:$0xff] %v3758_v5  ;;  %v3651_v17 = vmul.f32 %v5256_v24, %v3650_v38  ;;  %5263 = vpow2.f32 %v4467_v48  ;;  %v3544_v34 = vmul.f32 %v5260_v63, %v8212_v45  ;;  %vm3549_vm2 = vweird.f32 %v5260_v63 }
 0x3f1   : > { %v3370_v49 = vpop.f32.mrf.mxu2  ;;  %5265 = vrcp.f32 %v8227_v43  ;;  %vm3550_vm7 = vmor %vm3548_vm11, %vm3549_vm2  ;;  %v3404_v8 = vadd.f32 %v3403_v2, %v8135_v27  ;;  %v3614_v44 = vand.u32 2147483648, %v8227_v43  ;;  %v3612_v27 = vand.u32 2147483647, %v8227_v43 }
 0x3f2   : > { %v3652_v19 = vadd.f32 %v5256_v24, %v3651_v17  ;;  %v3545_v6 = vsub.f32 1.0, %v3544_v34  ;;  %v3371_v47 = vadd.f32 %v3370_v49, %v3352_v32  ;;  %vm3608_vm13 = vweird.f32 %v8227_v43 }
 0x3f3   : > { %v5262_v18 = vpop.eup %5261  ;;  %v3389_v62 = vpop.f32.mrf.mxu1  ;;  %v3615_v14 = vor.u32 1.1754944e-38, %v3614_v44  ;;  %vm3613_vm0 = vcmp.eq.f32.partialorder %v3612_v27, 8.507059e+37 }
 0x3f4   : > { %v3656_v26 = vsel %vm3655_vm4, %v5256_v24, %v3652_v19  ;;  %v3709_v55 = vmul.f32 %v5262_v18, %v8217_v54  ;;  %v3546_v23 = vmul.f32 %v5260_v63, %v3545_v6  ;;  %v8237_v33 = vadd.f32 %v3389_v62, %v3371_v47 }
 0x3f5   : > { %v3661_v25 = vsel %vm3658_vm5, %v3660_v21, %v3656_v26  ;;  %vm3714_vm6 = vweird.f32 %v5262_v18 }
 0x3f6   : > { %v3762_v46 = vmul.f32 %v3661_v25, %v8173_v29  ;;  %v5264_v57 = vpop.eup %5263  ;;  %v3710_v52 = vsub.f32 1.0, %v3709_v55  ;;  %v3547_v12 = vadd.f32 %v5260_v63, %v3546_v23  ;;  %v4471_v61 = vmul.f32 -1.442695, %v8237_v33  ;;  %vm3715_vm8 = vmor %vm3713_vm14, %vm3714_vm6  ;;  %v3422_v20 = vpop.f32.mrf.mxu0 }
 0x3f7   : > { %v8248_v29 = vadd.f32 1.0, %v5264_v57  ;;  %v3406_v60 = vpop.f32.mrf.mxu3  ;;  %v5266_v0 = vpop.eup %5265  ;;  %v3423_v48 = vadd.f32 %v3422_v20, %v3404_v8 }
 0x3f8   : > { %3778 = vst [vmem:[%s8176_s22 + $0x8] sm:$0xff] %v3762_v46  ;;  %v3711_v30 = vmul.f32 %v5262_v18, %v3710_v52  ;;  %v3551_v45 = vsel %vm3550_vm7, %v5260_v63, %v3547_v12  ;;  %v3604_v50 = vmul.f32 %v5266_v0, %v8227_v43  ;;  %vm3609_vm10 = vweird.f32 %v5266_v0 }
 0x3f9   : > { %v3439_v56 = vpop.f32.mrf.mxu2  ;;  %5267 = vrcp.f32 %v8248_v29  ;;  %v3556_v1 = vsel %vm8240_vm12, %v3555_v22, %v3551_v45  ;;  %vm3610_vm15 = vmor %vm3608_vm13, %vm3609_vm10  ;;  %v3674_v9 = vand.u32 2147483648, %v8248_v29  ;;  %v3407_v10 = vadd.f32 %v3406_v60, %v8141_v28 }
 0x3fa   : > { %v3712_v59 = vadd.f32 %v5262_v18, %v3711_v30  ;;  %v3755_v53 = vmul.f32 %v3556_v1, %v8185_v13  ;;  %v3605_v24 = vsub.f32 1.0, %v3604_v50  ;;  %5269 = vpow2.f32 %v4471_v61 }
 0x3fb   : > { %v8260_v54 = vadd.f32 %v3439_v56, %v3421_v31  ;;  %v3425_v21 = vpop.f32.mrf.mxu1  ;;  %v3672_v6 = vand.u32 2147483647, %v8248_v29  ;;  %vm3668_vm3 = vweird.f32 %v8248_v29 }
 0x3fc   : > { %v3716_v41 = vsel %vm3715_vm8, %v5262_v18, %v3712_v59  ;;  %3771 = vst [vmem:[%s8155_s8 + $0x10] sm:$0xff] %v3755_v53  ;;  %v3606_v40 = vmul.f32 %v5266_v0, %v3605_v24  ;;  %v3426_v25 = vadd.f32 %v3425_v21, %v3407_v10 }
 0x3fd   : > { %v3721_v15 = vsel %vm3718_vm9, %v3720_v51, %v3716_v41  ;;  %v4460_v5 = vmul.f32 -1.442695, %v8260_v54  ;;  %vm3673_vm5 = vcmp.eq.f32.partialorder %v3672_v6, 8.507059e+37 }
 0x3fe   : > { %v3766_v13 = vmul.f32 %v3721_v15, %v8191_v16  ;;  %v3607_v36 = vadd.f32 %v5266_v0, %v3606_v40 }
 0x3ff   : > { %v5268_v38 = vpop.eup %5267  ;;  %v3408_v2 = vpop.f32.mrf.mxu3  ;;  %5271 = vpow2.f32 %v4460_v5 }
 0x400   : > { %3782 = vst [vmem:[%s8176_s22 + $0x28] sm:$0xff] %v3766_v13  ;;  %v3664_v17 = vmul.f32 %v5268_v38, %v8248_v29  ;;  %v5270_v63 = vpop.eup %5269  ;;  %v3611_v49 = vsel %vm3610_vm15, %v5266_v0, %v3607_v36  ;;  %vm3669_vm1 = vweird.f32 %v5268_v38  ;;  %v3409_v60 = vadd.f32 %v3408_v2, %v8147_v7 }
 0x401   : > { %v3441_v3 = vpop.f32.mrf.mxu2  ;;  %v3616_v19 = vsel %vm3613_vm0, %v3615_v14, %v3611_v49  ;;  %v3511_v32 = vadd.f32 1.0, %v5270_v63  ;;  %vm3670_vm4 = vmor %vm3668_vm3, %vm3669_vm1 }
 0x402   : > { %v8269_v16 = vadd.f32 %v3441_v3, %v3423_v48  ;;  %v3665_v34 = vsub.f32 1.0, %v3664_v17  ;;  %v3759_v43 = vmul.f32 %v3616_v19, %v8203_v37  ;;  %v3675_v37 = vor.u32 1.1754944e-38, %v3674_v9 }
 0x403   : > { %5273 = vrcp.f32 %v3511_v32  ;;  %v3427_v29 = vpop.f32.mrf.mxu1  ;;  %v3732_v0 = vand.u32 2147483647, %v3511_v32  ;;  %v3734_v22 = vand.u32 2147483648, %v3511_v32  ;;  %vm3728_vm11 = vweird.f32 %v3511_v32 }
 0x404   : > { %v4464_v18 = vmul.f32 -1.442695, %v8269_v16  ;;  %v3666_v26 = vmul.f32 %v5268_v38, %v3665_v34  ;;  %3775 = vst [vmem:[%s8155_s8 + $0x30] sm:$0xff] %v3759_v43 }
 0x405   : > { %v5272_v47 = vpop.eup %5271  ;;  %vm3733_vm7 = vcmp.eq.f32.partialorder %v3732_v0, 8.507059e+37  ;;  %v3735_v8 = vor.u32 1.1754944e-38, %v3734_v22 }
 0x406   : > { %5275 = vpow2.f32 %v4464_v18  ;;  %v3667_v62 = vadd.f32 %v5268_v38, %v3666_v26  ;;  %v3500_v11 = vadd.f32 1.0, %v5272_v47 }
 0x407   : > { %v3444_v55 = vpop.f32.mrf.mxu3 }
 0x408   : > { %v3671_v28 = vsel %vm3670_vm4, %v5268_v38, %v3667_v62  ;;  %v8278_v46 = vadd.f32 %v3444_v55, %v3426_v25  ;;  %5277 = vrcp.f32 %v3500_v11  ;;  %v3569_v53 = vand.u32 2147483648, %v3500_v11 }
 0x409   : > { %v3676_v23 = vsel %vm3673_vm5, %v3675_v37, %v3671_v28  ;;  %v5274_v57 = vpop.eup %5273  ;;  %v3567_v15 = vand.u32 2147483647, %v3500_v11  ;;  %vm3563_vm14 = vweird.f32 %v3500_v11 }
 0x40a   : > { %v3763_v4 = vmul.f32 %v3676_v23, %v8219_v58  ;;  %v4468_v52 = vmul.f32 -1.442695, %v8278_v46  ;;  %v3724_v12 = vmul.f32 %v5274_v57, %v3511_v32  ;;  %vm3729_vm2 = vweird.f32 %v5274_v57 }
 0x40b   : > { %v3428_v58 = vadd.f32 %v3427_v29, %v3409_v60  ;;  %vm3730_vm12 = vmor %vm3728_vm11, %vm3729_vm2  ;;  %v3570_v5 = vor.u32 1.1754944e-38, %v3569_v53  ;;  %vm3568_vm9 = vcmp.eq.f32.partialorder %v3567_v15, 8.507059e+37 }
 0x40c   : > { %v5276_v35 = vpop.eup %5275  ;;  %3779 = vst [vmem:[%s8176_s22 + $0x10] sm:$0xff] %v3763_v4  ;;  %5279 = vpow2.f32 %v4468_v52  ;;  %v3725_v61 = vsub.f32 1.0, %v3724_v12 }
 0x40d   : > { %v8283_v42 = vadd.f32 1.0, %v5276_v35 }
 0x40e   : > { %v5278_v30 = vpop.eup %5277  ;;  %v3726_v39 = vmul.f32 %v5274_v57, %v3725_v61 }
 0x40f   : > { %5281 = vrcp.f32 %v8283_v42  ;;  %v3446_v56 = vpop.f32.mrf.mxu3  ;;  %v3559_v45 = vmul.f32 %v5278_v30, %v3500_v11  ;;  %vm3564_vm6 = vweird.f32 %v5278_v30  ;;  %v3629_v48 = vand.u32 2147483648, %v8283_v42 }
 0x410   : > { %v3727_v50 = vadd.f32 %v5274_v57, %v3726_v39  ;;  %v8287_v1 = vadd.f32 %v3446_v56, %v3428_v58  ;;  %vm3565_vm8 = vmor %vm3563_vm14, %vm3564_vm6  ;;  %v3627_v14 = vand.u32 2147483647, %v8283_v42  ;;  %vm3623_vm13 = vweird.f32 %v8283_v42 }
 0x411   : > { %v3560_v7 = vsub.f32 1.0, %v3559_v45  ;;  %v3630_v49 = vor.u32 1.1754944e-38, %v3629_v48 }
 0x412   : > { %v5280_v59 = vpop.eup %5279  ;;  %v3731_v31 = vsel %vm3730_vm12, %v5274_v57, %v3727_v50  ;;  %v4472_v24 = vmul.f32 -1.442695, %v8287_v1  ;;  %vm3628_vm0 = vcmp.eq.f32.partialorder %v3627_v14, 8.507059e+37 }
 0x413   : > { %v8289_v51 = vadd.f32 1.0, %v5280_v59  ;;  %v3736_v44 = vsel %vm3733_vm7, %v3735_v8, %v3731_v31  ;;  %v3561_v20 = vmul.f32 %v5278_v30, %v3560_v7 }
 0x414   : > { %v3767_v40 = vmul.f32 %v3736_v44, %v8237_v33 }
 0x415   : > { %v5282_v41 = vpop.eup %5281  ;;  %5283 = vrcp.f32 %v8289_v51  ;;  %v3562_v13 = vadd.f32 %v5278_v30, %v3561_v20  ;;  %v3689_v10 = vand.u32 2147483648, %v8289_v51  ;;  %v3687_v26 = vand.u32 2147483647, %v8289_v51 }
 0x416   : > { %v3619_v27 = vmul.f32 %v5282_v41, %v8283_v42  ;;  %3783 = vst [vmem:[%s8176_s22 + $0x30] sm:$0xff] %v3767_v40  ;;  %5285 = vpow2.f32 %v4472_v24  ;;  %vm3624_vm10 = vweird.f32 %v5282_v41  ;;  %vm3683_vm3 = vweird.f32 %v8289_v51 }
 0x417   : > { %v3566_v36 = vsel %vm3565_vm8, %v5278_v30, %v3562_v13  ;;  %vm3625_vm15 = vmor %vm3623_vm13, %vm3624_vm10 }
 0x418   : > { %v3620_v38 = vsub.f32 1.0, %v3619_v27  ;;  %v3571_v33 = vsel %vm3568_vm9, %v3570_v5, %v3566_v36 }
 0x419   : > { %v3756_v17 = vmul.f32 %v3571_v33, %v8260_v54 }
 0x41a   : > { %v3621_v2 = vmul.f32 %v5282_v41, %v3620_v38 }
 0x41b   : > { %v5284_v3 = vpop.eup %5283  ;;  %3772 = vst [vmem:[%s8155_s8 + $0x18] sm:$0xff] %v3756_v17 }
 0x41c   : > { %v3622_v63 = vadd.f32 %v5282_v41, %v3621_v2  ;;  %v3679_v19 = vmul.f32 %v5284_v3, %v8289_v51  ;;  %v5286_v34 = vpop.eup %5285  ;;  %vm3684_vm1 = vweird.f32 %v5284_v3 }
 0x41d   : > { %v3512_v54 = vadd.f32 1.0, %v5286_v34 }
 0x41e   : > { %v3626_v32 = vsel %vm3625_vm15, %v5282_v41, %v3622_v63  ;;  %v3680_v43 = vsub.f32 1.0, %v3679_v19 }
 0x41f   : > { %v3631_v21 = vsel %vm3628_vm0, %v3630_v49, %v3626_v32  ;;  %5287 = vrcp.f32 %v3512_v54 }
 0x420   : > { %v3760_v9 = vmul.f32 %v3631_v21, %v8269_v16  ;;  %v3681_v18 = vmul.f32 %v5284_v3, %v3680_v43 }
 0x422   : > { %3776 = vst [vmem:[%s8155_s8 + $0x38] sm:$0xff] %v3760_v9  ;;  %v3682_v6 = vadd.f32 %v5284_v3, %v3681_v18 }
 0x423   : > { %5350 = shalt.err (!%p5347_p7)
}
 0x424   : > { %s5435_s8 = smov 512   ;;  %s5436_s15 = smov 1024   ;;  %vm3685_vm4 = vmor %vm3683_vm3, %vm3684_vm1  ;;  %v3690_v16 = vor.u32 1.1754944e-38, %v3689_v10  ;;  %vm3688_vm5 = vcmp.eq.f32.partialorder %v3687_v26, 8.507059e+37  ;;  %v3749_v28 = vand.u32 2147483648, %v3512_v54  ;;  %vm3743_vm11 = vweird.f32 %v3512_v54 }
 0x425   : > { %s5437_s10 = smov 32   ;;  %v3686_v47 = vsel %vm3685_vm4, %v5284_v3, %v3682_v6  ;;  %v5288_v25 = vpop.eup %5287  ;;  %v3747_v57 = vand.u32 2147483647, %v3512_v54  ;;  %s3820_s17 = sshll.u32 %s8176_s22, 4  ;;  %s3821_s17 = int_to_ptr.vmem [resolvable:$true] %s3820_s17 }
 0x426   : > { %4614 = dma.vmem_to_hbm [thread:$0]  (%p5528_p11), %s8309_s12, 1024, %s3806_s29, %s3786_s19, %s5435_s8, %s5436_s15, %s5437_s10   ;;  %v3691_v62 = vsel %vm3688_vm5, %v3690_v16, %v3686_v47  ;;  %v3739_v11 = vmul.f32 %v5288_v25, %v3512_v54  ;;  %vm3744_vm2 = vweird.f32 %v5288_v25 }
 0x427   : > { %v3764_v37 = vmul.f32 %v3691_v62, %v8278_v46  ;;  %s8780_s12 = sshll.u32 %s5499_s28, 5  ;;  %vm3745_vm12 = vmor %vm3743_vm11, %vm3744_vm2  ;;  %v3750_v46 = vor.u32 1.1754944e-38, %v3749_v28  ;;  %vm3748_vm7 = vcmp.eq.f32.partialorder %v3747_v57, 8.507059e+37  ;;  %s3791_s28 = scalar_lea.sflag [#allocation8], %s5562_s16 }
 0x428   : > { %v3740_v55 = vsub.f32 1.0, %v3739_v11  ;;  %s3819_s20 = scalar_lea.hbm %s8383_s7, %s8780_s12  ;;  %s5371_s12 = scalar_lea.hbm %s8383_s7, 128 }
 0x429   : > { %3780 = vst [vmem:[%s8176_s22 + $0x18] sm:$0xff] %v3764_v37  ;;  %s3822_s21 = sshll.u32 %s3819_s20, 4  ;;  %s3823_s21 = int_to_ptr.hbm [resolvable:$true] %s3822_s21 }
 0x42a   : > { %v3741_v23 = vmul.f32 %v5288_v25, %v3740_v55  ;;  %s5365_s11 = sshra.s32 %s3823_s21, 4  ;;  %s5366_s11 = int_to_ptr.hbm [resolvable:$true] %s5365_s11 }
 0x42b   : > { %s5367_s23 = scalar_lea.hbm %s5366_s11, 64  ;;  %p5372_p2 = scmp.lt.s32.totalorder %s5366_s11, %s8383_s7 }
 0x42c   : > { %v3742_v4 = vadd.f32 %v5288_v25, %v3741_v23  ;;  %p5368_p8 = scmp.ne.s32.totalorder %s5366_s11, %s5367_s23  ;;  %p5373_p6 = scmp.lt.s32.totalorder %s5371_s12, %s5367_s23 }
 0x42e   : > { %v3746_v52 = vsel %vm3745_vm12, %v5288_v25, %v3742_v4  ;;  %p5369_p10 = pnand %p5368_p8, %p5528_p11  ;;  %p5374_p13 = por %p5373_p6, %p5372_p2 }
 0x42f   : > { %v3751_v35 = vsel %vm3748_vm7, %v3750_v46, %v3746_v52 }
 0x430   : > { %v3768_v12 = vmul.f32 %v3751_v35, %v8287_v1  ;;  %p5370_p1 = pneg %p5369_p10 }
 0x432   : > { %3784 = vst [vmem:[%s8176_s22 + $0x38] sm:$0xff] %v3768_v12  ;;  %p5375_p0 = pnand %p5374_p13, %p5370_p1 }
 0x434   : > { %5378 = shalt.err (!%p5375_p0)
}
 0x435   : > { %4615 = dma.vmem_to_hbm [thread:$0]  (%p5528_p11), %s3821_s17, 1024, %s3823_s21, %s3791_s28, %s5435_s8, %s5436_s15, %s5437_s10  }
 0x436 PF: > { %s3837_s16 = sand.u32 1, %s5409_s24   ;;  %p4623_p3 = pnand %p3931_p9, %p5532_p12 }
 0x437   : > { %s3838_s22 = scalar_lea.sflag [#allocation5], %s3837_s16 }
 0x438   : > { %p4624_p4 = pneg %p4623_p3 }
 0x43a   : > { %5400 = dma.done.wait (%p4624_p4), %s3838_s22, 1024  }
 0x43b   : > { %5402 = vsyncadd (%p4624_p4), %s3838_s22, 4294966272  ;;  %s3848_s20 = scalar_lea.sflag [#allocation8], %s3837_s16 }
 0x43c   : > { %5404 = dma.done.wait (%p4624_p4), %s3848_s20, 1024  }
 0x43d   : > { %5406 = vsyncadd (%p4624_p4), %s3848_s20, 4294966272  ;;  %s8781_s13 = sld [smem:[#allocation12_spill]]  ;;  %p24_p11 = scmp.ge.s32.totalorder %s5503_s30, 4  }
 0x43e   : > { %s8782_s24 = smov %s5413_s25  ;;  %s8783_s25 = smov %s5417_s26 }
 0x43f   : > { %s8785_s27 = smov %s5503_s30  ;;  %26 = sbr.rel (!%p24_p11) target bundleno = 7 (0x7), region = 113 }
 0x443   : > { %s8784_s26 = smov %s8781_s13 }
 0x444   :  { %3854 = vsyncpa [#allocation4], 1 }
 0x445   :  { %3856 = vsyncpa [#allocation4 + $0x1], 1 }
 0x446   :  { %3857 = vsyncpa [#allocation5], 1 }
 0x447   :  { %3859 = vsyncpa [#allocation5 + $0x1], 1 }
 0x448   :  { %3860 = vsyncpa [#allocation8], 1 }
 0x449   :  { %3862 = vsyncpa [#allocation8 + $0x1], 1 }

</bundles_post_ra>
